<compile_context>
chip_gen: v7x
topology: tpu7x:2x2x1
jax: 0.10.0
libtpu: 0.0.40
codegen_flags: <defaults>
</compile_context>

<pallas_src>
import functools

import jax
import jax.numpy as jnp
from jax import lax
from jax.experimental import pallas as pl
from jax.experimental.pallas import tpu as pltpu

EPS = 1e-5        # PyTorch BatchNorm1d default eps
LANE = 128        # lane-dense feature padding
ROW_TILE = 128    # node/row tile (2 tiles at N=256 -> both v7x TCs used)


# ----------------------------- kernel bodies -----------------------------

def _combine_stats(ps_ref, pq_ref, d, n_tiles, inv_n, eps):
    """Combine per-row-tile partial column sums into (mean, rstd), each (1, d)."""
    ps = ps_ref[...]                       # (1, n_tiles * d)
    pq = pq_ref[...]
    s = ps[:, 0:d]
    q = pq[:, 0:d]
    for t in range(1, n_tiles):            # n_tiles is tiny and static
        s = s + ps[:, t * d:(t + 1) * d]
        q = q + pq[:, t * d:(t + 1) * d]
    mean = s * inv_n
    var = jnp.maximum(q * inv_n - mean * mean, 0.0)   # biased batch variance
    rstd = lax.rsqrt(var + eps)
    return mean, rstd


def _block_first_kernel(x_ref, a_ref, w_ref, z_ref, psum_ref, psq_ref, *, tm):
    """Block 1: z = relu((fadj_tile @ x) @ W); emit per-tile BN partials."""
    t = jnp.dot(a_ref[...], x_ref[...], preferred_element_type=jnp.float32)
    z = jnp.dot(t, w_ref[...], preferred_element_type=jnp.float32)
    z = jnp.maximum(z, 0.0)                # relu(leaky_relu(z, 0.2)) == relu(z)
    z_ref[...] = z
    ones = jnp.ones((1, tm), jnp.float32)  # column sums on the MXU
    psum_ref[...] = jnp.dot(ones, z, preferred_element_type=jnp.float32)
    psq_ref[...] = jnp.dot(ones, z * z, preferred_element_type=jnp.float32)


def _block_mid_kernel(zp_ref, ps_ref, pq_ref, a_ref, w_ref,
                      hprev_ref, z_ref, psum_ref, psq_ref,
                      *, inv_n, eps, n_tiles, d_prev, tm):
    """Blocks 2..L: BN(prev z) -> h_prev (stored) -> GCN -> relu -> BN partials."""
    i = pl.program_id(0)
    mean, rstd = _combine_stats(ps_ref, pq_ref, d_prev, n_tiles, inv_n, eps)

    # BatchNorm1d(affine=False) of the previous block's pre-norm output.
    h_full = (zp_ref[...] - mean) * rstd                       # (Np, d_prev)
    row0 = pl.multiple_of(i * tm, tm)
    hprev_ref[...] = (zp_ref[pl.ds(row0, tm), :] - mean) * rstd

    # GCN: (fadj_tile @ h) @ W, then relu (== relu . leaky_relu(0.2)).
    t = jnp.dot(a_ref[...], h_full, preferred_element_type=jnp.float32)
    z = jnp.dot(t, w_ref[...], preferred_element_type=jnp.float32)
    z = jnp.maximum(z, 0.0)
    z_ref[...] = z

    ones = jnp.ones((1, tm), jnp.float32)
    psum_ref[...] = jnp.dot(ones, z, preferred_element_type=jnp.float32)
    psq_ref[...] = jnp.dot(ones, z * z, preferred_element_type=jnp.float32)


def _bn_finalize_kernel(z_ref, ps_ref, pq_ref, h_ref, *, inv_n, eps, n_tiles, d):
    """Final block's BatchNorm: h = (z - mean) * rstd."""
    mean, rstd = _combine_stats(ps_ref, pq_ref, d, n_tiles, inv_n, eps)
    h_ref[...] = (z_ref[...] - mean) * rstd


# ----------------------------- pallas_call wrappers -----------------------------

def _round_up(n, m):
    return ((n + m - 1) // m) * m


def _pad2d(a, rows, cols):
    r, c = a.shape
    if r == rows and c == cols:
        return a
    return jnp.pad(a, ((0, rows - r), (0, cols - c)))


def _first_block_call(x_pad, adj_pad, w_pad, *, n_tiles, tm):
    n_p, d_in = x_pad.shape
    d_out = w_pad.shape[1]
    kernel = functools.partial(_block_first_kernel, tm=tm)
    return pl.pallas_call(
        kernel,
        out_shape=(jax.ShapeDtypeStruct((n_p, d_out), jnp.float32),
                   jax.ShapeDtypeStruct((1, n_tiles * d_out), jnp.float32),
                   jax.ShapeDtypeStruct((1, n_tiles * d_out), jnp.float32)),
        grid_spec=pltpu.PrefetchScalarGridSpec(
            num_scalar_prefetch=0,
            grid=(n_tiles,),
            in_specs=[pl.BlockSpec((n_p, d_in), lambda i: (0, 0)),     # x (resident)
                      pl.BlockSpec((tm, n_p), lambda i: (i, 0)),       # fadj row tile
                      pl.BlockSpec((d_in, d_out), lambda i: (0, 0))],  # W (resident)
            out_specs=(pl.BlockSpec((tm, d_out), lambda i: (i, 0)),    # z tile
                       pl.BlockSpec((1, d_out), lambda i: (0, i)),     # per-tile sum
                       pl.BlockSpec((1, d_out), lambda i: (0, i)))),   # per-tile sumsq
        compiler_params=pltpu.CompilerParams(
            dimension_semantics=("parallel",)),
    )(x_pad, adj_pad, w_pad)


def _mid_block_call(z_prev, ps_prev, pq_prev, adj_pad, w_pad, *, n_tiles, tm, inv_n):
    n_p, d_prev = z_prev.shape
    d_out = w_pad.shape[1]
    kernel = functools.partial(_block_mid_kernel, inv_n=inv_n, eps=EPS,
                               n_tiles=n_tiles, d_prev=d_prev, tm=tm)
    return pl.pallas_call(
        kernel,
        out_shape=(jax.ShapeDtypeStruct((n_p, d_prev), jnp.float32),        # h_prev
                   jax.ShapeDtypeStruct((n_p, d_out), jnp.float32),         # z
                   jax.ShapeDtypeStruct((1, n_tiles * d_out), jnp.float32),
                   jax.ShapeDtypeStruct((1, n_tiles * d_out), jnp.float32)),
        grid_spec=pltpu.PrefetchScalarGridSpec(
            num_scalar_prefetch=0,
            grid=(n_tiles,),
            in_specs=[pl.BlockSpec((n_p, d_prev), lambda i: (0, 0)),            # prev z (resident)
                      pl.BlockSpec((1, n_tiles * d_prev), lambda i: (0, 0)),    # prev partial sums
                      pl.BlockSpec((1, n_tiles * d_prev), lambda i: (0, 0)),    # prev partial sumsq
                      pl.BlockSpec((tm, n_p), lambda i: (i, 0)),                # fadj row tile
                      pl.BlockSpec((d_prev, d_out), lambda i: (0, 0))],         # W (resident)
            out_specs=(pl.BlockSpec((tm, d_prev), lambda i: (i, 0)),
                       pl.BlockSpec((tm, d_out), lambda i: (i, 0)),
                       pl.BlockSpec((1, d_out), lambda i: (0, i)),
                       pl.BlockSpec((1, d_out), lambda i: (0, i)))),
        compiler_params=pltpu.CompilerParams(
            dimension_semantics=("parallel",)),
    )(z_prev, ps_prev, pq_prev, adj_pad, w_pad)


def _bn_finalize_call(z, ps, pq, *, n_tiles, tm, inv_n):
    n_p, d = z.shape
    kernel = functools.partial(_bn_finalize_kernel, inv_n=inv_n, eps=EPS,
                               n_tiles=n_tiles, d=d)
    return pl.pallas_call(
        kernel,
        out_shape=jax.ShapeDtypeStruct((n_p, d), jnp.float32),
        grid_spec=pltpu.PrefetchScalarGridSpec(
            num_scalar_prefetch=0,
            grid=(n_tiles,),
            in_specs=[pl.BlockSpec((tm, d), lambda i: (i, 0)),
                      pl.BlockSpec((1, n_tiles * d), lambda i: (0, 0)),
                      pl.BlockSpec((1, n_tiles * d), lambda i: (0, 0))],
            out_specs=pl.BlockSpec((tm, d), lambda i: (i, 0))),
        compiler_params=pltpu.CompilerParams(
            dimension_semantics=("parallel",)),
    )(z, ps, pq)


def cgcl1_forward(x, fadj, weights):
    """x: [N, x_input], fadj: [N, N], weights: list of [in_k, out_k] -> (h1..h4)."""
    n, d0 = x.shape
    dims = [d0] + [int(w.shape[1]) for w in weights]
    for k, w in enumerate(weights):
        assert w.shape[0] == dims[k]

    # Pad rows/features to 128 multiples: lane-dense stores, aligned row tiles.
    n_p = _round_up(n, ROW_TILE)
    tm = ROW_TILE
    n_tiles = n_p // tm
    inv_n = 1.0 / n                            # BN stats over the TRUE batch size
    d_pad = [_round_up(d, LANE) for d in dims]

    x_p = _pad2d(x.astype(jnp.float32), n_p, d_pad[0])
    adj_p = _pad2d(fadj.astype(jnp.float32), n_p, n_p)
    w_p = [_pad2d(w.astype(jnp.float32), d_pad[k], d_pad[k + 1])
           for k, w in enumerate(weights)]

    hs = []
    z, ps, pq = _first_block_call(x_p, adj_p, w_p[0], n_tiles=n_tiles, tm=tm)
    for k in range(1, len(weights)):
        h_prev, z, ps, pq = _mid_block_call(z, ps, pq, adj_p, w_p[k],
                                            n_tiles=n_tiles, tm=tm, inv_n=inv_n)
        hs.append(h_prev[:n, :dims[k]])
    h_last = _bn_finalize_call(z, ps, pq, n_tiles=n_tiles, tm=tm, inv_n=inv_n)
    hs.append(h_last[:n, :dims[-1]])
    return tuple(hs)


# ----------------------------- pure-JAX reference -----------------------------

def reference_forward(x, fadj, weights, eps=EPS):
    hs = []
    h = x
    for w in weights:
        z = fadj @ (h @ w)
        z = jnp.maximum(z, 0.0)                      # relu(leaky_relu(z, .2)) == relu(z)
        mean = jnp.mean(z, axis=0, keepdims=True)
        var = jnp.mean((z - mean) ** 2, axis=0, keepdims=True)
        h = (z - mean) * lax.rsqrt(var + eps)
        hs.append(h)
    return tuple(hs)


if __name__ == "__main__":
    N = 256                                          # nodes
    x_input, x_enc1, x_enc2, x_enc3, z_input = 64, 128, 64, 32, 16

    key = jax.random.PRNGKey(0)
    kx, ka, k1, k2, k3, k4 = jax.random.split(key, 6)

    x = jax.random.normal(kx, (N, x_input), dtype=jnp.float32)

    # Dense, row-normalized "adjacency" (stands in for the sparse fadj).
    a = jax.random.uniform(ka, (N, N), dtype=jnp.float32)
    fadj = a / jnp.sum(a, axis=1, keepdims=True)

    def xavier(k, fan_in, fan_out):
        bound = (6.0 / (fan_in + fan_out)) ** 0.5
        return jax.random.uniform(k, (fan_in, fan_out), minval=-bound,
                                  maxval=bound, dtype=jnp.float32)

    weights = [xavier(k1, x_input, x_enc1),
               xavier(k2, x_enc1, x_enc2),
               xavier(k3, x_enc2, x_enc3),
               xavier(k4, x_enc3, z_input)]

    outs = jax.jit(cgcl1_forward)(x, fadj, weights)
    outs = jax.block_until_ready(outs)

    refs = reference_forward(x, fadj, weights)
    expected_shapes = [(N, x_enc1), (N, x_enc2), (N, x_enc3), (N, z_input)]
    # Tolerance covers the (mathematically identical) matmul reassociation and
    # single-pass variance vs the centered-variance reference.
    for o, r, shp in zip(outs, refs, expected_shapes):
        assert o.shape == shp, (o.shape, shp)
        assert jnp.allclose(o, r, atol=5e-4, rtol=5e-4), (
            "mismatch vs reference, max abs diff = "
            f"{float(jnp.max(jnp.abs(o - r)))}")

    print("KERNEL_OK")
</pallas_src>

<mosaic_0001>
module attributes {stable_mosaic.version = 11 : i64} {
  func.func @_block_first_kernel(%arg0: i32, %arg1: memref<256x128xf32, #tpu.memory_space<vmem>>, %arg2: memref<128x256xf32, #tpu.memory_space<vmem>>, %arg3: memref<128x128xf32, #tpu.memory_space<vmem>>, %arg4: memref<128x128xf32, #tpu.memory_space<vmem>>, %arg5: memref<1x128xf32, #tpu.memory_space<vmem>>, %arg6: memref<1x128xf32, #tpu.memory_space<vmem>>) attributes {dimension_semantics = [#tpu.dimension_semantics<parallel>], iteration_bounds = array<i64: 2>, scalar_prefetch = 0 : i64, scratch_operands = 0 : i64, tpu.core_type = #tpu.core_type<tc>, window_params = [{pipeline_mode = #tpu.pipeline_mode<synchronous>, transform_indices = @transform_0, window_bounds = array<i64: 256, 128>}, {transform_indices = @transform_1, window_bounds = array<i64: 128, 256>}, {pipeline_mode = #tpu.pipeline_mode<synchronous>, transform_indices = @transform_2, window_bounds = array<i64: 128, 128>}, {transform_indices = @transform_3, window_bounds = array<i64: 128, 128>}, {transform_indices = @transform_4, window_bounds = array<i64: 1, 128>}, {transform_indices = @transform_5, window_bounds = array<i64: 1, 128>}]} {
    %c0 = arith.constant 0 : index
    %c0_0 = arith.constant 0 : index
    %0 = vector.load %arg2[%c0, %c0_0] : memref<128x256xf32, #tpu.memory_space<vmem>>, vector<128x256xf32>
    %c0_1 = arith.constant 0 : index
    %c0_2 = arith.constant 0 : index
    %1 = vector.load %arg1[%c0_1, %c0_2] : memref<256x128xf32, #tpu.memory_space<vmem>>, vector<256x128xf32>
    %cst = arith.constant dense<0.000000e+00> : vector<128x128xf32>
    %2 = tpu.matmul %0, %1, %cst {dimension_numbers = #tpu.dot_dimension_numbers<[1], [0], [0], [1], [0, 0, 1, 1], [], []>} : vector<128x256xf32>, vector<256x128xf32>, vector<128x128xf32> -> vector<128x128xf32>
    %c0_3 = arith.constant 0 : index
    %c0_4 = arith.constant 0 : index
    %3 = vector.load %arg3[%c0_3, %c0_4] : memref<128x128xf32, #tpu.memory_space<vmem>>, vector<128x128xf32>
    %cst_5 = arith.constant dense<0.000000e+00> : vector<128x128xf32>
    %4 = tpu.matmul %2, %3, %cst_5 {dimension_numbers = #tpu.dot_dimension_numbers<[1], [0], [0], [1], [0, 0, 1, 1], [], []>} : vector<128x128xf32>, vector<128x128xf32>, vector<128x128xf32> -> vector<128x128xf32>
    %cst_6 = arith.constant 0.000000e+00 : f32
    %5 = vector.broadcast %cst_6 : f32 to vector<128x128xf32>
    %6 = arith.maximumf %4, %5 : vector<128x128xf32>
    %c0_7 = arith.constant 0 : index
    %c0_8 = arith.constant 0 : index
    %7 = vector.load %arg4[%c0_7, %c0_8] : memref<128x128xf32, #tpu.memory_space<vmem>>, vector<128x128xf32>
    tpu.vector_store %arg4[%c0_7, %c0_8], %6 {strides = array<i32>} : memref<128x128xf32, #tpu.memory_space<vmem>>, vector<128x128xf32>,
    %cst_9 = arith.constant 1.000000e+00 : f32
    %8 = vector.broadcast %cst_9 : f32 to vector<1x128xf32>
    %cst_10 = arith.constant dense<0.000000e+00> : vector<1x128xf32>
    %9 = tpu.matmul %8, %6, %cst_10 {dimension_numbers = #tpu.dot_dimension_numbers<[1], [0], [0], [1], [0, 0, 1, 1], [], []>} : vector<1x128xf32>, vector<128x128xf32>, vector<1x128xf32> -> vector<1x128xf32>
    %c0_11 = arith.constant 0 : index
    %c0_12 = arith.constant 0 : index
    %10 = vector.load %arg5[%c0_11, %c0_12] : memref<1x128xf32, #tpu.memory_space<vmem>>, vector<1x128xf32>
    tpu.vector_store %arg5[%c0_11, %c0_12], %9 {strides = array<i32>} : memref<1x128xf32, #tpu.memory_space<vmem>>, vector<1x128xf32>,
    %11 = arith.mulf %6, %6 : vector<128x128xf32>
    %cst_13 = arith.constant dense<0.000000e+00> : vector<1x128xf32>
    %12 = tpu.matmul %8, %11, %cst_13 {dimension_numbers = #tpu.dot_dimension_numbers<[1], [0], [0], [1], [0, 0, 1, 1], [], []>} : vector<1x128xf32>, vector<128x128xf32>, vector<1x128xf32> -> vector<1x128xf32>
    %c0_14 = arith.constant 0 : index
    %c0_15 = arith.constant 0 : index
    %13 = vector.load %arg6[%c0_14, %c0_15] : memref<1x128xf32, #tpu.memory_space<vmem>>, vector<1x128xf32>
    tpu.vector_store %arg6[%c0_14, %c0_15], %12 {strides = array<i32>} : memref<1x128xf32, #tpu.memory_space<vmem>>, vector<1x128xf32>,
    return
  }
  func.func @transform_0(%arg0: i32) -> (i32, i32) {
    %c0_i32 = arith.constant 0 : i32
    %c0_i32_0 = arith.constant 0 : i32
    %c0_i32_1 = arith.constant 0 : i32
    return %c0_i32, %c0_i32_0 : i32, i32
  }
  func.func @transform_1(%arg0: i32) -> (i32, i32) {
    %c0_i32 = arith.constant 0 : i32
    %c0_i32_0 = arith.constant 0 : i32
    return %arg0, %c0_i32 : i32, i32
  }
  func.func @transform_2(%arg0: i32) -> (i32, i32) {
    %c0_i32 = arith.constant 0 : i32
    %c0_i32_0 = arith.constant 0 : i32
    %c0_i32_1 = arith.constant 0 : i32
    return %c0_i32, %c0_i32_0 : i32, i32
  }
  func.func @transform_3(%arg0: i32) -> (i32, i32) {
    %c0_i32 = arith.constant 0 : i32
    %c0_i32_0 = arith.constant 0 : i32
    return %arg0, %c0_i32 : i32, i32
  }
  func.func @transform_4(%arg0: i32) -> (i32, i32) {
    %c0_i32 = arith.constant 0 : i32
    %c0_i32_0 = arith.constant 0 : i32
    return %c0_i32, %arg0 : i32, i32
  }
  func.func @transform_5(%arg0: i32) -> (i32, i32) {
    %c0_i32 = arith.constant 0 : i32
    %c0_i32_0 = arith.constant 0 : i32
    return %c0_i32, %arg0 : i32, i32
  }
}

module attributes {stable_mosaic.version = 11 : i64} {
  func.func @_block_mid_kernel(%arg0: i32, %arg1: memref<256x128xf32, #tpu.memory_space<vmem>>, %arg2: memref<1x256xf32, #tpu.memory_space<vmem>>, %arg3: memref<1x256xf32, #tpu.memory_space<vmem>>, %arg4: memref<128x256xf32, #tpu.memory_space<vmem>>, %arg5: memref<128x128xf32, #tpu.memory_space<vmem>>, %arg6: memref<128x128xf32, #tpu.memory_space<vmem>>, %arg7: memref<128x128xf32, #tpu.memory_space<vmem>>, %arg8: memref<1x128xf32, #tpu.memory_space<vmem>>, %arg9: memref<1x128xf32, #tpu.memory_space<vmem>>) attributes {dimension_semantics = [#tpu.dimension_semantics<parallel>], iteration_bounds = array<i64: 2>, scalar_prefetch = 0 : i64, scratch_operands = 0 : i64, tpu.core_type = #tpu.core_type<tc>, window_params = [{pipeline_mode = #tpu.pipeline_mode<synchronous>, transform_indices = @transform_0, window_bounds = array<i64: 256, 128>}, {pipeline_mode = #tpu.pipeline_mode<synchronous>, transform_indices = @transform_1, window_bounds = array<i64: 1, 256>}, {pipeline_mode = #tpu.pipeline_mode<synchronous>, transform_indices = @transform_2, window_bounds = array<i64: 1, 256>}, {transform_indices = @transform_3, window_bounds = array<i64: 128, 256>}, {pipeline_mode = #tpu.pipeline_mode<synchronous>, transform_indices = @transform_4, window_bounds = array<i64: 128, 128>}, {transform_indices = @transform_5, window_bounds = array<i64: 128, 128>}, {transform_indices = @transform_6, window_bounds = array<i64: 128, 128>}, {transform_indices = @transform_7, window_bounds = array<i64: 1, 128>}, {transform_indices = @transform_8, window_bounds = array<i64: 1, 128>}]} {
    %c0 = arith.constant 0 : index
    %c0_0 = arith.constant 0 : index
    %0 = vector.load %arg2[%c0, %c0_0] : memref<1x256xf32, #tpu.memory_space<vmem>>, vector<1x256xf32>
    %c0_1 = arith.constant 0 : index
    %c0_2 = arith.constant 0 : index
    %1 = vector.load %arg3[%c0_1, %c0_2] : memref<1x256xf32, #tpu.memory_space<vmem>>, vector<1x256xf32>
    %2 = vector.extract_strided_slice %0 {offsets = [0, 0], sizes = [1, 128], strides = [1, 1]} : vector<1x256xf32> to vector<1x128xf32>
    %3 = vector.extract_strided_slice %1 {offsets = [0, 0], sizes = [1, 128], strides = [1, 1]} : vector<1x256xf32> to vector<1x128xf32>
    %4 = vector.extract_strided_slice %0 {offsets = [0, 128], sizes = [1, 128], strides = [1, 1]} : vector<1x256xf32> to vector<1x128xf32>
    %5 = arith.addf %2, %4 : vector<1x128xf32>
    %6 = vector.extract_strided_slice %1 {offsets = [0, 128], sizes = [1, 128], strides = [1, 1]} : vector<1x256xf32> to vector<1x128xf32>
    %7 = arith.addf %3, %6 : vector<1x128xf32>
    %cst = arith.constant 3.906250e-03 : f32
    %8 = vector.broadcast %cst : f32 to vector<1x128xf32>
    %9 = arith.mulf %5, %8 : vector<1x128xf32>
    %cst_3 = arith.constant 3.906250e-03 : f32
    %10 = vector.broadcast %cst_3 : f32 to vector<1x128xf32>
    %11 = arith.mulf %7, %10 : vector<1x128xf32>
    %12 = arith.mulf %9, %9 : vector<1x128xf32>
    %13 = arith.subf %11, %12 : vector<1x128xf32>
    %cst_4 = arith.constant 0.000000e+00 : f32
    %14 = vector.broadcast %cst_4 : f32 to vector<1x128xf32>
    %15 = arith.maximumf %13, %14 : vector<1x128xf32>
    %cst_5 = arith.constant 9.99999974E-6 : f32
    %16 = vector.broadcast %cst_5 : f32 to vector<1x128xf32>
    %17 = arith.addf %15, %16 : vector<1x128xf32>
    %18 = math.rsqrt %17 : vector<1x128xf32>
    %c0_6 = arith.constant 0 : index
    %c0_7 = arith.constant 0 : index
    %19 = vector.load %arg1[%c0_6, %c0_7] : memref<256x128xf32, #tpu.memory_space<vmem>>, vector<256x128xf32>
    %20 = vector.broadcast %9 : vector<1x128xf32> to vector<256x128xf32>
    %21 = arith.subf %19, %20 : vector<256x128xf32>
    %22 = vector.broadcast %18 : vector<1x128xf32> to vector<256x128xf32>
    %23 = arith.mulf %21, %22 : vector<256x128xf32>
    %c128_i32 = arith.constant 128 : i32
    %24 = arith.muli %arg0, %c128_i32 : i32
    %25 = tpu.assume_multiple %24, 128 : i32
    %26 = arith.index_cast %25 : i32 to index
    %c0_8 = arith.constant 0 : index
    %27 = vector.load %arg1[%26, %c0_8] : memref<256x128xf32, #tpu.memory_space<vmem>>, vector<128x128xf32>
    %28 = vector.broadcast %9 : vector<1x128xf32> to vector<128x128xf32>
    %29 = arith.subf %27, %28 : vector<128x128xf32>
    %30 = vector.broadcast %18 : vector<1x128xf32> to vector<128x128xf32>
    %31 = arith.mulf %29, %30 : vector<128x128xf32>
    %c0_9 = arith.constant 0 : index
    %c0_10 = arith.constant 0 : index
    %32 = vector.load %arg6[%c0_9, %c0_10] : memref<128x128xf32, #tpu.memory_space<vmem>>, vector<128x128xf32>
    tpu.vector_store %arg6[%c0_9, %c0_10], %31 {strides = array<i32>} : memref<128x128xf32, #tpu.memory_space<vmem>>, vector<128x128xf32>,
    %c0_11 = arith.constant 0 : index
    %c0_12 = arith.constant 0 : index
    %33 = vector.load %arg4[%c0_11, %c0_12] : memref<128x256xf32, #tpu.memory_space<vmem>>, vector<128x256xf32>
    %cst_13 = arith.constant dense<0.000000e+00> : vector<128x128xf32>
    %34 = tpu.matmul %33, %23, %cst_13 {dimension_numbers = #tpu.dot_dimension_numbers<[1], [0], [0], [1], [0, 0, 1, 1], [], []>} : vector<128x256xf32>, vector<256x128xf32>, vector<128x128xf32> -> vector<128x128xf32>
    %c0_14 = arith.constant 0 : index
    %c0_15 = arith.constant 0 : index
    %35 = vector.load %arg5[%c0_14, %c0_15] : memref<128x128xf32, #tpu.memory_space<vmem>>, vector<128x128xf32>
    %cst_16 = arith.constant dense<0.000000e+00> : vector<128x128xf32>
    %36 = tpu.matmul %34, %35, %cst_16 {dimension_numbers = #tpu.dot_dimension_numbers<[1], [0], [0], [1], [0, 0, 1, 1], [], []>} : vector<128x128xf32>, vector<128x128xf32>, vector<128x128xf32> -> vector<128x128xf32>
    %cst_17 = arith.constant 0.000000e+00 : f32
    %37 = vector.broadcast %cst_17 : f32 to vector<128x128xf32>
    %38 = arith.maximumf %36, %37 : vector<128x128xf32>
    %c0_18 = arith.constant 0 : index
    %c0_19 = arith.constant 0 : index
    %39 = vector.load %arg7[%c0_18, %c0_19] : memref<128x128xf32, #tpu.memory_space<vmem>>, vector<128x128xf32>
    tpu.vector_store %arg7[%c0_18, %c0_19], %38 {strides = array<i32>} : memref<128x128xf32, #tpu.memory_space<vmem>>, vector<128x128xf32>,
    %cst_20 = arith.constant 1.000000e+00 : f32
    %40 = vector.broadcast %cst_20 : f32 to vector<1x128xf32>
    %cst_21 = arith.constant dense<0.000000e+00> : vector<1x128xf32>
    %41 = tpu.matmul %40, %38, %cst_21 {dimension_numbers = #tpu.dot_dimension_numbers<[1], [0], [0], [1], [0, 0, 1, 1], [], []>} : vector<1x128xf32>, vector<128x128xf32>, vector<1x128xf32> -> vector<1x128xf32>
    %c0_22 = arith.constant 0 : index
    %c0_23 = arith.constant 0 : index
    %42 = vector.load %arg8[%c0_22, %c0_23] : memref<1x128xf32, #tpu.memory_space<vmem>>, vector<1x128xf32>
    tpu.vector_store %arg8[%c0_22, %c0_23], %41 {strides = array<i32>} : memref<1x128xf32, #tpu.memory_space<vmem>>, vector<1x128xf32>,
    %43 = arith.mulf %38, %38 : vector<128x128xf32>
    %cst_24 = arith.constant dense<0.000000e+00> : vector<1x128xf32>
    %44 = tpu.matmul %40, %43, %cst_24 {dimension_numbers = #tpu.dot_dimension_numbers<[1], [0], [0], [1], [0, 0, 1, 1], [], []>} : vector<1x128xf32>, vector<128x128xf32>, vector<1x128xf32> -> vector<1x128xf32>
    %c0_25 = arith.constant 0 : index
    %c0_26 = arith.constant 0 : index
    %45 = vector.load %arg9[%c0_25, %c0_26] : memref<1x128xf32, #tpu.memory_space<vmem>>, vector<1x128xf32>
    tpu.vector_store %arg9[%c0_25, %c0_26], %44 {strides = array<i32>} : memref<1x128xf32, #tpu.memory_space<vmem>>, vector<1x128xf32>,
    return
  }
  func.func @transform_0(%arg0: i32) -> (i32, i32) {
    %c0_i32 = arith.constant 0 : i32
    %c0_i32_0 = arith.constant 0 : i32
    %c0_i32_1 = arith.constant 0 : i32
    return %c0_i32, %c0_i32_0 : i32, i32
  }
  func.func @transform_1(%arg0: i32) -> (i32, i32) {
    %c0_i32 = arith.constant 0 : i32
    %c0_i32_0 = arith.constant 0 : i32
    %c0_i32_1 = arith.constant 0 : i32
    return %c0_i32, %c0_i32_0 : i32, i32
  }
  func.func @transform_2(%arg0: i32) -> (i32, i32) {
    %c0_i32 = arith.constant 0 : i32
    %c0_i32_0 = arith.constant 0 : i32
    %c0_i32_1 = arith.constant 0 : i32
    return %c0_i32, %c0_i32_0 : i32, i32
  }
  func.func @transform_3(%arg0: i32) -> (i32, i32) {
    %c0_i32 = arith.constant 0 : i32
    %c0_i32_0 = arith.constant 0 : i32
    return %arg0, %c0_i32 : i32, i32
  }
  func.func @transform_4(%arg0: i32) -> (i32, i32) {
    %c0_i32 = arith.constant 0 : i32
    %c0_i32_0 = arith.constant 0 : i32
    %c0_i32_1 = arith.constant 0 : i32
    return %c0_i32, %c0_i32_0 : i32, i32
  }
  func.func @transform_5(%arg0: i32) -> (i32, i32) {
    %c0_i32 = arith.constant 0 : i32
    %c0_i32_0 = arith.constant 0 : i32
    return %arg0, %c0_i32 : i32, i32
  }
  func.func @transform_6(%arg0: i32) -> (i32, i32) {
    %c0_i32 = arith.constant 0 : i32
    %c0_i32_0 = arith.constant 0 : i32
    return %arg0, %c0_i32 : i32, i32
  }
  func.func @transform_7(%arg0: i32) -> (i32, i32) {
    %c0_i32 = arith.constant 0 : i32
    %c0_i32_0 = arith.constant 0 : i32
    return %c0_i32, %arg0 : i32, i32
  }
  func.func @transform_8(%arg0: i32) -> (i32, i32) {
    %c0_i32 = arith.constant 0 : i32
    %c0_i32_0 = arith.constant 0 : i32
    return %c0_i32, %arg0 : i32, i32
  }
}

module attributes {stable_mosaic.version = 11 : i64} {
  func.func @_block_mid_kernel(%arg0: i32, %arg1: memref<256x128xf32, #tpu.memory_space<vmem>>, %arg2: memref<1x256xf32, #tpu.memory_space<vmem>>, %arg3: memref<1x256xf32, #tpu.memory_space<vmem>>, %arg4: memref<128x256xf32, #tpu.memory_space<vmem>>, %arg5: memref<128x128xf32, #tpu.memory_space<vmem>>, %arg6: memref<128x128xf32, #tpu.memory_space<vmem>>, %arg7: memref<128x128xf32, #tpu.memory_space<vmem>>, %arg8: memref<1x128xf32, #tpu.memory_space<vmem>>, %arg9: memref<1x128xf32, #tpu.memory_space<vmem>>) attributes {dimension_semantics = [#tpu.dimension_semantics<parallel>], iteration_bounds = array<i64: 2>, scalar_prefetch = 0 : i64, scratch_operands = 0 : i64, tpu.core_type = #tpu.core_type<tc>, window_params = [{pipeline_mode = #tpu.pipeline_mode<synchronous>, transform_indices = @transform_0, window_bounds = array<i64: 256, 128>}, {pipeline_mode = #tpu.pipeline_mode<synchronous>, transform_indices = @transform_1, window_bounds = array<i64: 1, 256>}, {pipeline_mode = #tpu.pipeline_mode<synchronous>, transform_indices = @transform_2, window_bounds = array<i64: 1, 256>}, {transform_indices = @transform_3, window_bounds = array<i64: 128, 256>}, {pipeline_mode = #tpu.pipeline_mode<synchronous>, transform_indices = @transform_4, window_bounds = array<i64: 128, 128>}, {transform_indices = @transform_5, window_bounds = array<i64: 128, 128>}, {transform_indices = @transform_6, window_bounds = array<i64: 128, 128>}, {transform_indices = @transform_7, window_bounds = array<i64: 1, 128>}, {transform_indices = @transform_8, window_bounds = array<i64: 1, 128>}]} {
    %c0 = arith.constant 0 : index
    %c0_0 = arith.constant 0 : index
    %0 = vector.load %arg2[%c0, %c0_0] : memref<1x256xf32, #tpu.memory_space<vmem>>, vector<1x256xf32>
    %c0_1 = arith.constant 0 : index
    %c0_2 = arith.constant 0 : index
    %1 = vector.load %arg3[%c0_1, %c0_2] : memref<1x256xf32, #tpu.memory_space<vmem>>, vector<1x256xf32>
    %2 = vector.extract_strided_slice %0 {offsets = [0, 0], sizes = [1, 128], strides = [1, 1]} : vector<1x256xf32> to vector<1x128xf32>
    %3 = vector.extract_strided_slice %1 {offsets = [0, 0], sizes = [1, 128], strides = [1, 1]} : vector<1x256xf32> to vector<1x128xf32>
    %4 = vector.extract_strided_slice %0 {offsets = [0, 128], sizes = [1, 128], strides = [1, 1]} : vector<1x256xf32> to vector<1x128xf32>
    %5 = arith.addf %2, %4 : vector<1x128xf32>
    %6 = vector.extract_strided_slice %1 {offsets = [0, 128], sizes = [1, 128], strides = [1, 1]} : vector<1x256xf32> to vector<1x128xf32>
    %7 = arith.addf %3, %6 : vector<1x128xf32>
    %cst = arith.constant 3.906250e-03 : f32
    %8 = vector.broadcast %cst : f32 to vector<1x128xf32>
    %9 = arith.mulf %5, %8 : vector<1x128xf32>
    %cst_3 = arith.constant 3.906250e-03 : f32
    %10 = vector.broadcast %cst_3 : f32 to vector<1x128xf32>
    %11 = arith.mulf %7, %10 : vector<1x128xf32>
    %12 = arith.mulf %9, %9 : vector<1x128xf32>
    %13 = arith.subf %11, %12 : vector<1x128xf32>
    %cst_4 = arith.constant 0.000000e+00 : f32
    %14 = vector.broadcast %cst_4 : f32 to vector<1x128xf32>
    %15 = arith.maximumf %13, %14 : vector<1x128xf32>
    %cst_5 = arith.constant 9.99999974E-6 : f32
    %16 = vector.broadcast %cst_5 : f32 to vector<1x128xf32>
    %17 = arith.addf %15, %16 : vector<1x128xf32>
    %18 = math.rsqrt %17 : vector<1x128xf32>
    %c0_6 = arith.constant 0 : index
    %c0_7 = arith.constant 0 : index
    %19 = vector.load %arg1[%c0_6, %c0_7] : memref<256x128xf32, #tpu.memory_space<vmem>>, vector<256x128xf32>
    %20 = vector.broadcast %9 : vector<1x128xf32> to vector<256x128xf32>
    %21 = arith.subf %19, %20 : vector<256x128xf32>
    %22 = vector.broadcast %18 : vector<1x128xf32> to vector<256x128xf32>
    %23 = arith.mulf %21, %22 : vector<256x128xf32>
    %c128_i32 = arith.constant 128 : i32
    %24 = arith.muli %arg0, %c128_i32 : i32
    %25 = tpu.assume_multiple %24, 128 : i32
    %26 = arith.index_cast %25 : i32 to index
    %c0_8 = arith.constant 0 : index
    %27 = vector.load %arg1[%26, %c0_8] : memref<256x128xf32, #tpu.memory_space<vmem>>, vector<128x128xf32>
    %28 = vector.broadcast %9 : vector<1x128xf32> to vector<128x128xf32>
    %29 = arith.subf %27, %28 : vector<128x128xf32>
    %30 = vector.broadcast %18 : vector<1x128xf32> to vector<128x128xf32>
    %31 = arith.mulf %29, %30 : vector<128x128xf32>
    %c0_9 = arith.constant 0 : index
    %c0_10 = arith.constant 0 : index
    %32 = vector.load %arg6[%c0_9, %c0_10] : memref<128x128xf32, #tpu.memory_space<vmem>>, vector<128x128xf32>
    tpu.vector_store %arg6[%c0_9, %c0_10], %31 {strides = array<i32>} : memref<128x128xf32, #tpu.memory_space<vmem>>, vector<128x128xf32>,
    %c0_11 = arith.constant 0 : index
    %c0_12 = arith.constant 0 : index
    %33 = vector.load %arg4[%c0_11, %c0_12] : memref<128x256xf32, #tpu.memory_space<vmem>>, vector<128x256xf32>
    %cst_13 = arith.constant dense<0.000000e+00> : vector<128x128xf32>
    %34 = tpu.matmul %33, %23, %cst_13 {dimension_numbers = #tpu.dot_dimension_numbers<[1], [0], [0], [1], [0, 0, 1, 1], [], []>} : vector<128x256xf32>, vector<256x128xf32>, vector<128x128xf32> -> vector<128x128xf32>
    %c0_14 = arith.constant 0 : index
    %c0_15 = arith.constant 0 : index
    %35 = vector.load %arg5[%c0_14, %c0_15] : memref<128x128xf32, #tpu.memory_space<vmem>>, vector<128x128xf32>
    %cst_16 = arith.constant dense<0.000000e+00> : vector<128x128xf32>
    %36 = tpu.matmul %34, %35, %cst_16 {dimension_numbers = #tpu.dot_dimension_numbers<[1], [0], [0], [1], [0, 0, 1, 1], [], []>} : vector<128x128xf32>, vector<128x128xf32>, vector<128x128xf32> -> vector<128x128xf32>
    %cst_17 = arith.constant 0.000000e+00 : f32
    %37 = vector.broadcast %cst_17 : f32 to vector<128x128xf32>
    %38 = arith.maximumf %36, %37 : vector<128x128xf32>
    %c0_18 = arith.constant 0 : index
    %c0_19 = arith.constant 0 : index
    %39 = vector.load %arg7[%c0_18, %c0_19] : memref<128x128xf32, #tpu.memory_space<vmem>>, vector<128x128xf32>
    tpu.vector_store %arg7[%c0_18, %c0_19], %38 {strides = array<i32>} : memref<128x128xf32, #tpu.memory_space<vmem>>, vector<128x128xf32>,
    %cst_20 = arith.constant 1.000000e+00 : f32
    %40 = vector.broadcast %cst_20 : f32 to vector<1x128xf32>
    %cst_21 = arith.constant dense<0.000000e+00> : vector<1x128xf32>
    %41 = tpu.matmul %40, %38, %cst_21 {dimension_numbers = #tpu.dot_dimension_numbers<[1], [0], [0], [1], [0, 0, 1, 1], [], []>} : vector<1x128xf32>, vector<128x128xf32>, vector<1x128xf32> -> vector<1x128xf32>
    %c0_22 = arith.constant 0 : index
    %c0_23 = arith.constant 0 : index
    %42 = vector.load %arg8[%c0_22, %c0_23] : memref<1x128xf32, #tpu.memory_space<vmem>>, vector<1x128xf32>
    tpu.vector_store %arg8[%c0_22, %c0_23], %41 {strides = array<i32>} : memref<1x128xf32, #tpu.memory_space<vmem>>, vector<1x128xf32>,
    %43 = arith.mulf %38, %38 : vector<128x128xf32>
    %cst_24 = arith.constant dense<0.000000e+00> : vector<1x128xf32>
    %44 = tpu.matmul %40, %43, %cst_24 {dimension_numbers = #tpu.dot_dimension_numbers<[1], [0], [0], [1], [0, 0, 1, 1], [], []>} : vector<1x128xf32>, vector<128x128xf32>, vector<1x128xf32> -> vector<1x128xf32>
    %c0_25 = arith.constant 0 : index
    %c0_26 = arith.constant 0 : index
    %45 = vector.load %arg9[%c0_25, %c0_26] : memref<1x128xf32, #tpu.memory_space<vmem>>, vector<1x128xf32>
    tpu.vector_store %arg9[%c0_25, %c0_26], %44 {strides = array<i32>} : memref<1x128xf32, #tpu.memory_space<vmem>>, vector<1x128xf32>,
    return
  }
  func.func @transform_0(%arg0: i32) -> (i32, i32) {
    %c0_i32 = arith.constant 0 : i32
    %c0_i32_0 = arith.constant 0 : i32
    %c0_i32_1 = arith.constant 0 : i32
    return %c0_i32, %c0_i32_0 : i32, i32
  }
  func.func @transform_1(%arg0: i32) -> (i32, i32) {
    %c0_i32 = arith.constant 0 : i32
    %c0_i32_0 = arith.constant 0 : i32
    %c0_i32_1 = arith.constant 0 : i32
    return %c0_i32, %c0_i32_0 : i32, i32
  }
  func.func @transform_2(%arg0: i32) -> (i32, i32) {
    %c0_i32 = arith.constant 0 : i32
    %c0_i32_0 = arith.constant 0 : i32
    %c0_i32_1 = arith.constant 0 : i32
    return %c0_i32, %c0_i32_0 : i32, i32
  }
  func.func @transform_3(%arg0: i32) -> (i32, i32) {
    %c0_i32 = arith.constant 0 : i32
    %c0_i32_0 = arith.constant 0 : i32
    return %arg0, %c0_i32 : i32, i32
  }
  func.func @transform_4(%arg0: i32) -> (i32, i32) {
    %c0_i32 = arith.constant 0 : i32
    %c0_i32_0 = arith.constant 0 : i32
    %c0_i32_1 = arith.constant 0 : i32
    return %c0_i32, %c0_i32_0 : i32, i32
  }
  func.func @transform_5(%arg0: i32) -> (i32, i32) {
    %c0_i32 = arith.constant 0 : i32
    %c0_i32_0 = arith.constant 0 : i32
    return %arg0, %c0_i32 : i32, i32
  }
  func.func @transform_6(%arg0: i32) -> (i32, i32) {
    %c0_i32 = arith.constant 0 : i32
    %c0_i32_0 = arith.constant 0 : i32
    return %arg0, %c0_i32 : i32, i32
  }
  func.func @transform_7(%arg0: i32) -> (i32, i32) {
    %c0_i32 = arith.constant 0 : i32
    %c0_i32_0 = arith.constant 0 : i32
    return %c0_i32, %arg0 : i32, i32
  }
  func.func @transform_8(%arg0: i32) -> (i32, i32) {
    %c0_i32 = arith.constant 0 : i32
    %c0_i32_0 = arith.constant 0 : i32
    return %c0_i32, %arg0 : i32, i32
  }
}

module attributes {stable_mosaic.version = 11 : i64} {
  func.func @_bn_finalize_kernel(%arg0: i32, %arg1: memref<128x128xf32, #tpu.memory_space<vmem>>, %arg2: memref<1x256xf32, #tpu.memory_space<vmem>>, %arg3: memref<1x256xf32, #tpu.memory_space<vmem>>, %arg4: memref<128x128xf32, #tpu.memory_space<vmem>>) attributes {dimension_semantics = [#tpu.dimension_semantics<parallel>], iteration_bounds = array<i64: 2>, scalar_prefetch = 0 : i64, scratch_operands = 0 : i64, tpu.core_type = #tpu.core_type<tc>, window_params = [{transform_indices = @transform_0, window_bounds = array<i64: 128, 128>}, {pipeline_mode = #tpu.pipeline_mode<synchronous>, transform_indices = @transform_1, window_bounds = array<i64: 1, 256>}, {pipeline_mode = #tpu.pipeline_mode<synchronous>, transform_indices = @transform_2, window_bounds = array<i64: 1, 256>}, {transform_indices = @transform_3, window_bounds = array<i64: 128, 128>}]} {
    %c0 = arith.constant 0 : index
    %c0_0 = arith.constant 0 : index
    %0 = vector.load %arg2[%c0, %c0_0] : memref<1x256xf32, #tpu.memory_space<vmem>>, vector<1x256xf32>
    %c0_1 = arith.constant 0 : index
    %c0_2 = arith.constant 0 : index
    %1 = vector.load %arg3[%c0_1, %c0_2] : memref<1x256xf32, #tpu.memory_space<vmem>>, vector<1x256xf32>
    %2 = vector.extract_strided_slice %0 {offsets = [0, 0], sizes = [1, 128], strides = [1, 1]} : vector<1x256xf32> to vector<1x128xf32>
    %3 = vector.extract_strided_slice %1 {offsets = [0, 0], sizes = [1, 128], strides = [1, 1]} : vector<1x256xf32> to vector<1x128xf32>
    %4 = vector.extract_strided_slice %0 {offsets = [0, 128], sizes = [1, 128], strides = [1, 1]} : vector<1x256xf32> to vector<1x128xf32>
    %5 = arith.addf %2, %4 : vector<1x128xf32>
    %6 = vector.extract_strided_slice %1 {offsets = [0, 128], sizes = [1, 128], strides = [1, 1]} : vector<1x256xf32> to vector<1x128xf32>
    %7 = arith.addf %3, %6 : vector<1x128xf32>
    %cst = arith.constant 3.906250e-03 : f32
    %8 = vector.broadcast %cst : f32 to vector<1x128xf32>
    %9 = arith.mulf %5, %8 : vector<1x128xf32>
    %cst_3 = arith.constant 3.906250e-03 : f32
    %10 = vector.broadcast %cst_3 : f32 to vector<1x128xf32>
    %11 = arith.mulf %7, %10 : vector<1x128xf32>
    %12 = arith.mulf %9, %9 : vector<1x128xf32>
    %13 = arith.subf %11, %12 : vector<1x128xf32>
    %cst_4 = arith.constant 0.000000e+00 : f32
    %14 = vector.broadcast %cst_4 : f32 to vector<1x128xf32>
    %15 = arith.maximumf %13, %14 : vector<1x128xf32>
    %cst_5 = arith.constant 9.99999974E-6 : f32
    %16 = vector.broadcast %cst_5 : f32 to vector<1x128xf32>
    %17 = arith.addf %15, %16 : vector<1x128xf32>
    %18 = math.rsqrt %17 : vector<1x128xf32>
    %c0_6 = arith.constant 0 : index
    %c0_7 = arith.constant 0 : index
    %19 = vector.load %arg1[%c0_6, %c0_7] : memref<128x128xf32, #tpu.memory_space<vmem>>, vector<128x128xf32>
    %20 = vector.broadcast %9 : vector<1x128xf32> to vector<128x128xf32>
    %21 = arith.subf %19, %20 : vector<128x128xf32>
    %22 = vector.broadcast %18 : vector<1x128xf32> to vector<128x128xf32>
    %23 = arith.mulf %21, %22 : vector<128x128xf32>
    %c0_8 = arith.constant 0 : index
    %c0_9 = arith.constant 0 : index
    %24 = vector.load %arg4[%c0_8, %c0_9] : memref<128x128xf32, #tpu.memory_space<vmem>>, vector<128x128xf32>
    tpu.vector_store %arg4[%c0_8, %c0_9], %23 {strides = array<i32>} : memref<128x128xf32, #tpu.memory_space<vmem>>, vector<128x128xf32>,
    return
  }
  func.func @transform_0(%arg0: i32) -> (i32, i32) {
    %c0_i32 = arith.constant 0 : i32
    %c0_i32_0 = arith.constant 0 : i32
    return %arg0, %c0_i32 : i32, i32
  }
  func.func @transform_1(%arg0: i32) -> (i32, i32) {
    %c0_i32 = arith.constant 0 : i32
    %c0_i32_0 = arith.constant 0 : i32
    %c0_i32_1 = arith.constant 0 : i32
    return %c0_i32, %c0_i32_0 : i32, i32
  }
  func.func @transform_2(%arg0: i32) -> (i32, i32) {
    %c0_i32 = arith.constant 0 : i32
    %c0_i32_0 = arith.constant 0 : i32
    %c0_i32_1 = arith.constant 0 : i32
    return %c0_i32, %c0_i32_0 : i32, i32
  }
  func.func @transform_3(%arg0: i32) -> (i32, i32) {
    %c0_i32 = arith.constant 0 : i32
    %c0_i32_0 = arith.constant 0 : i32
    return %arg0, %c0_i32 : i32, i32
  }
}

</mosaic_0001>

<bundles_post_ra>
// kernel: cgcl1_forward.5
= control target key start
LH: loop header
LB: loop body
LE: loop exit
PB: predicated region body
PF: predicated region fallthrough
CT: control target
= control target key end

     0   :  { %s1365_s18 = smov 0   ;;  %s1609_s0 = inlined_call_operand.vmem [shape: f32[256,128], index: 0, kind: input, shape index: {}]   ;;  %s1610_s1 = inlined_call_operand.vmem [shape: f32[256,256], index: 1, kind: input, shape index: {}]   ;;  %s1611_s2 = inlined_call_operand.vmem [shape: f32[128,128], index: 2, kind: input, shape index: {}]   ;;  %s1612_s3 = inlined_call_operand.vmem [shape: f32[256,128], index: 3, kind: output, shape index: {0}]   ;;  %s1613_s4 = inlined_call_operand.vmem [shape: f32[1,256], index: 4, kind: output, shape index: {1}]   ;;  %s1614_s5 = inlined_call_operand.vmem [shape: f32[1,256], index: 5, kind: output, shape index: {2}]  }
   0x1 LB: > { %s1371_s19 = sadd.s32 4294967295, %s1329_s18   ;;  %p918_p0 = scmp.ge.s32.totalorder %s1329_s18, 1  ;;  %s1329_s18 = sphi %s1365_s18, %s16_s18  }
   0x2   : > { %p194_p1 = scmp.lt.s32.totalorder %s1329_s18, 3 }
   0x4   : > { %p195_p2 = pnand %p918_p0, %p194_p1 }
   0x5   : > { %v296_v0 = vld [vmem:[%s1609_s0 + $0x80] sm:$0xff] (!%p195_p2)  ;;  %v297_v1 = vld [vmem:[%s1609_s0 + $0x88] sm:$0xff] (!%p195_p2)  ;;  %s919_s26 = sshll.u32 (!%p195_p2), %s1371_s19, 4  ;;  %v298_v5 = vld [vmem:[%s1609_s0 + $0x90] sm:$0xff] (!%p195_p2)  ;;  %vm1332_vm0 = vmmov (!%p195_p2), 0   ;;  %p242_p4 = scmp.lt.s32.totalorder (!%p195_p2), %s1371_s19, 1 }
   0x6   : > { %198 = sbr.rel (%p195_p2) target bundleno = 750 (0x2ee), region = 32  ;;  %v280_v2 = vld [vmem:[%s1609_s0] sm:$0xff] (!%p195_p2)  ;;  %v1199_v3 = vpack.c.bf16 (!%p195_p2), %v297_v1, %v296_v0  ;;  %v281_v4 = vld [vmem:[%s1609_s0 + $0x8] sm:$0xff] (!%p195_p2)  ;;  %v299_v6 = vld [vmem:[%s1609_s0 + $0x98] sm:$0xff] (!%p195_p2)  ;;  %p230_p3 = scmp.lt.s32.totalorder (!%p195_p2), %s919_s26, 31 }
   0x7   : > { %v1201_v7 = vpack.c.bf16 (!%p195_p2), %v281_v4, %v280_v2  ;;  %v1203_v8 = vpack.c.bf16 (!%p195_p2), %v299_v6, %v298_v5  ;;  %v282_v9 = vld [vmem:[%s1609_s0 + $0x10] sm:$0xff] (!%p195_p2)  ;;  %v283_v10 = vld [vmem:[%s1609_s0 + $0x18] sm:$0xff] (!%p195_p2)  ;;  %v300_v11 = vld [vmem:[%s1609_s0 + $0xa0] sm:$0xff] (!%p195_p2) }
   0x8   : > { %1200 = vmatprep.subr.bf16.mxu0 (!%p195_p2), %v1199_v3  ;;  %v301_v12 = vld [vmem:[%s1609_s0 + $0xa8] sm:$0xff] (!%p195_p2)  ;;  %v1205_v13 = vpack.c.bf16 (!%p195_p2), %v283_v10, %v282_v9  ;;  %v284_v15 = vld [vmem:[%s1609_s0 + $0x20] sm:$0xff] (!%p195_p2)  ;;  %v302_v17 = vld [vmem:[%s1609_s0 + $0xb0] sm:$0xff] (!%p195_p2) }
   0x9   : > { %1202 = vmatpush3.bf16.msra.mxu0 (!%p195_p2), %v1201_v7  ;;  %v1207_v14 = vpack.c.bf16 (!%p195_p2), %v301_v12, %v300_v11  ;;  %v285_v16 = vld [vmem:[%s1609_s0 + $0x28] sm:$0xff] (!%p195_p2)  ;;  %v303_v18 = vld [vmem:[%s1609_s0 + $0xb8] sm:$0xff] (!%p195_p2)  ;;  %v286_v21 = vld [vmem:[%s1609_s0 + $0x30] sm:$0xff] (!%p195_p2) }
   0xa   : > { %1204 = vmatprep.subr.bf16.mxu0 (!%p195_p2), %v1203_v8  ;;  %v1209_v19 = vpack.c.bf16 (!%p195_p2), %v285_v16, %v284_v15  ;;  %v1211_v20 = vpack.c.bf16 (!%p195_p2), %v303_v18, %v302_v17  ;;  %v287_v22 = vld [vmem:[%s1609_s0 + $0x38] sm:$0xff] (!%p195_p2)  ;;  %v304_v23 = vld [vmem:[%s1609_s0 + $0xc0] sm:$0xff] (!%p195_p2)  ;;  %v305_v24 = vld [vmem:[%s1609_s0 + $0xc8] sm:$0xff] (!%p195_p2) }
   0xb   : > { %v1213_v26 = vpack.c.bf16 (!%p195_p2), %v287_v22, %v286_v21  ;;  %v1215_v27 = vpack.c.bf16 (!%p195_p2), %v305_v24, %v304_v23  ;;  %v288_v28 = vld [vmem:[%s1609_s0 + $0x40] sm:$0xff] (!%p195_p2)  ;;  %v289_v29 = vld [vmem:[%s1609_s0 + $0x48] sm:$0xff] (!%p195_p2)  ;;  %v306_v30 = vld [vmem:[%s1609_s0 + $0xd0] sm:$0xff] (!%p195_p2) }
   0xc   : > { %v307_v31 = vld [vmem:[%s1609_s0 + $0xd8] sm:$0xff] (!%p195_p2)  ;;  %v1217_v32 = vpack.c.bf16 (!%p195_p2), %v289_v29, %v288_v28  ;;  %v290_v34 = vld [vmem:[%s1609_s0 + $0x50] sm:$0xff] (!%p195_p2)  ;;  %v308_v36 = vld [vmem:[%s1609_s0 + $0xe0] sm:$0xff] (!%p195_p2) }
   0xd   : > { %s1616_s26 = smov (!%p230_p3, %s919_s26), 31  ;;  %1206 = vmatpush3.bf16.msra.mxu0 %v1205_v13  ;;  %v1219_v33 = vpack.c.bf16 %v307_v31, %v306_v30  ;;  %v291_v35 = vld [vmem:[%s1609_s0 + $0x58] sm:$0xff]  ;;  %v309_v37 = vld [vmem:[%s1609_s0 + $0xe8] sm:$0xff]  ;;  %v292_v39 = vld [vmem:[%s1609_s0 + $0x60] sm:$0xff]  ;;  %s1618_s19 = smov (!%p242_p4, %s1371_s19), 1 }
   0xe   : > { %s926_s22 = sshll.u32 %s1616_s26, 4  ;;  %1208 = vmatprep.subr.bf16.mxu0 %v1207_v14  ;;  %v1221_v38 = vpack.c.bf16 %v291_v35, %v290_v34  ;;  %v293_v40 = vld [vmem:[%s1609_s0 + $0x68] sm:$0xff]  ;;  %v1223_v41 = vpack.c.bf16 %v309_v37, %v308_v36  ;;  %v310_v42 = vld [vmem:[%s1609_s0 + $0xf0] sm:$0xff]  ;;  %v457_v43 = vld [vmem:[%s1611_s2] sm:$0xff]  ;;  %s244_s15 = scalar_lea.vmem %s1613_s4, %s1618_s19 }
   0xf   : > { %s1424_s30 = scalar_lea.vmem %s1610_s1, %s926_s22  ;;  %v458_v44 = vld [vmem:[%s1611_s2 + $0x8] sm:$0xff]  ;;  %v311_v45 = vld [vmem:[%s1609_s0 + $0xf8] sm:$0xff]  ;;  %v459_v47 = vld [vmem:[%s1611_s2 + $0x10] sm:$0xff]  ;;  %v1225_v52 = vpack.c.bf16 %v293_v40, %v292_v39  ;;  %s247_s20 = scalar_lea.vmem %s1614_s5, %s1618_s19 }
  0x10   : > { %v249_v25 = vld [vmem:[%s1424_s30 + $0x8] sm:$0xff]  ;;  %v1231_v46 = vpack.c.bf16 %v458_v44, %v457_v43  ;;  %v460_v48 = vld [vmem:[%s1611_s2 + $0x18] sm:$0xff]  ;;  %v461_v50 = vld [vmem:[%s1611_s2 + $0x20] sm:$0xff]  ;;  %v1227_v53 = vpack.c.bf16 %v311_v45, %v310_v42 }
  0x11   : > { %376 = vmatprep.mubr.f32.mxu0 %v249_v25  ;;  %1210 = vmatpush3.bf16.msra.mxu0 %v1209_v19  ;;  %v1235_v49 = vpack.c.bf16 %v460_v48, %v459_v47  ;;  %v462_v51 = vld [vmem:[%s1611_s2 + $0x28] sm:$0xff]  ;;  %v294_v54 = vld [vmem:[%s1609_s0 + $0x70] sm:$0xff]  ;;  %v295_v55 = vld [vmem:[%s1609_s0 + $0x78] sm:$0xff] }
  0x12   : > { %1212 = vmatprep.subr.bf16.mxu0 %v1211_v20  ;;  %1232 = vmatprep.subr.bf16.mxu1 %v1231_v46  ;;  %v1239_v56 = vpack.c.bf16 %v462_v51, %v461_v50  ;;  %v463_v57 = vld [vmem:[%s1611_s2 + $0x30] sm:$0xff]  ;;  %v464_v58 = vld [vmem:[%s1611_s2 + $0x38] sm:$0xff]  ;;  %v1229_v59 = vpack.c.bf16 %v295_v55, %v294_v54  ;;  %v465_v61 = vld [vmem:[%s1611_s2 + $0x40] sm:$0xff] }
  0x13   : > { %1234 = vmatpush3.bf16.msra.mxu1 %v1231_v46  ;;  %v1243_v60 = vpack.c.bf16 %v464_v58, %v463_v57  ;;  %v466_v62 = vld [vmem:[%s1611_s2 + $0x48] sm:$0xff]  ;;  %v248_v63 = vld [vmem:[%s1424_s30] sm:$0xff]  ;;  %v251_v0 = vld [vmem:[%s1424_s30 + $0x18] sm:$0xff] }
  0x14   : > { %1236 = vmatprep.subr.bf16.mxu1 %v1235_v49  ;;  %v1247_v1 = vpack.c.bf16 %v466_v62, %v465_v61  ;;  %v467_v2 = vld [vmem:[%s1611_s2 + $0x50] sm:$0xff]  ;;  %v468_v3 = vld [vmem:[%s1611_s2 + $0x58] sm:$0xff]  ;;  %v253_v5 = vld [vmem:[%s1424_s30 + $0x28] sm:$0xff] }
  0x15   : > { %1214 = vmatpush3.bf16.msra.mxu0 %v1213_v26  ;;  %v250_v4 = vld [vmem:[%s1424_s30 + $0x10] sm:$0xff]  ;;  %v1251_v6 = vpack.c.bf16 %v468_v3, %v467_v2  ;;  %v252_v7 = vld [vmem:[%s1424_s30 + $0x20] sm:$0xff]  ;;  %v255_v8 = vld [vmem:[%s1424_s30 + $0x38] sm:$0xff] }
  0x16   : > { %1216 = vmatprep.subr.bf16.mxu0 %v1215_v27  ;;  %v254_v9 = vld [vmem:[%s1424_s30 + $0x30] sm:$0xff]  ;;  %v257_v10 = vld [vmem:[%s1424_s30 + $0x48] sm:$0xff]  ;;  %v256_v11 = vld [vmem:[%s1424_s30 + $0x40] sm:$0xff] }
  0x17   : > { %1238 = vmatpush3.bf16.msra.mxu1 %v1235_v49  ;;  %v259_v12 = vld [vmem:[%s1424_s30 + $0x58] sm:$0xff]  ;;  %v258_v13 = vld [vmem:[%s1424_s30 + $0x50] sm:$0xff]  ;;  %v261_v14 = vld [vmem:[%s1424_s30 + $0x68] sm:$0xff] }
  0x18   : > { %1240 = vmatprep.subr.bf16.mxu1 %v1239_v56  ;;  %v260_v15 = vld [vmem:[%s1424_s30 + $0x60] sm:$0xff]  ;;  %v263_v16 = vld [vmem:[%s1424_s30 + $0x78] sm:$0xff]  ;;  %v262_v17 = vld [vmem:[%s1424_s30 + $0x70] sm:$0xff] }
  0x19   : > { %1218 = vmatpush3.bf16.msra.mxu0 %v1217_v32  ;;  %v265_v18 = vld [vmem:[%s1424_s30 + $0x88] sm:$0xff]  ;;  %v264_v19 = vld [vmem:[%s1424_s30 + $0x80] sm:$0xff]  ;;  %v267_v20 = vld [vmem:[%s1424_s30 + $0x98] sm:$0xff] }
  0x1a   : > { %1220 = vmatprep.subr.bf16.mxu0 %v1219_v33  ;;  %v266_v21 = vld [vmem:[%s1424_s30 + $0x90] sm:$0xff]  ;;  %v269_v22 = vld [vmem:[%s1424_s30 + $0xa8] sm:$0xff]  ;;  %v268_v23 = vld [vmem:[%s1424_s30 + $0xa0] sm:$0xff] }
  0x1b   : > { %1242 = vmatpush3.bf16.msra.mxu1 %v1239_v56  ;;  %v271_v24 = vld [vmem:[%s1424_s30 + $0xb8] sm:$0xff]  ;;  %v270_v25 = vld [vmem:[%s1424_s30 + $0xb0] sm:$0xff]  ;;  %v273_v26 = vld [vmem:[%s1424_s30 + $0xc8] sm:$0xff] }
  0x1c   : > { %1244 = vmatprep.subr.bf16.mxu1 %v1243_v60  ;;  %v272_v27 = vld [vmem:[%s1424_s30 + $0xc0] sm:$0xff]  ;;  %v275_v28 = vld [vmem:[%s1424_s30 + $0xd8] sm:$0xff]  ;;  %v274_v29 = vld [vmem:[%s1424_s30 + $0xd0] sm:$0xff] }
  0x1d   : > { %1222 = vmatpush3.bf16.msra.mxu0 %v1221_v38  ;;  %v277_v30 = vld [vmem:[%s1424_s30 + $0xe8] sm:$0xff]  ;;  %v276_v31 = vld [vmem:[%s1424_s30 + $0xe0] sm:$0xff]  ;;  %v279_v32 = vld [vmem:[%s1424_s30 + $0xf8] sm:$0xff] }
  0x1e   : > { %1224 = vmatprep.subr.bf16.mxu0 %v1223_v41  ;;  %v278_v33 = vld [vmem:[%s1424_s30 + $0xf0] sm:$0xff]  ;;  %v469_v34 = vld [vmem:[%s1611_s2 + $0x60] sm:$0xff]  ;;  %v470_v35 = vld [vmem:[%s1611_s2 + $0x68] sm:$0xff]  ;;  %s923_s30 = sshll.u32 %s1616_s26, 3 }
  0x1f   : > { %1246 = vmatpush3.bf16.msra.mxu1 %v1243_v60  ;;  %v1255_v36 = vpack.c.bf16 %v470_v35, %v469_v34  ;;  %v471_v37 = vld [vmem:[%s1611_s2 + $0x70] sm:$0xff]  ;;  %v472_v38 = vld [vmem:[%s1611_s2 + $0x78] sm:$0xff]  ;;  %s1566_s13 = scalar_lea.vmem %s1612_s3, %s923_s30 }
  0x20   : > { %1248 = vmatprep.subr.bf16.mxu1 %v1247_v1  ;;  %v1259_v39 = vpack.c.bf16 %v472_v38, %v471_v37 }
  0x21   : > { %1226 = vmatpush3.bf16.msra.mxu0 %v1225_v52 }
  0x22   : > { %1228 = vmatprep.subr.bf16.mxu0 %v1227_v53 }
  0x23   : > { %1250 = vmatpush3.bf16.msra.mxu1 %v1247_v1 }
  0x24   : > { %1252 = vmatprep.subr.bf16.mxu1 %v1251_v6 }
  0x25   : > { %1230 = vmatpush3.bf16.msra.mxu0 %v1229_v59 }
  0x27   : > { %1254 = vmatpush3.bf16.msra.mxu1 %v1251_v6 }
  0x28   : > { %377 = vmatmul.mubr.f32.vlgmr.msra.gmra.mrb[0].mxu0 %v248_v63  ;;  %1256 = vmatprep.subr.bf16.mxu1 %v1255_v36 }
  0x29   : > { %381 = vmatprep.mubr.f32.mxu0 %v251_v0 }
  0x2b   : > { %1258 = vmatpush3.bf16.msra.mxu1 %v1255_v36 }
  0x2c   : > { %382 = vmatmul.mubr.f32.gmra.mrb[2].mxu0 %v250_v4  ;;  %1260 = vmatprep.subr.bf16.mxu1 %v1259_v39 }
  0x2d   : > { %386 = vmatprep.mubr.f32.mxu0 %v253_v5 }
  0x2f   : > { %1262 = vmatpush3.bf16.msra.mxu1 %v1259_v39 }
  0x30   : > { %387 = vmatmul.mubr.f32.gmra.mrb[4].mxu0 %v252_v7 }
  0x31   : > { %391 = vmatprep.mubr.f32.mxu0 %v255_v8 }
  0x34   : > { %392 = vmatmul.mubr.f32.gmra.mrb[6].mxu0 %v254_v9 }
  0x35   : > { %396 = vmatprep.mubr.f32.mxu0 %v257_v10 }
  0x38   : > { %397 = vmatmul.mubr.f32.gmra.mrb[8].mxu0 %v256_v11 }
  0x39   : > { %401 = vmatprep.mubr.f32.mxu0 %v259_v12 }
  0x3c   : > { %402 = vmatmul.mubr.f32.gmra.mrb[10].mxu0 %v258_v13 }
  0x3d   : > { %406 = vmatprep.mubr.f32.mxu0 %v261_v14 }
  0x40   : > { %407 = vmatmul.mubr.f32.gmra.mrb[12].mxu0 %v260_v15 }
  0x41   : > { %411 = vmatprep.mubr.f32.mxu0 %v263_v16 }
  0x44   : > { %412 = vmatmul.mubr.f32.gmra.mrb[14].mxu0 %v262_v17 }
  0x45   : > { %416 = vmatprep.mubr.f32.mxu0 %v265_v18 }
  0x48   : > { %417 = vmatmul.mubr.f32.gmra.mrb[16].mxu0 %v264_v19 }
  0x49   : > { %421 = vmatprep.mubr.f32.mxu0 %v267_v20 }
  0x4c   : > { %422 = vmatmul.mubr.f32.gmra.mrb[18].mxu0 %v266_v21 }
  0x4d   : > { %426 = vmatprep.mubr.f32.mxu0 %v269_v22 }
  0x50   : > { %427 = vmatmul.mubr.f32.gmra.mrb[20].mxu0 %v268_v23 }
  0x51   : > { %431 = vmatprep.mubr.f32.mxu0 %v271_v24  ;;  %v1331_v24 = vmov 0.0|0.0  }
  0x52   : > { %1263 = vmatprep.subr.bf16.mxu1 %v1331_v24  ;;  %1287 = vmatprep.subr.bf16.mxu0 %v1331_v24 }
  0x54   : > { %432 = vmatmul.mubr.f32.gmra.mrb[22].mxu0 %v270_v25  ;;  %v1333_v25 = vmov 0.0  }
  0x55   : > { %436 = vmatprep.mubr.f32.mxu0 %v273_v26 }
  0x58   : > { %437 = vmatmul.mubr.f32.gmra.mrb[24].mxu0 %v272_v27 }
  0x59   : > { %441 = vmatprep.mubr.f32.mxu0 %v275_v28 }
  0x5c   : > { %442 = vmatmul.mubr.f32.gmra.mrb[26].mxu0 %v274_v29 }
  0x5d   : > { %446 = vmatprep.mubr.f32.mxu0 %v277_v30 }
  0x60   : > { %447 = vmatmul.mubr.f32.gmra.mrb[28].mxu0 %v276_v31 }
  0x61   : > { %451 = vmatprep.mubr.f32.mxu0 %v279_v32 }
  0x64   : > { %452 = vmatmul.mubr.f32.gmra.mrb[30].mxu0 %v278_v33 }
  0x65   : > { %1196 = vmatprep.mubr.msk.f32.mxu0 %vm1332_vm0, %v1333_v25 }
  0xfb   : > { %v959_v40 = vpop.f32.mrb[0].mxu0 }
  0xfc   : > { %v960_v41 = vpop.f32.mrb[1].mxu0 }
  0xfd   : > { %v961_v42 = vadd.f32 %v960_v41, %v959_v40 }
  0xff   : > { %v962_v43 = vpop.f32.mrb[2].mxu0  ;;  %1105 = vmatprep.mubr.f32.mxu1 %v961_v42 }
 0x100   : > { %v963_v44 = vpop.f32.mrb[3].mxu0 }
 0x101   : > { %v964_v45 = vadd.f32 %v963_v44, %v962_v43 }
 0x103   : > { %v965_v46 = vpop.f32.mrb[4].mxu0  ;;  %1106 = vmatmul.mubr.f32.vlgmr.msra.gmra.mrb[0].mxu1 %v964_v45 }
 0x104   : > { %v966_v47 = vpop.f32.mrb[5].mxu0 }
 0x105   : > { %v967_v48 = vadd.f32 %v966_v47, %v965_v46 }
 0x107   : > { %v968_v49 = vpop.f32.mrb[6].mxu0  ;;  %1108 = vmatprep.mubr.f32.mxu1 %v967_v48 }
 0x108   : > { %v969_v50 = vpop.f32.mrb[7].mxu0 }
 0x109   : > { %v970_v51 = vadd.f32 %v969_v50, %v968_v49 }
 0x10b   : > { %v971_v52 = vpop.f32.mrb[8].mxu0  ;;  %1109 = vmatmul.mubr.f32.gmra.mrb[2].mxu1 %v970_v51 }
 0x10c   : > { %v972_v53 = vpop.f32.mrb[9].mxu0 }
 0x10d   : > { %v973_v54 = vadd.f32 %v972_v53, %v971_v52 }
 0x10f   : > { %v974_v55 = vpop.f32.mrb[10].mxu0  ;;  %1111 = vmatprep.mubr.f32.mxu1 %v973_v54 }
 0x110   : > { %v975_v56 = vpop.f32.mrb[11].mxu0 }
 0x111   : > { %v976_v57 = vadd.f32 %v975_v56, %v974_v55 }
 0x113   : > { %v977_v58 = vpop.f32.mrb[12].mxu0  ;;  %1112 = vmatmul.mubr.f32.gmra.mrb[4].mxu1 %v976_v57 }
 0x114   : > { %v978_v59 = vpop.f32.mrb[13].mxu0 }
 0x115   : > { %v979_v60 = vadd.f32 %v978_v59, %v977_v58 }
 0x117   : > { %v980_v61 = vpop.f32.mrb[14].mxu0  ;;  %1114 = vmatprep.mubr.f32.mxu1 %v979_v60 }
 0x118   : > { %v981_v62 = vpop.f32.mrb[15].mxu0 }
 0x119   : > { %v982_v63 = vadd.f32 %v981_v62, %v980_v61 }
 0x11b   : > { %v983_v0 = vpop.f32.mrb[16].mxu0  ;;  %1115 = vmatmul.mubr.f32.gmra.mrb[6].mxu1 %v982_v63 }
 0x11c   : > { %v984_v1 = vpop.f32.mrb[17].mxu0 }
 0x11d   : > { %v985_v2 = vadd.f32 %v984_v1, %v983_v0 }
 0x11f   : > { %v986_v3 = vpop.f32.mrb[18].mxu0  ;;  %1117 = vmatprep.mubr.f32.mxu1 %v985_v2 }
 0x120   : > { %v987_v4 = vpop.f32.mrb[19].mxu0 }
 0x121   : > { %v988_v5 = vadd.f32 %v987_v4, %v986_v3 }
 0x123   : > { %v989_v6 = vpop.f32.mrb[20].mxu0  ;;  %1118 = vmatmul.mubr.f32.gmra.mrb[8].mxu1 %v988_v5 }
 0x124   : > { %v990_v7 = vpop.f32.mrb[21].mxu0 }
 0x125   : > { %v991_v8 = vadd.f32 %v990_v7, %v989_v6 }
 0x127   : > { %v992_v9 = vpop.f32.mrb[22].mxu0  ;;  %1120 = vmatprep.mubr.f32.mxu1 %v991_v8 }
 0x128   : > { %v993_v10 = vpop.f32.mrb[23].mxu0 }
 0x129   : > { %v994_v11 = vadd.f32 %v993_v10, %v992_v9 }
 0x12b   : > { %v995_v12 = vpop.f32.mrb[24].mxu0  ;;  %1121 = vmatmul.mubr.f32.gmra.mrb[10].mxu1 %v994_v11 }
 0x12c   : > { %v996_v13 = vpop.f32.mrb[25].mxu0 }
 0x12d   : > { %v997_v14 = vadd.f32 %v996_v13, %v995_v12 }
 0x12f   : > { %v998_v15 = vpop.f32.mrb[26].mxu0  ;;  %1123 = vmatprep.mubr.f32.mxu1 %v997_v14 }
 0x130   : > { %v999_v16 = vpop.f32.mrb[27].mxu0 }
 0x131   : > { %v1000_v17 = vadd.f32 %v999_v16, %v998_v15 }
 0x133   : > { %v1001_v18 = vpop.f32.mrb[28].mxu0  ;;  %1124 = vmatmul.mubr.f32.gmra.mrb[12].mxu1 %v1000_v17 }
 0x134   : > { %v1002_v19 = vpop.f32.mrb[29].mxu0 }
 0x135   : > { %v1003_v20 = vadd.f32 %v1002_v19, %v1001_v18 }
 0x137   : > { %v1004_v21 = vpop.f32.mrb[30].mxu0  ;;  %1126 = vmatprep.mubr.f32.mxu1 %v1003_v20 }
 0x138   : > { %v1005_v22 = vpop.f32.mrb[31].mxu0 }
 0x139   : > { %v1006_v23 = vadd.f32 %v1005_v22, %v1004_v21 }
 0x13b   : > { %1127 = vmatmul.mubr.f32.gmra.mrb[14].mxu1 %v1006_v23 }
 0x13c   : > { %1161 = vmatprep.mubr.msk.f32.mxu1 %vm1332_vm0, %v1333_v25 }
 0x1d6   : > { %v1107_v26 = vpop.f32.mrb[0].mxu1 }
 0x1d7   : > { %v619_v27 = vmax.f32 %v1107_v26, 0.0  ;;  %v539_v28 = vpop.f32.mrb[1].mxu1 }
 0x1d8   : > { %v618_v29 = vmax.f32 %v539_v28, 0.0 }
 0x1d9   : > { %635 = vst [vmem:[%s1566_s13 + $0x8] sm:$0xff] %v619_v27  ;;  %v722_v30 = vmul.f32 %v619_v27, %v619_v27 }
 0x1da   : > { %634 = vst [vmem:[%s1566_s13] sm:$0xff] %v618_v29  ;;  %v1264_v31 = vpack.c.bf16 %v619_v27, %v618_v29  ;;  %v721_v32 = vmul.f32 %v618_v29, %v618_v29  ;;  %v1334_v27 = vmov 1.0  }
 0x1dc   : > { %v1288_v33 = vpack.c.bf16 %v722_v30, %v721_v32  ;;  %1265 = vmatpush3.bf16.msra.mxu1 %v1264_v31 }
 0x1dd   : > { %1266 = vmatprep.subr.bf16.mxu1 %v1331_v24 }
 0x1de   : > { %v1110_v34 = vpop.f32.mrb[2].mxu1  ;;  %1289 = vmatpush3.bf16.msra.mxu0 %v1288_v33 }
 0x1df   : > { %v621_v35 = vmax.f32 %v1110_v34, 0.0  ;;  %v549_v36 = vpop.f32.mrb[3].mxu1  ;;  %1290 = vmatprep.subr.bf16.mxu0 %v1331_v24 }
 0x1e0   : > { %v620_v37 = vmax.f32 %v549_v36, 0.0 }
 0x1e1   : > { %637 = vst [vmem:[%s1566_s13 + $0x18] sm:$0xff] %v621_v35  ;;  %v724_v38 = vmul.f32 %v621_v35, %v621_v35 }
 0x1e2   : > { %636 = vst [vmem:[%s1566_s13 + $0x10] sm:$0xff] %v620_v37  ;;  %v1267_v39 = vpack.c.bf16 %v621_v35, %v620_v37  ;;  %v723_v40 = vmul.f32 %v620_v37, %v620_v37 }
 0x1e4   : > { %v1291_v41 = vpack.c.bf16 %v724_v38, %v723_v40  ;;  %1268 = vmatpush3.bf16.msra.mxu1 %v1267_v39 }
 0x1e5   : > { %1269 = vmatprep.subr.bf16.mxu1 %v1331_v24 }
 0x1e6   : > { %v1113_v42 = vpop.f32.mrb[4].mxu1  ;;  %1292 = vmatpush3.bf16.msra.mxu0 %v1291_v41 }
 0x1e7   : > { %v623_v43 = vmax.f32 %v1113_v42, 0.0  ;;  %v559_v44 = vpop.f32.mrb[5].mxu1  ;;  %1293 = vmatprep.subr.bf16.mxu0 %v1331_v24 }
 0x1e8   : > { %v622_v45 = vmax.f32 %v559_v44, 0.0 }
 0x1e9   : > { %639 = vst [vmem:[%s1566_s13 + $0x28] sm:$0xff] %v623_v43  ;;  %v726_v46 = vmul.f32 %v623_v43, %v623_v43 }
 0x1ea   : > { %638 = vst [vmem:[%s1566_s13 + $0x20] sm:$0xff] %v622_v45  ;;  %v1270_v47 = vpack.c.bf16 %v623_v43, %v622_v45  ;;  %v725_v48 = vmul.f32 %v622_v45, %v622_v45 }
 0x1ec   : > { %v1294_v49 = vpack.c.bf16 %v726_v46, %v725_v48  ;;  %1271 = vmatpush3.bf16.msra.mxu1 %v1270_v47 }
 0x1ed   : > { %1272 = vmatprep.subr.bf16.mxu1 %v1331_v24 }
 0x1ee   : > { %v1116_v50 = vpop.f32.mrb[6].mxu1  ;;  %1295 = vmatpush3.bf16.msra.mxu0 %v1294_v49 }
 0x1ef   : > { %v625_v51 = vmax.f32 %v1116_v50, 0.0  ;;  %v569_v52 = vpop.f32.mrb[7].mxu1  ;;  %1296 = vmatprep.subr.bf16.mxu0 %v1331_v24 }
 0x1f0   : > { %v624_v53 = vmax.f32 %v569_v52, 0.0 }
 0x1f1   : > { %641 = vst [vmem:[%s1566_s13 + $0x38] sm:$0xff] %v625_v51  ;;  %v728_v54 = vmul.f32 %v625_v51, %v625_v51 }
 0x1f2   : > { %640 = vst [vmem:[%s1566_s13 + $0x30] sm:$0xff] %v624_v53  ;;  %v1273_v55 = vpack.c.bf16 %v625_v51, %v624_v53  ;;  %v727_v56 = vmul.f32 %v624_v53, %v624_v53 }
 0x1f4   : > { %v1297_v57 = vpack.c.bf16 %v728_v54, %v727_v56  ;;  %1274 = vmatpush3.bf16.msra.mxu1 %v1273_v55 }
 0x1f5   : > { %1275 = vmatprep.subr.bf16.mxu1 %v1331_v24 }
 0x1f6   : > { %v1119_v58 = vpop.f32.mrb[8].mxu1  ;;  %1298 = vmatpush3.bf16.msra.mxu0 %v1297_v57 }
 0x1f7   : > { %v627_v59 = vmax.f32 %v1119_v58, 0.0  ;;  %v579_v60 = vpop.f32.mrb[9].mxu1  ;;  %1299 = vmatprep.subr.bf16.mxu0 %v1331_v24 }
 0x1f8   : > { %v626_v61 = vmax.f32 %v579_v60, 0.0 }
 0x1f9   : > { %643 = vst [vmem:[%s1566_s13 + $0x48] sm:$0xff] %v627_v59  ;;  %v730_v62 = vmul.f32 %v627_v59, %v627_v59 }
 0x1fa   : > { %642 = vst [vmem:[%s1566_s13 + $0x40] sm:$0xff] %v626_v61  ;;  %v1276_v63 = vpack.c.bf16 %v627_v59, %v626_v61  ;;  %v729_v0 = vmul.f32 %v626_v61, %v626_v61 }
 0x1fc   : > { %v1300_v1 = vpack.c.bf16 %v730_v62, %v729_v0  ;;  %1277 = vmatpush3.bf16.msra.mxu1 %v1276_v63 }
 0x1fd   : > { %1278 = vmatprep.subr.bf16.mxu1 %v1331_v24 }
 0x1fe   : > { %v1122_v2 = vpop.f32.mrb[10].mxu1  ;;  %1301 = vmatpush3.bf16.msra.mxu0 %v1300_v1 }
 0x1ff   : > { %v629_v3 = vmax.f32 %v1122_v2, 0.0  ;;  %v589_v4 = vpop.f32.mrb[11].mxu1  ;;  %1302 = vmatprep.subr.bf16.mxu0 %v1331_v24 }
 0x200   : > { %v628_v5 = vmax.f32 %v589_v4, 0.0 }
 0x201   : > { %645 = vst [vmem:[%s1566_s13 + $0x58] sm:$0xff] %v629_v3  ;;  %v732_v6 = vmul.f32 %v629_v3, %v629_v3 }
 0x202   : > { %644 = vst [vmem:[%s1566_s13 + $0x50] sm:$0xff] %v628_v5  ;;  %v1279_v7 = vpack.c.bf16 %v629_v3, %v628_v5  ;;  %v731_v8 = vmul.f32 %v628_v5, %v628_v5 }
 0x204   : > { %v1303_v9 = vpack.c.bf16 %v732_v6, %v731_v8  ;;  %1280 = vmatpush3.bf16.msra.mxu1 %v1279_v7 }
 0x205   : > { %1281 = vmatprep.subr.bf16.mxu1 %v1331_v24 }
 0x206   : > { %v1125_v10 = vpop.f32.mrb[12].mxu1  ;;  %1304 = vmatpush3.bf16.msra.mxu0 %v1303_v9 }
 0x207   : > { %v631_v11 = vmax.f32 %v1125_v10, 0.0  ;;  %v599_v12 = vpop.f32.mrb[13].mxu1  ;;  %1305 = vmatprep.subr.bf16.mxu0 %v1331_v24 }
 0x208   : > { %v630_v13 = vmax.f32 %v599_v12, 0.0 }
 0x209   : > { %647 = vst [vmem:[%s1566_s13 + $0x68] sm:$0xff] %v631_v11  ;;  %v734_v14 = vmul.f32 %v631_v11, %v631_v11 }
 0x20a   : > { %646 = vst [vmem:[%s1566_s13 + $0x60] sm:$0xff] %v630_v13  ;;  %v1282_v15 = vpack.c.bf16 %v631_v11, %v630_v13  ;;  %v733_v16 = vmul.f32 %v630_v13, %v630_v13 }
 0x20c   : > { %v1306_v17 = vpack.c.bf16 %v734_v14, %v733_v16  ;;  %1283 = vmatpush3.bf16.msra.mxu1 %v1282_v15 }
 0x20d   : > { %1284 = vmatprep.subr.bf16.mxu1 %v1331_v24 }
 0x20e   : > { %v1128_v18 = vpop.f32.mrb[14].mxu1  ;;  %1307 = vmatpush3.bf16.msra.mxu0 %v1306_v17 }
 0x20f   : > { %v633_v19 = vmax.f32 %v1128_v18, 0.0  ;;  %v609_v20 = vpop.f32.mrb[15].mxu1  ;;  %1308 = vmatprep.subr.bf16.mxu0 %v1331_v24 }
 0x210   : > { %v632_v21 = vmax.f32 %v609_v20, 0.0 }
 0x211   : > { %649 = vst [vmem:[%s1566_s13 + $0x78] sm:$0xff] %v633_v19  ;;  %v736_v22 = vmul.f32 %v633_v19, %v633_v19 }
 0x212   : > { %648 = vst [vmem:[%s1566_s13 + $0x70] sm:$0xff] %v632_v21  ;;  %v1285_v23 = vpack.c.bf16 %v633_v19, %v632_v21  ;;  %v735_v25 = vmul.f32 %v632_v21, %v632_v21 }
 0x214   : > { %v1309_v26 = vpack.c.bf16 %v736_v22, %v735_v25  ;;  %1286 = vmatpush3.bf16.msra.mxu1 %v1285_v23 }
 0x216   : > { %1310 = vmatpush3.bf16.msra.mxu0 %v1309_v26 }
 0x217   : > { %1162 = vmatmul.mubr.f32.vlgmr.msra.gmra.mrb[16].mxu1 %v1334_v27 }
 0x219   : > { %1197 = vmatmul.mubr.f32.vlgmr.msra.gmra.mrb[32].mxu0 %v1334_v27 }
 0x2ea   : > { %v716_v28 = vpop.f32.mrb[16].mxu1 }
 0x2eb   : > { %720 = vst [vmem:[%s244_s15] sm:$0x1] %v716_v28  ;;  %v1163_v24 = vpop.f32.mrb[17].mxu1 }
 0x2ec   : > { %v803_v29 = vpop.f32.mrb[32].mxu0 }
 0x2ed   : > { %807 = vst [vmem:[%s247_s20] sm:$0x1] %v803_v29  ;;  %v1198_v30 = vpop.f32.mrb[33].mxu0 }
 0x2ee PF: > { %s16_s18 = sadd.s32 1, %s1329_s18  }
 0x2ef   : > { %p13_p5 = scmp.ge.s32.totalorder %s16_s18, 4  }
 0x2f1   :  { %15 = sbr.rel (!%p13_p5) target bundleno = 1 (0x1), region = 86 }

// kernel: cgcl1_forward.9
= control target key start
LH: loop header
LB: loop body
LE: loop exit
PB: predicated region body
PF: predicated region fallthrough
CT: control target
= control target key end

     0   :  { %s372_s12 = smov 0   ;;  %s420_s0 = inlined_call_operand.vmem [shape: f32[256,128], index: 0, kind: input, shape index: {}]   ;;  %s421_s1 = inlined_call_operand.vmem [shape: f32[1,256], index: 1, kind: input, shape index: {}]   ;;  %s422_s2 = inlined_call_operand.vmem [shape: f32[1,256], index: 2, kind: input, shape index: {}]   ;;  %s423_s3 = inlined_call_operand.vmem [shape: f32[256,128], index: 3, kind: output, shape index: {}]  }
   0x1 LB: > { %s323_s13 = sadd.s32 4294967295, %s350_s12   ;;  %p327_p0 = scmp.ge.s32.totalorder %s350_s12, 1  ;;  %s350_s12 = sphi %s372_s12, %s13_s12  }
   0x2   : > { %p138_p1 = scmp.lt.s32.totalorder %s350_s12, 3 }
   0x4   : > { %p139_p2 = pnand %p327_p0, %p138_p1 }
   0x5   : > { %v174_v0 = vld [vmem:[%s421_s1] sm:$0x3] (!%p139_p2)  ;;  %s328_s18 = sshll.u32 (!%p139_p2), %s323_s13, 4  ;;  %v208_v9 = vlaneseq (!%p139_p2) }
   0x6   : > { %142 = sbr.rel (%p139_p2) target bundleno = 43 (0x2b), region = 32  ;;  %v175_v1 = vld [vmem:[%s422_s2] sm:$0x3] (!%p139_p2)  ;;  %v177_v2 = vrot.slane (!%p139_p2), %v174_v0, 1  ;;  %p163_p3 = scmp.lt.s32.totalorder (!%p139_p2), %s328_s18, 31 }
   0x7   : > { %v181_v3 = vrot.slane (!%p139_p2), %v175_v1, 1  ;;  %v209_v12 = vshrl.u32 (!%p139_p2), %v208_v9, 7 }
   0x8   : > { %v179_v4 = vadd.f32 (!%p139_p2), %v177_v2, %v174_v0 }
   0x9   : > { %v183_v5 = vadd.f32 (!%p139_p2), %v181_v3, %v175_v1  ;;  %v210_v14 = vsub.s32 (!%p139_p2), 0, %v209_v12 }
   0xa   : > { %v184_v6 = vmul.f32 (!%p139_p2), 0.00390625, %v179_v4 }
   0xb   : > { %v185_v7 = vmul.f32 (!%p139_p2), 0.00390625, %v183_v5 }
   0xc   : > { %v186_v8 = vmul.f32 (!%p139_p2), %v184_v6, %v184_v6  ;;  %v211_v16 = vrot.slane (!%p139_p2), %v184_v6, %v210_v14 }
   0xd   : > { %s425_s18 = smov (!%p163_p3, %s328_s18), 31 }
   0xe   : > { %v187_v10 = vsub.f32 %v185_v7, %v186_v8  ;;  %s329_s19 = sshll.u32 %s425_s18, 3 }
   0xf   : > { %s166_s22 = scalar_lea.vmem %s420_s0, %s329_s19  ;;  %s399_s25 = scalar_lea.vmem %s423_s3, %s329_s19 }
  0x10   : > { %v188_v11 = vmax.f32 %v187_v10, 0.0  ;;  %v191_v15 = vld [vmem:[%s166_s22] sm:$0xff]  ;;  %v192_v17 = vld [vmem:[%s166_s22 + $0x8] sm:$0xff]  ;;  %v193_v18 = vld [vmem:[%s166_s22 + $0x10] sm:$0xff] }
  0x11   : > { %v194_v19 = vld [vmem:[%s166_s22 + $0x18] sm:$0xff]  ;;  %v195_v20 = vld [vmem:[%s166_s22 + $0x20] sm:$0xff]  ;;  %v196_v21 = vld [vmem:[%s166_s22 + $0x28] sm:$0xff]  ;;  %v213_v26 = vsub.f32 %v191_v15, %v211_v16  ;;  %v214_v30 = vsub.f32 %v192_v17, %v211_v16  ;;  %v215_v31 = vsub.f32 %v193_v18, %v211_v16 }
  0x12   : > { %v189_v13 = vadd.f32 1e-05, %v188_v11  ;;  %v197_v22 = vld [vmem:[%s166_s22 + $0x30] sm:$0xff]  ;;  %v198_v23 = vld [vmem:[%s166_s22 + $0x38] sm:$0xff]  ;;  %v199_v24 = vld [vmem:[%s166_s22 + $0x40] sm:$0xff]  ;;  %v216_v32 = vsub.f32 %v194_v19, %v211_v16  ;;  %v217_v33 = vsub.f32 %v195_v20, %v211_v16  ;;  %v218_v38 = vsub.f32 %v196_v21, %v211_v16 }
  0x13   : > { %v200_v25 = vld [vmem:[%s166_s22 + $0x48] sm:$0xff]  ;;  %v201_v27 = vld [vmem:[%s166_s22 + $0x50] sm:$0xff]  ;;  %v202_v28 = vld [vmem:[%s166_s22 + $0x58] sm:$0xff]  ;;  %v219_v39 = vsub.f32 %v197_v22, %v211_v16  ;;  %v220_v40 = vsub.f32 %v198_v23, %v211_v16  ;;  %v221_v41 = vsub.f32 %v199_v24, %v211_v16 }
  0x14   : > { %342 = vrsqrt.f32 %v189_v13  ;;  %v203_v29 = vld [vmem:[%s166_s22 + $0x60] sm:$0xff]  ;;  %v204_v34 = vld [vmem:[%s166_s22 + $0x68] sm:$0xff]  ;;  %v205_v35 = vld [vmem:[%s166_s22 + $0x70] sm:$0xff]  ;;  %v222_v43 = vsub.f32 %v200_v25, %v211_v16  ;;  %v223_v44 = vsub.f32 %v201_v27, %v211_v16  ;;  %v224_v45 = vsub.f32 %v202_v28, %v211_v16 }
  0x15   : > { %v206_v36 = vld [vmem:[%s166_s22 + $0x78] sm:$0xff]  ;;  %v225_v46 = vsub.f32 %v203_v29, %v211_v16  ;;  %v226_v47 = vsub.f32 %v204_v34, %v211_v16  ;;  %v227_v48 = vsub.f32 %v205_v35, %v211_v16 }
  0x16   : > { %v228_v49 = vsub.f32 %v206_v36, %v211_v16 }
  0x1e   : > { %v343_v37 = vpop.eup %342 }
  0x1f   : > { %v233_v42 = vrot.slane %v343_v37, %v210_v14 }
  0x21   : > { %v235_v50 = vmul.f32 %v233_v42, %v213_v26  ;;  %v236_v51 = vmul.f32 %v233_v42, %v214_v30  ;;  %v237_v52 = vmul.f32 %v233_v42, %v215_v31  ;;  %v238_v53 = vmul.f32 %v233_v42, %v216_v32 }
  0x22   : > { %v239_v54 = vmul.f32 %v233_v42, %v217_v33  ;;  %v240_v55 = vmul.f32 %v233_v42, %v218_v38  ;;  %v241_v56 = vmul.f32 %v233_v42, %v219_v39  ;;  %v242_v57 = vmul.f32 %v233_v42, %v220_v40 }
  0x23   : > { %251 = vst [vmem:[%s399_s25] sm:$0xff] %v235_v50  ;;  %252 = vst [vmem:[%s399_s25 + $0x8] sm:$0xff] %v236_v51  ;;  %v243_v58 = vmul.f32 %v233_v42, %v221_v41  ;;  %v244_v59 = vmul.f32 %v233_v42, %v222_v43  ;;  %v245_v60 = vmul.f32 %v233_v42, %v223_v44 }
  0x24   : > { %253 = vst [vmem:[%s399_s25 + $0x10] sm:$0xff] %v237_v52  ;;  %254 = vst [vmem:[%s399_s25 + $0x18] sm:$0xff] %v238_v53  ;;  %v246_v61 = vmul.f32 %v233_v42, %v224_v45  ;;  %v247_v62 = vmul.f32 %v233_v42, %v225_v46  ;;  %v248_v63 = vmul.f32 %v233_v42, %v226_v47 }
  0x25   : > { %255 = vst [vmem:[%s399_s25 + $0x20] sm:$0xff] %v239_v54  ;;  %256 = vst [vmem:[%s399_s25 + $0x28] sm:$0xff] %v240_v55  ;;  %v249_v0 = vmul.f32 %v233_v42, %v227_v48  ;;  %v250_v1 = vmul.f32 %v233_v42, %v228_v49 }
  0x26   : > { %257 = vst [vmem:[%s399_s25 + $0x30] sm:$0xff] %v241_v56  ;;  %258 = vst [vmem:[%s399_s25 + $0x38] sm:$0xff] %v242_v57 }
  0x27   : > { %259 = vst [vmem:[%s399_s25 + $0x40] sm:$0xff] %v243_v58  ;;  %260 = vst [vmem:[%s399_s25 + $0x48] sm:$0xff] %v244_v59 }
  0x28   : > { %261 = vst [vmem:[%s399_s25 + $0x50] sm:$0xff] %v245_v60  ;;  %262 = vst [vmem:[%s399_s25 + $0x58] sm:$0xff] %v246_v61 }
  0x29   : > { %263 = vst [vmem:[%s399_s25 + $0x60] sm:$0xff] %v247_v62  ;;  %264 = vst [vmem:[%s399_s25 + $0x68] sm:$0xff] %v248_v63 }
  0x2a   : > { %265 = vst [vmem:[%s399_s25 + $0x70] sm:$0xff] %v249_v0  ;;  %266 = vst [vmem:[%s399_s25 + $0x78] sm:$0xff] %v250_v1 }
  0x2b PF: > { %s13_s12 = sadd.s32 1, %s350_s12  }
  0x2c   : > { %p10_p4 = scmp.ge.s32.totalorder %s13_s12, 4  }
  0x2e   :  { %12 = sbr.rel (!%p10_p4) target bundleno = 1 (0x1), region = 62 }

// kernel: cgcl1_forward.7
= control target key start
LH: loop header
LB: loop body
LE: loop exit
PB: predicated region body
PF: predicated region fallthrough
CT: control target
= control target key end

     0   :  { %s1674_s27 = smov 0   ;;  %s2074_s0 = inlined_call_operand.vmem [shape: f32[256,128], index: 0, kind: input, shape index: {}]   ;;  %s2075_s1 = inlined_call_operand.vmem [shape: f32[1,256], index: 1, kind: input, shape index: {}]   ;;  %s2076_s2 = inlined_call_operand.vmem [shape: f32[1,256], index: 2, kind: input, shape index: {}]   ;;  %s2077_s3 = inlined_call_operand.vmem [shape: f32[256,256], index: 3, kind: input, shape index: {}]   ;;  %s2078_s4 = inlined_call_operand.vmem [shape: f32[128,128], index: 4, kind: input, shape index: {}]   ;;  %s2079_s5 = inlined_call_operand.vmem [shape: f32[256,128], index: 5, kind: output, shape index: {0}]   ;;  %s2080_s6 = inlined_call_operand.vmem [shape: f32[256,128], index: 6, kind: output, shape index: {1}]   ;;  %s2081_s7 = inlined_call_operand.vmem [shape: f32[1,256], index: 7, kind: output, shape index: {2}]   ;;  %s2082_s8 = inlined_call_operand.vmem [shape: f32[1,256], index: 8, kind: output, shape index: {3}]  }
   0x1 LB: > { %s1680_s28 = sadd.s32 4294967295, %s1623_s27   ;;  %p1207_p0 = scmp.ge.s32.totalorder %s1623_s27, 1  ;;  %s1623_s27 = sphi %s1674_s27, %s19_s27  }
   0x2   : > { %p271_p1 = scmp.lt.s32.totalorder %s1623_s27, 3 }
   0x4   : > { %p272_p2 = pnand %p1207_p0, %p271_p1 }
   0x5   : > { %v342_v0 = vld [vmem:[%s2075_s1] sm:$0x3] (!%p272_p2)  ;;  %s1208_s11 = sshll.u32 (!%p272_p2), %s1680_s28, 4  ;;  %v392_v9 = vlaneseq (!%p272_p2)  ;;  %v376_v17 = vld [vmem:[%s2074_s0 + $0x88] sm:$0xff] (!%p272_p2)  ;;  %v377_v21 = vld [vmem:[%s2074_s0 + $0x90] sm:$0xff] (!%p272_p2)  ;;  %vm1626_vm0 = vmmov (!%p272_p2), 0  }
   0x6   : > { %275 = sbr.rel (%p272_p2) target bundleno = 779 (0x30b), region = 40  ;;  %v343_v1 = vld [vmem:[%s2076_s2] sm:$0x3] (!%p272_p2)  ;;  %v345_v2 = vrot.slane (!%p272_p2), %v342_v0, 1  ;;  %p318_p3 = scmp.lt.s32.totalorder (!%p272_p2), %s1208_s11, 31  ;;  %v360_v20 = vld [vmem:[%s2074_s0 + $0x8] sm:$0xff] (!%p272_p2) }
   0x7   : > { %v349_v3 = vrot.slane (!%p272_p2), %v343_v1, 1  ;;  %v393_v12 = vshrl.u32 (!%p272_p2), %v392_v9, 7  ;;  %v375_v16 = vld [vmem:[%s2074_s0 + $0x80] sm:$0xff] (!%p272_p2)  ;;  %v378_v22 = vld [vmem:[%s2074_s0 + $0x98] sm:$0xff] (!%p272_p2)  ;;  %v361_v23 = vld [vmem:[%s2074_s0 + $0x10] sm:$0xff] (!%p272_p2)  ;;  %p336_p4 = scmp.lt.s32.totalorder (!%p272_p2), %s1680_s28, 1 }
   0x8   : > { %v347_v4 = vadd.f32 (!%p272_p2), %v345_v2, %v342_v0  ;;  %v359_v19 = vld [vmem:[%s2074_s0] sm:$0xff] (!%p272_p2)  ;;  %v362_v24 = vld [vmem:[%s2074_s0 + $0x18] sm:$0xff] (!%p272_p2)  ;;  %v380_v26 = vld [vmem:[%s2074_s0 + $0xa8] sm:$0xff] (!%p272_p2) }
   0x9   : > { %v351_v5 = vadd.f32 (!%p272_p2), %v349_v3, %v343_v1  ;;  %v394_v15 = vsub.s32 (!%p272_p2), 0, %v393_v12  ;;  %v379_v25 = vld [vmem:[%s2074_s0 + $0xa0] sm:$0xff] (!%p272_p2)  ;;  %v711_v29 = vld [vmem:[%s2078_s4 + $0x8] sm:$0xff] (!%p272_p2)  ;;  %v712_v30 = vld [vmem:[%s2078_s4 + $0x10] sm:$0xff] (!%p272_p2) }
   0xa   : > { %v352_v6 = vmul.f32 (!%p272_p2), 0.00390625, %v347_v4  ;;  %v363_v27 = vld [vmem:[%s2074_s0 + $0x20] sm:$0xff] (!%p272_p2)  ;;  %v364_v32 = vld [vmem:[%s2074_s0 + $0x28] sm:$0xff] (!%p272_p2)  ;;  %v1751_v33 = vld [vmem:[%s2074_s0 + $0xb0] sm:$0xff] (!%p272_p2) }
   0xb   : > { %v353_v7 = vmul.f32 (!%p272_p2), 0.00390625, %v351_v5  ;;  %v710_v28 = vld [vmem:[%s2078_s4] sm:$0xff] (!%p272_p2)  ;;  %v713_v35 = vld [vmem:[%s2078_s4 + $0x18] sm:$0xff] (!%p272_p2)  ;;  %v715_v42 = vld [vmem:[%s2078_s4 + $0x28] sm:$0xff] (!%p272_p2) }
   0xc   : > { %v354_v8 = vmul.f32 (!%p272_p2), %v352_v6, %v352_v6  ;;  %v1706_v18 = vrot.slane (!%p272_p2), %v352_v6, %v394_v15  ;;  %v1523_v34 = vpack.c.bf16 (!%p272_p2), %v711_v29, %v710_v28  ;;  %v382_v39 = vld [vmem:[%s2074_s0 + $0xb8] sm:$0xff] (!%p272_p2)  ;;  %v1527_v40 = vpack.c.bf16 (!%p272_p2), %v713_v35, %v712_v30  ;;  %v714_v41 = vld [vmem:[%s2078_s4 + $0x20] sm:$0xff] (!%p272_p2)  ;;  %v365_v60 = vld [vmem:[%s2074_s0 + $0x30] sm:$0xff] (!%p272_p2) }
   0xd   : > { %s2084_s11 = smov (!%p318_p3, %s1208_s11), 31  ;;  %v1531_v55 = vpack.c.bf16 %v715_v42, %v714_v41  ;;  %v366_v1 = vld [vmem:[%s2074_s0 + $0x38] sm:$0xff]  ;;  %v716_v2 = vld [vmem:[%s2078_s4 + $0x30] sm:$0xff] }
   0xe   : > { %s1218_s12 = sshll.u32 %s2084_s11, 4  ;;  %v355_v10 = vsub.f32 %v353_v7, %v354_v8  ;;  %v413_v31 = vsub.f32 %v375_v16, %v1706_v18  ;;  %v414_v36 = vsub.f32 %v376_v17, %v1706_v18  ;;  %v397_v37 = vsub.f32 %v359_v19, %v1706_v18  ;;  %1524 = vmatprep.subr.bf16.mxu1 %v1523_v34  ;;  %v717_v3 = vld [vmem:[%s2078_s4 + $0x38] sm:$0xff]  ;;  %v383_v8 = vld [vmem:[%s2074_s0 + $0xc0] sm:$0xff]  ;;  %s1212_s25 = sshll.u32 %s2084_s11, 3 }
   0xf   : > { %s1697_s15 = scalar_lea.vmem %s2077_s3, %s1218_s12  ;;  %v398_v38 = vsub.f32 %v360_v20, %v1706_v18  ;;  %v415_v44 = vsub.f32 %v377_v21, %v1706_v18  ;;  %v416_v45 = vsub.f32 %v378_v22, %v1706_v18  ;;  %v399_v46 = vsub.f32 %v361_v23, %v1706_v18  ;;  %1526 = vmatpush3.bf16.msra.mxu1 %v1523_v34  ;;  %v368_v20 = vld [vmem:[%s2074_s0 + $0x48] sm:$0xff]  ;;  %v718_v21 = vld [vmem:[%s2078_s4 + $0x40] sm:$0xff]  ;;  %v386_v28 = vld [vmem:[%s2074_s0 + $0xd8] sm:$0xff]  ;;  %s1967_s30 = scalar_lea.vmem %s2079_s5, %s1212_s25 }
  0x10   : > { %v356_v11 = vmax.f32 %v355_v10, 0.0  ;;  %v534_v13 = vld [vmem:[%s1697_s15 + $0x8] sm:$0xff]  ;;  %v400_v47 = vsub.f32 %v362_v24, %v1706_v18  ;;  %v417_v49 = vsub.f32 %v379_v25, %v1706_v18  ;;  %v418_v50 = vsub.f32 %v380_v26, %v1706_v18  ;;  %1528 = vmatprep.subr.bf16.mxu1 %v1527_v40  ;;  %s2031_s12 = scalar_lea.vmem %s2080_s6, %s1212_s25 }
  0x11   : > { %629 = vmatprep.mubr.f32.mxu0 %v534_v13  ;;  %v401_v51 = vsub.f32 %v363_v27, %v1706_v18  ;;  %v402_v52 = vsub.f32 %v364_v32, %v1706_v18  ;;  %v419_v53 = vsub.f32 %v1751_v33, %v1706_v18  ;;  %v420_v54 = vsub.f32 %v382_v39, %v1706_v18  ;;  %v384_v10 = vld [vmem:[%s2074_s0 + $0xc8] sm:$0xff]  ;;  %v367_v13 = vld [vmem:[%s2074_s0 + $0x40] sm:$0xff]  ;;  %v385_v27 = vld [vmem:[%s2074_s0 + $0xd0] sm:$0xff] }
  0x12   : > { %v357_v14 = vadd.f32 1e-05, %v356_v11  ;;  %v403_v11 = vsub.f32 %v365_v60, %v1706_v18  ;;  %v404_v12 = vsub.f32 %v366_v1, %v1706_v18  ;;  %v421_v19 = vsub.f32 %v383_v8, %v1706_v18  ;;  %v719_v22 = vld [vmem:[%s2078_s4 + $0x48] sm:$0xff]  ;;  %v721_v39 = vld [vmem:[%s2078_s4 + $0x58] sm:$0xff]  ;;  %v389_v60 = vld [vmem:[%s2074_s0 + $0xf0] sm:$0xff] }
  0x13   : > { %1530 = vmatpush3.bf16.msra.mxu1 %v1527_v40  ;;  %v422_v26 = vsub.f32 %v384_v10, %v1706_v18  ;;  %v405_v29 = vsub.f32 %v367_v13, %v1706_v18  ;;  %v406_v30 = vsub.f32 %v368_v20, %v1706_v18  ;;  %v1539_v32 = vpack.c.bf16 %v719_v22, %v718_v21 }
  0x14   : > { %1615 = vrsqrt.f32 %v357_v14  ;;  %1532 = vmatprep.subr.bf16.mxu1 %v1531_v55  ;;  %v1535_v14 = vpack.c.bf16 %v717_v3, %v716_v2  ;;  %v427_v3 = vsub.f32 %v389_v60, %v1706_v18  ;;  %v725_v60 = vld [vmem:[%s2078_s4 + $0x78] sm:$0xff] }
  0x17   : > { %1534 = vmatpush3.bf16.msra.mxu1 %v1531_v55  ;;  %v372_v55 = vld [vmem:[%s2074_s0 + $0x68] sm:$0xff] }
  0x18   : > { %1536 = vmatprep.subr.bf16.mxu1 %v1535_v14 }
  0x1b   : > { %1538 = vmatpush3.bf16.msra.mxu1 %v1535_v14 }
  0x1c   : > { %1540 = vmatprep.subr.bf16.mxu1 %v1539_v32 }
  0x1e   : > { %v1616_v43 = vpop.eup %1615 }
  0x1f   : > { %v1772_v48 = vrot.slane %v1616_v43, %v394_v15  ;;  %v424_v43 = vsub.f32 %v386_v28, %v1706_v18  ;;  %1542 = vmatpush3.bf16.msra.mxu1 %v1539_v32  ;;  %v537_v28 = vld [vmem:[%s1697_s15 + $0x20] sm:$0xff] }
  0x20   : > { %v541_v32 = vld [vmem:[%s1697_s15 + $0x40] sm:$0xff] }
  0x21   : > { %v451_v56 = vmul.f32 %v1772_v48, %v413_v31  ;;  %v452_v57 = vmul.f32 %v1772_v48, %v414_v36  ;;  %v435_v58 = vmul.f32 %v1772_v48, %v397_v37  ;;  %v436_v59 = vmul.f32 %v1772_v48, %v398_v38  ;;  %v369_v31 = vld [vmem:[%s2074_s0 + $0x50] sm:$0xff]  ;;  %v370_v37 = vld [vmem:[%s2074_s0 + $0x58] sm:$0xff] }
  0x22   : > { %v453_v61 = vmul.f32 %v1772_v48, %v415_v44  ;;  %v454_v62 = vmul.f32 %v1772_v48, %v416_v45  ;;  %v437_v63 = vmul.f32 %v1772_v48, %v399_v46  ;;  %v438_v0 = vmul.f32 %v1772_v48, %v400_v47  ;;  %v720_v38 = vld [vmem:[%s2078_s4 + $0x50] sm:$0xff]  ;;  %v387_v44 = vld [vmem:[%s2074_s0 + $0xe0] sm:$0xff]  ;;  %v388_v45 = vld [vmem:[%s2074_s0 + $0xe8] sm:$0xff] }
  0x23   : > { %v1491_v4 = vpack.c.bf16 %v452_v57, %v451_v56  ;;  %v1493_v5 = vpack.c.bf16 %v436_v59, %v435_v58  ;;  %v455_v6 = vmul.f32 %v1772_v48, %v417_v49  ;;  %v456_v7 = vmul.f32 %v1772_v48, %v418_v50 }
  0x24   : > { %v1495_v9 = vpack.c.bf16 %v454_v62, %v453_v61  ;;  %v1497_v15 = vpack.c.bf16 %v438_v0, %v437_v63  ;;  %v439_v16 = vmul.f32 %v1772_v48, %v401_v51  ;;  %v440_v17 = vmul.f32 %v1772_v48, %v402_v52  ;;  %v390_v61 = vld [vmem:[%s2074_s0 + $0xf8] sm:$0xff] }
  0x25   : > { %1492 = vmatprep.subr.bf16.mxu0 %v1491_v4  ;;  %v1499_v23 = vpack.c.bf16 %v456_v7, %v455_v6  ;;  %v457_v24 = vmul.f32 %v1772_v48, %v419_v53  ;;  %v458_v25 = vmul.f32 %v1772_v48, %v420_v54  ;;  %v441_v34 = vmul.f32 %v1772_v48, %v403_v11  ;;  %v371_v54 = vld [vmem:[%s2074_s0 + $0x60] sm:$0xff]  ;;  %v373_v4 = vld [vmem:[%s2074_s0 + $0x70] sm:$0xff] }
  0x26   : > { %1494 = vmatpush3.bf16.msra.mxu0 %v1493_v5  ;;  %v1501_v33 = vpack.c.bf16 %v440_v17, %v439_v16  ;;  %v442_v35 = vmul.f32 %v1772_v48, %v404_v12  ;;  %v423_v36 = vsub.f32 %v385_v27, %v1706_v18  ;;  %v459_v41 = vmul.f32 %v1772_v48, %v421_v19  ;;  %v538_v27 = vld [vmem:[%s1697_s15 + $0x28] sm:$0xff] }
  0x27   : > { %1496 = vmatprep.subr.bf16.mxu0 %v1495_v9  ;;  %v1503_v40 = vpack.c.bf16 %v458_v25, %v457_v24  ;;  %v460_v42 = vmul.f32 %v1772_v48, %v422_v26  ;;  %v407_v46 = vsub.f32 %v369_v31, %v1706_v18  ;;  %v408_v47 = vsub.f32 %v370_v37, %v1706_v18  ;;  %v374_v9 = vld [vmem:[%s2074_s0 + $0x78] sm:$0xff]  ;;  %v533_v24 = vld [vmem:[%s1697_s15] sm:$0xff]  ;;  %v535_v26 = vld [vmem:[%s1697_s15 + $0x10] sm:$0xff] }
  0x28   : > { %v1543_v49 = vpack.c.bf16 %v721_v39, %v720_v38  ;;  %v1505_v50 = vpack.c.bf16 %v442_v35, %v441_v34  ;;  %v443_v51 = vmul.f32 %v1772_v48, %v405_v29  ;;  %v444_v52 = vmul.f32 %v1772_v48, %v406_v30  ;;  %v536_v25 = vld [vmem:[%s1697_s15 + $0x18] sm:$0xff]  ;;  %v539_v30 = vld [vmem:[%s1697_s15 + $0x30] sm:$0xff]  ;;  %v542_v31 = vld [vmem:[%s1697_s15 + $0x48] sm:$0xff] }
  0x29   : > { %v425_v53 = vsub.f32 %v387_v44, %v1706_v18  ;;  %v1507_v56 = vpack.c.bf16 %v460_v42, %v459_v41  ;;  %v461_v57 = vmul.f32 %v1772_v48, %v423_v36  ;;  %v462_v58 = vmul.f32 %v1772_v48, %v424_v43  ;;  %v540_v29 = vld [vmem:[%s1697_s15 + $0x38] sm:$0xff]  ;;  %v543_v34 = vld [vmem:[%s1697_s15 + $0x50] sm:$0xff]  ;;  %v546_v35 = vld [vmem:[%s1697_s15 + $0x68] sm:$0xff] }
  0x2a   : > { %1498 = vmatpush3.bf16.msra.mxu0 %v1497_v15  ;;  %v426_v59 = vsub.f32 %v388_v45, %v1706_v18  ;;  %v409_v62 = vsub.f32 %v371_v54, %v1706_v18  ;;  %v410_v63 = vsub.f32 %v372_v55, %v1706_v18  ;;  %1544 = vmatprep.subr.bf16.mxu1 %v1543_v49  ;;  %v545_v36 = vld [vmem:[%s1697_s15 + $0x60] sm:$0xff]  ;;  %v548_v37 = vld [vmem:[%s1697_s15 + $0x78] sm:$0xff]  ;;  %v547_v38 = vld [vmem:[%s1697_s15 + $0x70] sm:$0xff] }
  0x2b   : > { %1500 = vmatprep.subr.bf16.mxu0 %v1499_v23  ;;  %v1509_v0 = vpack.c.bf16 %v444_v52, %v443_v51  ;;  %v445_v1 = vmul.f32 %v1772_v48, %v407_v46  ;;  %v446_v2 = vmul.f32 %v1772_v48, %v408_v47  ;;  %v1511_v5 = vpack.c.bf16 %v462_v58, %v461_v57  ;;  %v550_v39 = vld [vmem:[%s1697_s15 + $0x88] sm:$0xff]  ;;  %v552_v41 = vld [vmem:[%s1697_s15 + $0x98] sm:$0xff]  ;;  %v551_v42 = vld [vmem:[%s1697_s15 + $0x90] sm:$0xff] }
  0x2c   : > { %v463_v6 = vmul.f32 %v1772_v48, %v425_v53  ;;  %v464_v7 = vmul.f32 %v1772_v48, %v426_v59  ;;  %v428_v8 = vsub.f32 %v390_v61, %v1706_v18  ;;  %1546 = vmatpush3.bf16.msra.mxu1 %v1543_v49  ;;  %v411_v10 = vsub.f32 %v373_v4, %v1706_v18  ;;  %v554_v43 = vld [vmem:[%s1697_s15 + $0xa8] sm:$0xff]  ;;  %v553_v44 = vld [vmem:[%s1697_s15 + $0xa0] sm:$0xff]  ;;  %v556_v45 = vld [vmem:[%s1697_s15 + $0xb8] sm:$0xff] }
  0x2d   : > { %v1513_v11 = vpack.c.bf16 %v446_v2, %v445_v1  ;;  %v447_v12 = vmul.f32 %v1772_v48, %v409_v62  ;;  %v448_v13 = vmul.f32 %v1772_v48, %v410_v63  ;;  %v412_v14 = vsub.f32 %v374_v9, %v1706_v18  ;;  %v555_v46 = vld [vmem:[%s1697_s15 + $0xb0] sm:$0xff]  ;;  %v558_v47 = vld [vmem:[%s1697_s15 + $0xc8] sm:$0xff]  ;;  %v557_v49 = vld [vmem:[%s1697_s15 + $0xc0] sm:$0xff] }
  0x2e   : > { %1502 = vmatpush3.bf16.msra.mxu0 %v1501_v33  ;;  %v1515_v15 = vpack.c.bf16 %v464_v7, %v463_v6  ;;  %v465_v16 = vmul.f32 %v1772_v48, %v427_v3  ;;  %v466_v17 = vmul.f32 %v1772_v48, %v428_v8  ;;  %v449_v20 = vmul.f32 %v1772_v48, %v411_v10  ;;  %v544_v33 = vld [vmem:[%s1697_s15 + $0x58] sm:$0xff]  ;;  %v559_v51 = vld [vmem:[%s1697_s15 + $0xd0] sm:$0xff]  ;;  %v562_v52 = vld [vmem:[%s1697_s15 + $0xe8] sm:$0xff] }
  0x2f   : > { %1504 = vmatprep.subr.bf16.mxu0 %v1503_v40  ;;  %v1517_v19 = vpack.c.bf16 %v448_v13, %v447_v12  ;;  %v450_v21 = vmul.f32 %v1772_v48, %v412_v14  ;;  %v549_v40 = vld [vmem:[%s1697_s15 + $0x80] sm:$0xff]  ;;  %v564_v54 = vld [vmem:[%s1697_s15 + $0xf8] sm:$0xff]  ;;  %v563_v55 = vld [vmem:[%s1697_s15 + $0xf0] sm:$0xff] }
  0x30   : > { %v1519_v22 = vpack.c.bf16 %v466_v17, %v465_v16  ;;  %v561_v53 = vld [vmem:[%s1697_s15 + $0xe0] sm:$0xff]  ;;  %v723_v57 = vld [vmem:[%s2078_s4 + $0x68] sm:$0xff]  ;;  %v724_v59 = vld [vmem:[%s2078_s4 + $0x70] sm:$0xff] }
  0x31   : > { %v1521_v23 = vpack.c.bf16 %v450_v21, %v449_v20  ;;  %v1551_v61 = vpack.c.bf16 %v725_v60, %v724_v59 }
  0x32   : > { %1506 = vmatpush3.bf16.msra.mxu0 %v1505_v50  ;;  %v560_v50 = vld [vmem:[%s1697_s15 + $0xd8] sm:$0xff]  ;;  %s1215_s15 = sshll.u32 %s1680_s28, 7  ;;  %s2086_s28 = smov (!%p336_p4, %s1680_s28), 1 }
  0x33   : > { %1508 = vmatprep.subr.bf16.mxu0 %v1507_v56  ;;  %v722_v56 = vld [vmem:[%s2078_s4 + $0x60] sm:$0xff]  ;;  %s1950_s24 = scalar_lea.vmem %s2074_s0, %s1215_s15  ;;  %s338_s14 = scalar_lea.vmem %s2081_s7, %s2086_s28 }
  0x34   : > { %v1547_v58 = vpack.c.bf16 %v723_v57, %v722_v56  ;;  %v469_v62 = vld [vmem:[%s1950_s24] sm:$0xff]  ;;  %v470_v63 = vld [vmem:[%s1950_s24 + $0x8] sm:$0xff]  ;;  %v472_v1 = vld [vmem:[%s1950_s24 + $0x18] sm:$0xff]  ;;  %s341_s18 = scalar_lea.vmem %s2082_s8, %s2086_s28 }
  0x35   : > { %v473_v2 = vld [vmem:[%s1950_s24 + $0x20] sm:$0xff]  ;;  %v474_v3 = vld [vmem:[%s1950_s24 + $0x28] sm:$0xff]  ;;  %v485_v4 = vsub.f32 %v469_v62, %v1706_v18  ;;  %v475_v7 = vld [vmem:[%s1950_s24 + $0x30] sm:$0xff]  ;;  %v488_v10 = vsub.f32 %v472_v1, %v1706_v18 }
  0x36   : > { %1510 = vmatpush3.bf16.msra.mxu0 %v1509_v0  ;;  %1548 = vmatprep.subr.bf16.mxu1 %v1547_v58  ;;  %v471_v0 = vld [vmem:[%s1950_s24 + $0x10] sm:$0xff]  ;;  %v476_v8 = vld [vmem:[%s1950_s24 + $0x38] sm:$0xff]  ;;  %v477_v9 = vld [vmem:[%s1950_s24 + $0x40] sm:$0xff]  ;;  %v490_v12 = vsub.f32 %v474_v3, %v1706_v18  ;;  %v491_v16 = vsub.f32 %v475_v7, %v1706_v18 }
  0x37   : > { %1512 = vmatprep.subr.bf16.mxu0 %v1511_v5  ;;  %1550 = vmatpush3.bf16.msra.mxu1 %v1547_v58  ;;  %v486_v5 = vsub.f32 %v470_v63, %v1706_v18  ;;  %v487_v6 = vsub.f32 %v471_v0, %v1706_v18  ;;  %v478_v13 = vld [vmem:[%s1950_s24 + $0x48] sm:$0xff]  ;;  %v479_v14 = vld [vmem:[%s1950_s24 + $0x50] sm:$0xff]  ;;  %v492_v17 = vsub.f32 %v476_v8, %v1706_v18  ;;  %v481_v21 = vld [vmem:[%s1950_s24 + $0x60] sm:$0xff] }
  0x38   : > { %1552 = vmatprep.subr.bf16.mxu1 %v1551_v61  ;;  %v501_v20 = vmul.f32 %v485_v4, %v1772_v48 }
  0x3a   : > { %1514 = vmatpush3.bf16.msra.mxu0 %v1513_v11  ;;  %v489_v11 = vsub.f32 %v473_v2, %v1706_v18  ;;  %517 = vst [vmem:[%s1967_s30] sm:$0xff] %v501_v20 }
  0x3b   : > { %1516 = vmatprep.subr.bf16.mxu0 %v1515_v15  ;;  %1554 = vmatpush3.bf16.msra.mxu1 %v1551_v61  ;;  %v480_v15 = vld [vmem:[%s1950_s24 + $0x58] sm:$0xff] }
  0x3e   : > { %1518 = vmatpush3.bf16.msra.mxu0 %v1517_v19  ;;  %v493_v19 = vsub.f32 %v477_v9, %v1706_v18 }
  0x3f   : > { %1520 = vmatprep.subr.bf16.mxu0 %v1519_v22  ;;  %v482_v22 = vld [vmem:[%s1950_s24 + $0x68] sm:$0xff] }
  0x42   : > { %1522 = vmatpush3.bf16.msra.mxu0 %v1521_v23  ;;  %v483_v23 = vld [vmem:[%s1950_s24 + $0x70] sm:$0xff] }
  0x45   : > { %630 = vmatmul.mubr.f32.vlgmr.msra.gmra.mrb[0].mxu0 %v533_v24  ;;  %v494_v24 = vsub.f32 %v478_v13, %v1706_v18 }
  0x46   : > { %634 = vmatprep.mubr.f32.mxu0 %v536_v25  ;;  %v495_v25 = vsub.f32 %v479_v14, %v1706_v18 }
  0x49   : > { %635 = vmatmul.mubr.f32.gmra.mrb[2].mxu0 %v535_v26  ;;  %v496_v26 = vsub.f32 %v480_v15, %v1706_v18 }
  0x4a   : > { %639 = vmatprep.mubr.f32.mxu0 %v538_v27  ;;  %v502_v27 = vmul.f32 %v486_v5, %v1772_v48 }
  0x4c   : > { %518 = vst [vmem:[%s1967_s30 + $0x8] sm:$0xff] %v502_v27 }
  0x4d   : > { %640 = vmatmul.mubr.f32.gmra.mrb[4].mxu0 %v537_v28  ;;  %v484_v28 = vld [vmem:[%s1950_s24 + $0x78] sm:$0xff] }
  0x4e   : > { %644 = vmatprep.mubr.f32.mxu0 %v540_v29  ;;  %v497_v29 = vsub.f32 %v481_v21, %v1706_v18 }
  0x51   : > { %645 = vmatmul.mubr.f32.gmra.mrb[6].mxu0 %v539_v30  ;;  %v498_v30 = vsub.f32 %v482_v22, %v1706_v18 }
  0x52   : > { %649 = vmatprep.mubr.f32.mxu0 %v542_v31  ;;  %v499_v31 = vsub.f32 %v483_v23, %v1706_v18 }
  0x55   : > { %650 = vmatmul.mubr.f32.gmra.mrb[8].mxu0 %v541_v32  ;;  %v503_v32 = vmul.f32 %v487_v6, %v1772_v48 }
  0x56   : > { %654 = vmatprep.mubr.f32.mxu0 %v544_v33  ;;  %v500_v33 = vsub.f32 %v484_v28, %v1706_v18  ;;  %v510_v18 = vmul.f32 %v494_v24, %v1772_v48 }
  0x57   : > { %519 = vst [vmem:[%s1967_s30 + $0x10] sm:$0xff] %v503_v32  ;;  %v1627_v32 = vmov 0.0  }
  0x58   : > { %526 = vst [vmem:[%s1967_s30 + $0x48] sm:$0xff] %v510_v18 }
  0x59   : > { %655 = vmatmul.mubr.f32.gmra.mrb[10].mxu0 %v543_v34  ;;  %v504_v34 = vmul.f32 %v488_v10, %v1772_v48 }
  0x5a   : > { %659 = vmatprep.mubr.f32.mxu0 %v546_v35  ;;  %v505_v35 = vmul.f32 %v489_v11, %v1772_v48 }
  0x5b   : > { %520 = vst [vmem:[%s1967_s30 + $0x18] sm:$0xff] %v504_v34 }
  0x5c   : > { %521 = vst [vmem:[%s1967_s30 + $0x20] sm:$0xff] %v505_v35 }
  0x5d   : > { %660 = vmatmul.mubr.f32.gmra.mrb[12].mxu0 %v545_v36  ;;  %v506_v36 = vmul.f32 %v490_v12, %v1772_v48 }
  0x5e   : > { %664 = vmatprep.mubr.f32.mxu0 %v548_v37  ;;  %v507_v37 = vmul.f32 %v491_v16, %v1772_v48 }
  0x5f   : > { %522 = vst [vmem:[%s1967_s30 + $0x28] sm:$0xff] %v506_v36 }
  0x60   : > { %523 = vst [vmem:[%s1967_s30 + $0x30] sm:$0xff] %v507_v37 }
  0x61   : > { %665 = vmatmul.mubr.f32.gmra.mrb[14].mxu0 %v547_v38  ;;  %v508_v38 = vmul.f32 %v492_v17, %v1772_v48 }
  0x62   : > { %669 = vmatprep.mubr.f32.mxu0 %v550_v39  ;;  %v509_v39 = vmul.f32 %v493_v19, %v1772_v48 }
  0x63   : > { %524 = vst [vmem:[%s1967_s30 + $0x38] sm:$0xff] %v508_v38 }
  0x64   : > { %525 = vst [vmem:[%s1967_s30 + $0x40] sm:$0xff] %v509_v39 }
  0x65   : > { %670 = vmatmul.mubr.f32.gmra.mrb[16].mxu0 %v549_v40  ;;  %v511_v40 = vmul.f32 %v495_v25, %v1772_v48 }
  0x66   : > { %674 = vmatprep.mubr.f32.mxu0 %v552_v41  ;;  %v512_v41 = vmul.f32 %v496_v26, %v1772_v48 }
  0x67   : > { %527 = vst [vmem:[%s1967_s30 + $0x50] sm:$0xff] %v511_v40 }
  0x68   : > { %528 = vst [vmem:[%s1967_s30 + $0x58] sm:$0xff] %v512_v41 }
  0x69   : > { %675 = vmatmul.mubr.f32.gmra.mrb[18].mxu0 %v551_v42  ;;  %v513_v42 = vmul.f32 %v497_v29, %v1772_v48 }
  0x6a   : > { %679 = vmatprep.mubr.f32.mxu0 %v554_v43  ;;  %v514_v43 = vmul.f32 %v498_v30, %v1772_v48 }
  0x6b   : > { %529 = vst [vmem:[%s1967_s30 + $0x60] sm:$0xff] %v513_v42 }
  0x6c   : > { %530 = vst [vmem:[%s1967_s30 + $0x68] sm:$0xff] %v514_v43 }
  0x6d   : > { %680 = vmatmul.mubr.f32.gmra.mrb[20].mxu0 %v553_v44  ;;  %v515_v44 = vmul.f32 %v499_v31, %v1772_v48  ;;  %v1625_v31 = vmov 0.0|0.0  }
  0x6e   : > { %684 = vmatprep.mubr.f32.mxu0 %v556_v45  ;;  %v516_v45 = vmul.f32 %v500_v33, %v1772_v48  ;;  %1555 = vmatprep.subr.bf16.mxu1 %v1625_v31 }
  0x6f   : > { %531 = vst [vmem:[%s1967_s30 + $0x70] sm:$0xff] %v515_v44  ;;  %1579 = vmatprep.subr.bf16.mxu0 %v1625_v31 }
  0x70   : > { %532 = vst [vmem:[%s1967_s30 + $0x78] sm:$0xff] %v516_v45 }
  0x71   : > { %685 = vmatmul.mubr.f32.gmra.mrb[22].mxu0 %v555_v46 }
  0x72   : > { %689 = vmatprep.mubr.f32.mxu0 %v558_v47 }
  0x75   : > { %690 = vmatmul.mubr.f32.gmra.mrb[24].mxu0 %v557_v49 }
  0x76   : > { %694 = vmatprep.mubr.f32.mxu0 %v560_v50 }
  0x79   : > { %695 = vmatmul.mubr.f32.gmra.mrb[26].mxu0 %v559_v51 }
  0x7a   : > { %699 = vmatprep.mubr.f32.mxu0 %v562_v52 }
  0x7d   : > { %700 = vmatmul.mubr.f32.gmra.mrb[28].mxu0 %v561_v53 }
  0x7e   : > { %704 = vmatprep.mubr.f32.mxu0 %v564_v54 }
  0x81   : > { %705 = vmatmul.mubr.f32.gmra.mrb[30].mxu0 %v563_v55 }
  0x82   : > { %1488 = vmatprep.mubr.msk.f32.mxu0 %vm1626_vm0, %v1627_v32 }
 0x118   : > { %v1251_v46 = vpop.f32.mrb[0].mxu0 }
 0x119   : > { %v1252_v47 = vpop.f32.mrb[1].mxu0 }
 0x11a   : > { %v1253_v49 = vadd.f32 %v1252_v47, %v1251_v46 }
 0x11c   : > { %v1254_v50 = vpop.f32.mrb[2].mxu0  ;;  %1397 = vmatprep.mubr.f32.mxu1 %v1253_v49 }
 0x11d   : > { %v1255_v51 = vpop.f32.mrb[3].mxu0 }
 0x11e   : > { %v1256_v52 = vadd.f32 %v1255_v51, %v1254_v50 }
 0x120   : > { %v1257_v53 = vpop.f32.mrb[4].mxu0  ;;  %1398 = vmatmul.mubr.f32.vlgmr.msra.gmra.mrb[0].mxu1 %v1256_v52 }
 0x121   : > { %v1258_v48 = vpop.f32.mrb[5].mxu0 }
 0x122   : > { %v1259_v54 = vadd.f32 %v1258_v48, %v1257_v53 }
 0x124   : > { %v1260_v55 = vpop.f32.mrb[6].mxu0  ;;  %1400 = vmatprep.mubr.f32.mxu1 %v1259_v54 }
 0x125   : > { %v1261_v56 = vpop.f32.mrb[7].mxu0 }
 0x126   : > { %v1262_v57 = vadd.f32 %v1261_v56, %v1260_v55 }
 0x128   : > { %v1263_v58 = vpop.f32.mrb[8].mxu0  ;;  %1401 = vmatmul.mubr.f32.gmra.mrb[2].mxu1 %v1262_v57 }
 0x129   : > { %v1264_v59 = vpop.f32.mrb[9].mxu0 }
 0x12a   : > { %v1265_v60 = vadd.f32 %v1264_v59, %v1263_v58 }
 0x12c   : > { %v1266_v61 = vpop.f32.mrb[10].mxu0  ;;  %1403 = vmatprep.mubr.f32.mxu1 %v1265_v60 }
 0x12d   : > { %v1267_v62 = vpop.f32.mrb[11].mxu0 }
 0x12e   : > { %v1268_v63 = vadd.f32 %v1267_v62, %v1266_v61 }
 0x130   : > { %v1269_v0 = vpop.f32.mrb[12].mxu0  ;;  %1404 = vmatmul.mubr.f32.gmra.mrb[4].mxu1 %v1268_v63 }
 0x131   : > { %v1270_v1 = vpop.f32.mrb[13].mxu0 }
 0x132   : > { %v1271_v2 = vadd.f32 %v1270_v1, %v1269_v0 }
 0x134   : > { %v1272_v3 = vpop.f32.mrb[14].mxu0  ;;  %1406 = vmatprep.mubr.f32.mxu1 %v1271_v2 }
 0x135   : > { %v1273_v4 = vpop.f32.mrb[15].mxu0 }
 0x136   : > { %v1274_v5 = vadd.f32 %v1273_v4, %v1272_v3 }
 0x138   : > { %v1275_v6 = vpop.f32.mrb[16].mxu0  ;;  %1407 = vmatmul.mubr.f32.gmra.mrb[6].mxu1 %v1274_v5 }
 0x139   : > { %v1276_v7 = vpop.f32.mrb[17].mxu0 }
 0x13a   : > { %v1277_v8 = vadd.f32 %v1276_v7, %v1275_v6 }
 0x13c   : > { %v1278_v9 = vpop.f32.mrb[18].mxu0  ;;  %1409 = vmatprep.mubr.f32.mxu1 %v1277_v8 }
 0x13d   : > { %v1279_v10 = vpop.f32.mrb[19].mxu0 }
 0x13e   : > { %v1280_v11 = vadd.f32 %v1279_v10, %v1278_v9 }
 0x140   : > { %v1281_v12 = vpop.f32.mrb[20].mxu0  ;;  %1410 = vmatmul.mubr.f32.gmra.mrb[8].mxu1 %v1280_v11 }
 0x141   : > { %v1282_v13 = vpop.f32.mrb[21].mxu0 }
 0x142   : > { %v1283_v14 = vadd.f32 %v1282_v13, %v1281_v12 }
 0x144   : > { %v1284_v15 = vpop.f32.mrb[22].mxu0  ;;  %1412 = vmatprep.mubr.f32.mxu1 %v1283_v14 }
 0x145   : > { %v1285_v16 = vpop.f32.mrb[23].mxu0 }
 0x146   : > { %v1286_v17 = vadd.f32 %v1285_v16, %v1284_v15 }
 0x148   : > { %v1287_v19 = vpop.f32.mrb[24].mxu0  ;;  %1413 = vmatmul.mubr.f32.gmra.mrb[10].mxu1 %v1286_v17 }
 0x149   : > { %v1288_v20 = vpop.f32.mrb[25].mxu0 }
 0x14a   : > { %v1289_v21 = vadd.f32 %v1288_v20, %v1287_v19 }
 0x14c   : > { %v1290_v22 = vpop.f32.mrb[26].mxu0  ;;  %1415 = vmatprep.mubr.f32.mxu1 %v1289_v21 }
 0x14d   : > { %v1291_v23 = vpop.f32.mrb[27].mxu0 }
 0x14e   : > { %v1292_v24 = vadd.f32 %v1291_v23, %v1290_v22 }
 0x150   : > { %v1293_v25 = vpop.f32.mrb[28].mxu0  ;;  %1416 = vmatmul.mubr.f32.gmra.mrb[12].mxu1 %v1292_v24 }
 0x151   : > { %v1294_v26 = vpop.f32.mrb[29].mxu0 }
 0x152   : > { %v1295_v27 = vadd.f32 %v1294_v26, %v1293_v25 }
 0x154   : > { %v1296_v28 = vpop.f32.mrb[30].mxu0  ;;  %1418 = vmatprep.mubr.f32.mxu1 %v1295_v27 }
 0x155   : > { %v1297_v29 = vpop.f32.mrb[31].mxu0 }
 0x156   : > { %v1298_v30 = vadd.f32 %v1297_v29, %v1296_v28 }
 0x158   : > { %1419 = vmatmul.mubr.f32.gmra.mrb[14].mxu1 %v1298_v30 }
 0x159   : > { %1453 = vmatprep.mubr.msk.f32.mxu1 %vm1626_vm0, %v1627_v32 }
 0x1f3   : > { %v1399_v33 = vpop.f32.mrb[0].mxu1 }
 0x1f4   : > { %v872_v34 = vmax.f32 %v1399_v33, 0.0  ;;  %v792_v35 = vpop.f32.mrb[1].mxu1 }
 0x1f5   : > { %v871_v36 = vmax.f32 %v792_v35, 0.0 }
 0x1f6   : > { %888 = vst [vmem:[%s2031_s12 + $0x8] sm:$0xff] %v872_v34  ;;  %v975_v37 = vmul.f32 %v872_v34, %v872_v34 }
 0x1f7   : > { %887 = vst [vmem:[%s2031_s12] sm:$0xff] %v871_v36  ;;  %v1556_v38 = vpack.c.bf16 %v872_v34, %v871_v36  ;;  %v974_v39 = vmul.f32 %v871_v36, %v871_v36  ;;  %v1628_v34 = vmov 1.0  }
 0x1f9   : > { %v1580_v18 = vpack.c.bf16 %v975_v37, %v974_v39  ;;  %1557 = vmatpush3.bf16.msra.mxu1 %v1556_v38 }
 0x1fa   : > { %1558 = vmatprep.subr.bf16.mxu1 %v1625_v31 }
 0x1fb   : > { %v1402_v40 = vpop.f32.mrb[2].mxu1  ;;  %1581 = vmatpush3.bf16.msra.mxu0 %v1580_v18 }
 0x1fc   : > { %v874_v41 = vmax.f32 %v1402_v40, 0.0  ;;  %v802_v42 = vpop.f32.mrb[3].mxu1  ;;  %1582 = vmatprep.subr.bf16.mxu0 %v1625_v31 }
 0x1fd   : > { %v873_v43 = vmax.f32 %v802_v42, 0.0 }
 0x1fe   : > { %890 = vst [vmem:[%s2031_s12 + $0x18] sm:$0xff] %v874_v41  ;;  %v977_v44 = vmul.f32 %v874_v41, %v874_v41 }
 0x1ff   : > { %889 = vst [vmem:[%s2031_s12 + $0x10] sm:$0xff] %v873_v43  ;;  %v1559_v45 = vpack.c.bf16 %v874_v41, %v873_v43  ;;  %v976_v46 = vmul.f32 %v873_v43, %v873_v43 }
 0x201   : > { %v1583_v47 = vpack.c.bf16 %v977_v44, %v976_v46  ;;  %1560 = vmatpush3.bf16.msra.mxu1 %v1559_v45 }
 0x202   : > { %1561 = vmatprep.subr.bf16.mxu1 %v1625_v31 }
 0x203   : > { %v1405_v49 = vpop.f32.mrb[4].mxu1  ;;  %1584 = vmatpush3.bf16.msra.mxu0 %v1583_v47 }
 0x204   : > { %v876_v50 = vmax.f32 %v1405_v49, 0.0  ;;  %v812_v51 = vpop.f32.mrb[5].mxu1  ;;  %1585 = vmatprep.subr.bf16.mxu0 %v1625_v31 }
 0x205   : > { %v875_v52 = vmax.f32 %v812_v51, 0.0 }
 0x206   : > { %892 = vst [vmem:[%s2031_s12 + $0x28] sm:$0xff] %v876_v50  ;;  %v979_v53 = vmul.f32 %v876_v50, %v876_v50 }
 0x207   : > { %891 = vst [vmem:[%s2031_s12 + $0x20] sm:$0xff] %v875_v52  ;;  %v1562_v48 = vpack.c.bf16 %v876_v50, %v875_v52  ;;  %v978_v54 = vmul.f32 %v875_v52, %v875_v52 }
 0x209   : > { %v1586_v55 = vpack.c.bf16 %v979_v53, %v978_v54  ;;  %1563 = vmatpush3.bf16.msra.mxu1 %v1562_v48 }
 0x20a   : > { %1564 = vmatprep.subr.bf16.mxu1 %v1625_v31 }
 0x20b   : > { %v1408_v56 = vpop.f32.mrb[6].mxu1  ;;  %1587 = vmatpush3.bf16.msra.mxu0 %v1586_v55 }
 0x20c   : > { %v878_v57 = vmax.f32 %v1408_v56, 0.0  ;;  %v822_v58 = vpop.f32.mrb[7].mxu1  ;;  %1588 = vmatprep.subr.bf16.mxu0 %v1625_v31 }
 0x20d   : > { %v877_v59 = vmax.f32 %v822_v58, 0.0 }
 0x20e   : > { %894 = vst [vmem:[%s2031_s12 + $0x38] sm:$0xff] %v878_v57  ;;  %v981_v60 = vmul.f32 %v878_v57, %v878_v57 }
 0x20f   : > { %893 = vst [vmem:[%s2031_s12 + $0x30] sm:$0xff] %v877_v59  ;;  %v1565_v61 = vpack.c.bf16 %v878_v57, %v877_v59  ;;  %v980_v62 = vmul.f32 %v877_v59, %v877_v59 }
 0x211   : > { %v1589_v63 = vpack.c.bf16 %v981_v60, %v980_v62  ;;  %1566 = vmatpush3.bf16.msra.mxu1 %v1565_v61 }
 0x212   : > { %1567 = vmatprep.subr.bf16.mxu1 %v1625_v31 }
 0x213   : > { %v1411_v0 = vpop.f32.mrb[8].mxu1  ;;  %1590 = vmatpush3.bf16.msra.mxu0 %v1589_v63 }
 0x214   : > { %v880_v1 = vmax.f32 %v1411_v0, 0.0  ;;  %v832_v2 = vpop.f32.mrb[9].mxu1  ;;  %1591 = vmatprep.subr.bf16.mxu0 %v1625_v31 }
 0x215   : > { %v879_v3 = vmax.f32 %v832_v2, 0.0 }
 0x216   : > { %896 = vst [vmem:[%s2031_s12 + $0x48] sm:$0xff] %v880_v1  ;;  %v983_v4 = vmul.f32 %v880_v1, %v880_v1 }
 0x217   : > { %895 = vst [vmem:[%s2031_s12 + $0x40] sm:$0xff] %v879_v3  ;;  %v1568_v5 = vpack.c.bf16 %v880_v1, %v879_v3  ;;  %v982_v6 = vmul.f32 %v879_v3, %v879_v3 }
 0x219   : > { %v1592_v7 = vpack.c.bf16 %v983_v4, %v982_v6  ;;  %1569 = vmatpush3.bf16.msra.mxu1 %v1568_v5 }
 0x21a   : > { %1570 = vmatprep.subr.bf16.mxu1 %v1625_v31 }
 0x21b   : > { %v1414_v8 = vpop.f32.mrb[10].mxu1  ;;  %1593 = vmatpush3.bf16.msra.mxu0 %v1592_v7 }
 0x21c   : > { %v882_v9 = vmax.f32 %v1414_v8, 0.0  ;;  %v842_v10 = vpop.f32.mrb[11].mxu1  ;;  %1594 = vmatprep.subr.bf16.mxu0 %v1625_v31 }
 0x21d   : > { %v881_v11 = vmax.f32 %v842_v10, 0.0 }
 0x21e   : > { %898 = vst [vmem:[%s2031_s12 + $0x58] sm:$0xff] %v882_v9  ;;  %v985_v12 = vmul.f32 %v882_v9, %v882_v9 }
 0x21f   : > { %897 = vst [vmem:[%s2031_s12 + $0x50] sm:$0xff] %v881_v11  ;;  %v1571_v13 = vpack.c.bf16 %v882_v9, %v881_v11  ;;  %v984_v14 = vmul.f32 %v881_v11, %v881_v11 }
 0x221   : > { %v1595_v15 = vpack.c.bf16 %v985_v12, %v984_v14  ;;  %1572 = vmatpush3.bf16.msra.mxu1 %v1571_v13 }
 0x222   : > { %1573 = vmatprep.subr.bf16.mxu1 %v1625_v31 }
 0x223   : > { %v1417_v16 = vpop.f32.mrb[12].mxu1  ;;  %1596 = vmatpush3.bf16.msra.mxu0 %v1595_v15 }
 0x224   : > { %v884_v17 = vmax.f32 %v1417_v16, 0.0  ;;  %v852_v19 = vpop.f32.mrb[13].mxu1  ;;  %1597 = vmatprep.subr.bf16.mxu0 %v1625_v31 }
 0x225   : > { %v883_v20 = vmax.f32 %v852_v19, 0.0 }
 0x226   : > { %900 = vst [vmem:[%s2031_s12 + $0x68] sm:$0xff] %v884_v17  ;;  %v987_v21 = vmul.f32 %v884_v17, %v884_v17 }
 0x227   : > { %899 = vst [vmem:[%s2031_s12 + $0x60] sm:$0xff] %v883_v20  ;;  %v1574_v22 = vpack.c.bf16 %v884_v17, %v883_v20  ;;  %v986_v23 = vmul.f32 %v883_v20, %v883_v20 }
 0x229   : > { %v1598_v24 = vpack.c.bf16 %v987_v21, %v986_v23  ;;  %1575 = vmatpush3.bf16.msra.mxu1 %v1574_v22 }
 0x22a   : > { %1576 = vmatprep.subr.bf16.mxu1 %v1625_v31 }
 0x22b   : > { %v1420_v25 = vpop.f32.mrb[14].mxu1  ;;  %1599 = vmatpush3.bf16.msra.mxu0 %v1598_v24 }
 0x22c   : > { %v886_v26 = vmax.f32 %v1420_v25, 0.0  ;;  %v862_v27 = vpop.f32.mrb[15].mxu1  ;;  %1600 = vmatprep.subr.bf16.mxu0 %v1625_v31 }
 0x22d   : > { %v885_v28 = vmax.f32 %v862_v27, 0.0 }
 0x22e   : > { %902 = vst [vmem:[%s2031_s12 + $0x78] sm:$0xff] %v886_v26  ;;  %v989_v29 = vmul.f32 %v886_v26, %v886_v26 }
 0x22f   : > { %901 = vst [vmem:[%s2031_s12 + $0x70] sm:$0xff] %v885_v28  ;;  %v1577_v30 = vpack.c.bf16 %v886_v26, %v885_v28  ;;  %v988_v32 = vmul.f32 %v885_v28, %v885_v28 }
 0x231   : > { %v1601_v33 = vpack.c.bf16 %v989_v29, %v988_v32  ;;  %1578 = vmatpush3.bf16.msra.mxu1 %v1577_v30 }
 0x233   : > { %1602 = vmatpush3.bf16.msra.mxu0 %v1601_v33 }
 0x234   : > { %1454 = vmatmul.mubr.f32.vlgmr.msra.gmra.mrb[16].mxu1 %v1628_v34 }
 0x236   : > { %1489 = vmatmul.mubr.f32.vlgmr.msra.gmra.mrb[32].mxu0 %v1628_v34 }
 0x307   : > { %v969_v35 = vpop.f32.mrb[16].mxu1 }
 0x308   : > { %973 = vst [vmem:[%s338_s14] sm:$0x1] %v969_v35  ;;  %v1455_v31 = vpop.f32.mrb[17].mxu1 }
 0x309   : > { %v1056_v36 = vpop.f32.mrb[32].mxu0 }
 0x30a   : > { %1060 = vst [vmem:[%s341_s18] sm:$0x1] %v1056_v36  ;;  %v1490_v37 = vpop.f32.mrb[33].mxu0 }
 0x30b PF: > { %s19_s27 = sadd.s32 1, %s1623_s27  }
 0x30c   : > { %p16_p5 = scmp.ge.s32.totalorder %s19_s27, 4  }
 0x30e   :  { %18 = sbr.rel (!%p16_p5) target bundleno = 1 (0x1), region = 107 }

// kernel: cgcl1_forward.6
= control target key start
LH: loop header
LB: loop body
LE: loop exit
PB: predicated region body
PF: predicated region fallthrough
CT: control target
= control target key end

     0   :  { %s2269_s0 = inlined_call_operand.vmem [shape: f32[256,128], index: 0, kind: input, shape index: {}]   ;;  %s2270_s1 = inlined_call_operand.vmem [shape: f32[1,256], index: 1, kind: input, shape index: {}]   ;;  %s2271_s2 = inlined_call_operand.vmem [shape: f32[1,256], index: 2, kind: input, shape index: {}]   ;;  %s2272_s3 = inlined_call_operand.vmem [shape: f32[256,256], index: 3, kind: input, shape index: {}]   ;;  %s2273_s4 = inlined_call_operand.vmem [shape: f32[128,128], index: 4, kind: input, shape index: {}]   ;;  %s2274_s5 = inlined_call_operand.hbm [shape: f32[256,128], index: 5, kind: output, shape index: {0}]   ;;  %s2275_s6 = inlined_call_operand.vmem [shape: f32[256,128], index: 6, kind: output, shape index: {1}]   ;;  %s2276_s7 = inlined_call_operand.vmem [shape: f32[1,256], index: 7, kind: output, shape index: {2}]   ;;  %s2277_s8 = inlined_call_operand.vmem [shape: f32[1,256], index: 8, kind: output, shape index: {3}]  }
   0x1   :  { %2278 = sst [smem:[#allocation5_spill]] %s2270_s1 }
   0x2   :  { %14 = vsyncpa [#allocation3], 0 }
   0x3   :  { %16 = vsyncpa [#allocation3 + $0x1], 0  ;;  %s1786_s27 = smov 0   ;;  %s1788_s28 = smov 0  }
   0x4   :  { %s1790_s29 = smov 0   ;;  %s1792_s30 = smov 0  }
   0x5 LB: > { %s1807_s9 = sadd.s32 4294967295, %s1732_s30   ;;  %s1221_s10 = sadd.s32 4294967294, %s1732_s30   ;;  %s1732_s30 = sphi %s1792_s30, %s2285_s30   ;;  %s1728_s29 = sphi %s1790_s29, %s2284_s29   ;;  %s1724_s28 = sphi %s1788_s28, %s2283_s28   ;;  %s1720_s27 = sphi %s1786_s27, %s2282_s27  }
   0x6   : > { %s1811_s11 = sadd.s32 1, %s1732_s30   ;;  %s139_s12 = sadd.s32 1, %s1728_s29 }
   0x7   : > { %s136_s13 = ssub.s32 %s1732_s30, %s1811_s11  ;;  %p149_p0 = scmp.ne.s32.totalorder %s1728_s29, %s1724_s28 }
   0x8   : > { %p137_p1 = scmp.eq.s32.totalorder %s136_s13, 0  ;;  %p150_p2 = scmp.eq.s32.totalorder %s1807_s9, 1 }
   0x9   : > { %p155_p3 = scmp.ne.s32.totalorder %s1724_s28, %s1720_s27  ;;  %p156_p4 = scmp.eq.s32.totalorder %s1221_s10, 1 }
   0xa   : > { %s1822_s14 = scalar_select %p137_p1, %s1728_s29, %s139_s12  }
   0xb   : > { %p1824_p5 = por %p150_p2, %p149_p0  ;;  %p1828_p6 = por %p156_p4, %p155_p3 }
   0xc   : > { %p1224_p7 = scmp.ge.s32.totalorder %s1732_s30, 1  ;;  %p274_p8 = scmp.lt.s32.totalorder %s1732_s30, 3 }
   0xe   : > { %p275_p9 = pnand %p1224_p7, %p274_p8 }
   0xf   : > { %s2281_s1 = sld [smem:[#allocation5_spill]] (!%p275_p9)  ;;  %v341_v1 = vld [vmem:[%s2271_s2] sm:$0x3] (!%p275_p9)  ;;  %s1226_s21 = sshll.u32 (!%p275_p9), %s1807_s9, 4  ;;  %v390_v9 = vlaneseq (!%p275_p9)  ;;  %v374_v17 = vld [vmem:[%s2269_s0 + $0x88] sm:$0xff] (!%p275_p9)  ;;  %v375_v21 = vld [vmem:[%s2269_s0 + $0x90] sm:$0xff] (!%p275_p9) }
  0x10   : > { %278 = sbr.rel (%p275_p9) target bundleno = 795 (0x31b), region = 40  ;;  %v347_v3 = vrot.slane (!%p275_p9), %v341_v1, 1  ;;  %p321_p10 = scmp.lt.s32.totalorder (!%p275_p9), %s1226_s21, 31  ;;  %v373_v16 = vld [vmem:[%s2269_s0 + $0x80] sm:$0xff] (!%p275_p9)  ;;  %v358_v20 = vld [vmem:[%s2269_s0 + $0x8] sm:$0xff] (!%p275_p9)  ;;  %v376_v22 = vld [vmem:[%s2269_s0 + $0x98] sm:$0xff] (!%p275_p9) }
  0x11   : > { %v391_v12 = vshrl.u32 (!%p275_p9), %v390_v9, 7  ;;  %v357_v19 = vld [vmem:[%s2269_s0] sm:$0xff] (!%p275_p9)  ;;  %v359_v23 = vld [vmem:[%s2269_s0 + $0x10] sm:$0xff] (!%p275_p9)  ;;  %v360_v24 = vld [vmem:[%s2269_s0 + $0x18] sm:$0xff] (!%p275_p9)  ;;  %vm1735_vm0 = vmmov (!%p275_p9), 0   ;;  %s300_s19 = sand.u32 (!%p275_p9), 1, %s1724_s28  }
  0x12   : > { %v349_v5 = vadd.f32 (!%p275_p9), %v347_v3, %v341_v1  ;;  %v377_v25 = vld [vmem:[%s2269_s0 + $0xa0] sm:$0xff] (!%p275_p9)  ;;  %v378_v26 = vld [vmem:[%s2269_s0 + $0xa8] sm:$0xff] (!%p275_p9)  ;;  %v710_v30 = vld [vmem:[%s2273_s4 + $0x10] sm:$0xff] (!%p275_p9)  ;;  %s1225_s20 = sshll.u32 (!%p275_p9), %s300_s19, 7  ;;  %s1238_s23 = sshll.u32 (!%p275_p9), %s1807_s9, 11 }
  0x13   : > { %v392_v15 = vsub.s32 (!%p275_p9), 0, %v391_v12  ;;  %v361_v27 = vld [vmem:[%s2269_s0 + $0x20] sm:$0xff] (!%p275_p9)  ;;  %v709_v29 = vld [vmem:[%s2273_s4 + $0x8] sm:$0xff] (!%p275_p9)  ;;  %v1901_v33 = vld [vmem:[%s2269_s0 + $0xb0] sm:$0xff] (!%p275_p9)  ;;  %s2202_s10 = scalar_lea.hbm (!%p275_p9), %s2274_s5, %s1238_s23  ;;  %s2220_s12 = scalar_lea.sflag (!%p275_p9), [#allocation3], %s300_s19 }
  0x14   : > { %v351_v7 = vmul.f32 (!%p275_p9), 0.00390625, %v349_v5  ;;  %v708_v28 = vld [vmem:[%s2273_s4] sm:$0xff] (!%p275_p9)  ;;  %v362_v32 = vld [vmem:[%s2269_s0 + $0x28] sm:$0xff] (!%p275_p9)  ;;  %v711_v35 = vld [vmem:[%s2273_s4 + $0x18] sm:$0xff] (!%p275_p9) }
  0x15   : > { %v340_v0 = vld [vmem:[%s2281_s1] sm:$0x3] (!%p275_p9)  ;;  %v1543_v34 = vpack.c.bf16 (!%p275_p9), %v709_v29, %v708_v28  ;;  %v380_v39 = vld [vmem:[%s2269_s0 + $0xb8] sm:$0xff] (!%p275_p9)  ;;  %v1547_v40 = vpack.c.bf16 (!%p275_p9), %v711_v35, %v710_v30  ;;  %v713_v42 = vld [vmem:[%s2273_s4 + $0x28] sm:$0xff] (!%p275_p9) }
  0x16   : > { %v343_v2 = vrot.slane (!%p275_p9), %v340_v0, 1  ;;  %v712_v41 = vld [vmem:[%s2273_s4 + $0x20] sm:$0xff] (!%p275_p9)  ;;  %v363_v60 = vld [vmem:[%s2269_s0 + $0x30] sm:$0xff] (!%p275_p9)  ;;  %v364_v1 = vld [vmem:[%s2269_s0 + $0x38] sm:$0xff] (!%p275_p9) }
  0x17   : > { %s2287_s21 = smov (!%p321_p10, %s1226_s21), 31  ;;  %1544 = vmatprep.subr.bf16.mxu1 %v1543_v34  ;;  %v1551_v55 = vpack.c.bf16 %v713_v42, %v712_v41  ;;  %v715_v3 = vld [vmem:[%s2273_s4 + $0x38] sm:$0xff] }
  0x18   : > { %v345_v4 = vadd.f32 %v343_v2, %v340_v0  ;;  %s1237_s22 = sshll.u32 %s2287_s21, 4  ;;  %1546 = vmatpush3.bf16.msra.mxu1 %v1543_v34  ;;  %v714_v2 = vld [vmem:[%s2273_s4 + $0x30] sm:$0xff]  ;;  %v384_v28 = vld [vmem:[%s2269_s0 + $0xd8] sm:$0xff] }
  0x19   : > { %s1847_s25 = scalar_lea.vmem %s2272_s3, %s1237_s22  ;;  %1548 = vmatprep.subr.bf16.mxu1 %v1547_v40  ;;  %s2177_s22 = scalar_lea.vmem [#allocation2], %s1225_s20 }
  0x1a   : > { %v350_v6 = vmul.f32 0.00390625, %v345_v4  ;;  %v532_v13 = vld [vmem:[%s1847_s25 + $0x8] sm:$0xff]  ;;  %s1084_s24 = sshll.u32 %s2177_s22, 4  ;;  %s2210_s24 = int_to_ptr.vmem [resolvable:$true] %s1084_s24 }
  0x1b   : > { %627 = vmatprep.mubr.f32.mxu0 %v532_v13  ;;  %v365_v13 = vld [vmem:[%s2269_s0 + $0x40] sm:$0xff] }
  0x1c   : > { %v352_v8 = vmul.f32 %v350_v6, %v350_v6  ;;  %v1856_v18 = vrot.slane %v350_v6, %v392_v15  ;;  %1550 = vmatpush3.bf16.msra.mxu1 %v1547_v40 }
  0x1d   : > { %1552 = vmatprep.subr.bf16.mxu1 %v1551_v55 }
  0x1e   : > { %v353_v10 = vsub.f32 %v351_v7, %v352_v8  ;;  %v411_v31 = vsub.f32 %v373_v16, %v1856_v18  ;;  %v412_v36 = vsub.f32 %v374_v17, %v1856_v18  ;;  %v395_v37 = vsub.f32 %v357_v19, %v1856_v18  ;;  %v381_v8 = vld [vmem:[%s2269_s0 + $0xc0] sm:$0xff] }
  0x1f   : > { %v396_v38 = vsub.f32 %v358_v20, %v1856_v18  ;;  %v413_v44 = vsub.f32 %v375_v21, %v1856_v18  ;;  %v414_v45 = vsub.f32 %v376_v22, %v1856_v18  ;;  %v397_v46 = vsub.f32 %v359_v23, %v1856_v18  ;;  %v366_v20 = vld [vmem:[%s2269_s0 + $0x48] sm:$0xff]  ;;  %v716_v21 = vld [vmem:[%s2273_s4 + $0x40] sm:$0xff] }
  0x20   : > { %v354_v11 = vmax.f32 %v353_v10, 0.0  ;;  %v398_v47 = vsub.f32 %v360_v24, %v1856_v18  ;;  %v415_v49 = vsub.f32 %v377_v25, %v1856_v18  ;;  %v416_v50 = vsub.f32 %v378_v26, %v1856_v18  ;;  %v382_v10 = vld [vmem:[%s2269_s0 + $0xc8] sm:$0xff]  ;;  %1554 = vmatpush3.bf16.msra.mxu1 %v1551_v55 }
  0x21   : > { %v399_v51 = vsub.f32 %v361_v27, %v1856_v18  ;;  %v400_v52 = vsub.f32 %v362_v32, %v1856_v18  ;;  %v417_v53 = vsub.f32 %v1901_v33, %v1856_v18  ;;  %v418_v54 = vsub.f32 %v380_v39, %v1856_v18  ;;  %v717_v22 = vld [vmem:[%s2273_s4 + $0x48] sm:$0xff]  ;;  %v383_v27 = vld [vmem:[%s2269_s0 + $0xd0] sm:$0xff]  ;;  %v719_v39 = vld [vmem:[%s2273_s4 + $0x58] sm:$0xff] }
  0x22   : > { %v355_v14 = vadd.f32 1e-05, %v354_v11  ;;  %v401_v11 = vsub.f32 %v363_v60, %v1856_v18  ;;  %v402_v12 = vsub.f32 %v364_v1, %v1856_v18  ;;  %v419_v19 = vsub.f32 %v381_v8, %v1856_v18  ;;  %v370_v55 = vld [vmem:[%s2269_s0 + $0x68] sm:$0xff]  ;;  %v387_v60 = vld [vmem:[%s2269_s0 + $0xf0] sm:$0xff] }
  0x23   : > { %v420_v26 = vsub.f32 %v382_v10, %v1856_v18  ;;  %v403_v29 = vsub.f32 %v365_v13, %v1856_v18  ;;  %v404_v30 = vsub.f32 %v366_v20, %v1856_v18  ;;  %v1559_v32 = vpack.c.bf16 %v717_v22, %v716_v21 }
  0x24   : > { %1668 = vrsqrt.f32 %v355_v14  ;;  %v1555_v14 = vpack.c.bf16 %v715_v3, %v714_v2  ;;  %v425_v3 = vsub.f32 %v387_v60, %v1856_v18  ;;  %v723_v60 = vld [vmem:[%s2273_s4 + $0x78] sm:$0xff] }
  0x26   : > { %1556 = vmatprep.subr.bf16.mxu1 %v1555_v14 }
  0x27   : > { %1558 = vmatpush3.bf16.msra.mxu1 %v1555_v14 }
  0x28   : > { %1560 = vmatprep.subr.bf16.mxu1 %v1559_v32 }
  0x2b   : > { %1562 = vmatpush3.bf16.msra.mxu1 %v1559_v32  ;;  %v539_v32 = vld [vmem:[%s1847_s25 + $0x40] sm:$0xff] }
  0x2e   : > { %v1669_v43 = vpop.eup %1668 }
  0x2f   : > { %v1922_v48 = vrot.slane %v1669_v43, %v392_v15  ;;  %v422_v43 = vsub.f32 %v384_v28, %v1856_v18  ;;  %v535_v28 = vld [vmem:[%s1847_s25 + $0x20] sm:$0xff] }
  0x31   : > { %v449_v56 = vmul.f32 %v1922_v48, %v411_v31  ;;  %v450_v57 = vmul.f32 %v1922_v48, %v412_v36  ;;  %v433_v58 = vmul.f32 %v1922_v48, %v395_v37  ;;  %v434_v59 = vmul.f32 %v1922_v48, %v396_v38  ;;  %v367_v31 = vld [vmem:[%s2269_s0 + $0x50] sm:$0xff]  ;;  %v368_v37 = vld [vmem:[%s2269_s0 + $0x58] sm:$0xff] }
  0x32   : > { %v451_v61 = vmul.f32 %v1922_v48, %v413_v44  ;;  %v452_v62 = vmul.f32 %v1922_v48, %v414_v45  ;;  %v435_v63 = vmul.f32 %v1922_v48, %v397_v46  ;;  %v436_v0 = vmul.f32 %v1922_v48, %v398_v47  ;;  %v718_v38 = vld [vmem:[%s2273_s4 + $0x50] sm:$0xff]  ;;  %v385_v44 = vld [vmem:[%s2269_s0 + $0xe0] sm:$0xff]  ;;  %v386_v45 = vld [vmem:[%s2269_s0 + $0xe8] sm:$0xff] }
  0x33   : > { %v1511_v4 = vpack.c.bf16 %v450_v57, %v449_v56  ;;  %v1513_v5 = vpack.c.bf16 %v434_v59, %v433_v58  ;;  %v453_v6 = vmul.f32 %v1922_v48, %v415_v49  ;;  %v454_v7 = vmul.f32 %v1922_v48, %v416_v50 }
  0x34   : > { %v1515_v9 = vpack.c.bf16 %v452_v62, %v451_v61  ;;  %v1517_v15 = vpack.c.bf16 %v436_v0, %v435_v63  ;;  %v437_v16 = vmul.f32 %v1922_v48, %v399_v51  ;;  %v438_v17 = vmul.f32 %v1922_v48, %v400_v52  ;;  %v388_v61 = vld [vmem:[%s2269_s0 + $0xf8] sm:$0xff] }
  0x35   : > { %1512 = vmatprep.subr.bf16.mxu0 %v1511_v4  ;;  %v1519_v23 = vpack.c.bf16 %v454_v7, %v453_v6  ;;  %v455_v24 = vmul.f32 %v1922_v48, %v417_v53  ;;  %v456_v25 = vmul.f32 %v1922_v48, %v418_v54  ;;  %v439_v34 = vmul.f32 %v1922_v48, %v401_v11  ;;  %v369_v54 = vld [vmem:[%s2269_s0 + $0x60] sm:$0xff]  ;;  %v371_v4 = vld [vmem:[%s2269_s0 + $0x70] sm:$0xff] }
  0x36   : > { %1514 = vmatpush3.bf16.msra.mxu0 %v1513_v5  ;;  %v1521_v33 = vpack.c.bf16 %v438_v17, %v437_v16  ;;  %v440_v35 = vmul.f32 %v1922_v48, %v402_v12  ;;  %v421_v36 = vsub.f32 %v383_v27, %v1856_v18  ;;  %v457_v41 = vmul.f32 %v1922_v48, %v419_v19  ;;  %v536_v27 = vld [vmem:[%s1847_s25 + $0x28] sm:$0xff] }
  0x37   : > { %1516 = vmatprep.subr.bf16.mxu0 %v1515_v9  ;;  %v1523_v40 = vpack.c.bf16 %v456_v25, %v455_v24  ;;  %v458_v42 = vmul.f32 %v1922_v48, %v420_v26  ;;  %v405_v46 = vsub.f32 %v367_v31, %v1856_v18  ;;  %v406_v47 = vsub.f32 %v368_v37, %v1856_v18  ;;  %v372_v9 = vld [vmem:[%s2269_s0 + $0x78] sm:$0xff]  ;;  %v531_v24 = vld [vmem:[%s1847_s25] sm:$0xff]  ;;  %v533_v26 = vld [vmem:[%s1847_s25 + $0x10] sm:$0xff] }
  0x38   : > { %v1563_v49 = vpack.c.bf16 %v719_v39, %v718_v38  ;;  %v1525_v50 = vpack.c.bf16 %v440_v35, %v439_v34  ;;  %v441_v51 = vmul.f32 %v1922_v48, %v403_v29  ;;  %v442_v52 = vmul.f32 %v1922_v48, %v404_v30  ;;  %v534_v25 = vld [vmem:[%s1847_s25 + $0x18] sm:$0xff]  ;;  %v537_v30 = vld [vmem:[%s1847_s25 + $0x30] sm:$0xff]  ;;  %v540_v31 = vld [vmem:[%s1847_s25 + $0x48] sm:$0xff] }
  0x39   : > { %v423_v53 = vsub.f32 %v385_v44, %v1856_v18  ;;  %v1527_v56 = vpack.c.bf16 %v458_v42, %v457_v41  ;;  %v459_v57 = vmul.f32 %v1922_v48, %v421_v36  ;;  %v460_v58 = vmul.f32 %v1922_v48, %v422_v43  ;;  %v538_v29 = vld [vmem:[%s1847_s25 + $0x38] sm:$0xff]  ;;  %v541_v34 = vld [vmem:[%s1847_s25 + $0x50] sm:$0xff]  ;;  %v544_v35 = vld [vmem:[%s1847_s25 + $0x68] sm:$0xff] }
  0x3a   : > { %1518 = vmatpush3.bf16.msra.mxu0 %v1517_v15  ;;  %v424_v59 = vsub.f32 %v386_v45, %v1856_v18  ;;  %v407_v62 = vsub.f32 %v369_v54, %v1856_v18  ;;  %v408_v63 = vsub.f32 %v370_v55, %v1856_v18  ;;  %1564 = vmatprep.subr.bf16.mxu1 %v1563_v49  ;;  %v543_v36 = vld [vmem:[%s1847_s25 + $0x60] sm:$0xff]  ;;  %v546_v37 = vld [vmem:[%s1847_s25 + $0x78] sm:$0xff]  ;;  %v545_v38 = vld [vmem:[%s1847_s25 + $0x70] sm:$0xff] }
  0x3b   : > { %1520 = vmatprep.subr.bf16.mxu0 %v1519_v23  ;;  %v1529_v0 = vpack.c.bf16 %v442_v52, %v441_v51  ;;  %v443_v1 = vmul.f32 %v1922_v48, %v405_v46  ;;  %v444_v2 = vmul.f32 %v1922_v48, %v406_v47  ;;  %v1531_v5 = vpack.c.bf16 %v460_v58, %v459_v57  ;;  %v548_v39 = vld [vmem:[%s1847_s25 + $0x88] sm:$0xff]  ;;  %v550_v41 = vld [vmem:[%s1847_s25 + $0x98] sm:$0xff]  ;;  %v549_v42 = vld [vmem:[%s1847_s25 + $0x90] sm:$0xff] }
  0x3c   : > { %v461_v6 = vmul.f32 %v1922_v48, %v423_v53  ;;  %v462_v7 = vmul.f32 %v1922_v48, %v424_v59  ;;  %v426_v8 = vsub.f32 %v388_v61, %v1856_v18  ;;  %1566 = vmatpush3.bf16.msra.mxu1 %v1563_v49  ;;  %v409_v10 = vsub.f32 %v371_v4, %v1856_v18  ;;  %v552_v43 = vld [vmem:[%s1847_s25 + $0xa8] sm:$0xff]  ;;  %v551_v44 = vld [vmem:[%s1847_s25 + $0xa0] sm:$0xff]  ;;  %v554_v45 = vld [vmem:[%s1847_s25 + $0xb8] sm:$0xff] }
  0x3d   : > { %v1533_v11 = vpack.c.bf16 %v444_v2, %v443_v1  ;;  %v445_v12 = vmul.f32 %v1922_v48, %v407_v62  ;;  %v446_v13 = vmul.f32 %v1922_v48, %v408_v63  ;;  %v410_v14 = vsub.f32 %v372_v9, %v1856_v18  ;;  %v553_v46 = vld [vmem:[%s1847_s25 + $0xb0] sm:$0xff]  ;;  %v556_v47 = vld [vmem:[%s1847_s25 + $0xc8] sm:$0xff]  ;;  %v555_v49 = vld [vmem:[%s1847_s25 + $0xc0] sm:$0xff] }
  0x3e   : > { %1522 = vmatpush3.bf16.msra.mxu0 %v1521_v33  ;;  %v1535_v15 = vpack.c.bf16 %v462_v7, %v461_v6  ;;  %v463_v16 = vmul.f32 %v1922_v48, %v425_v3  ;;  %v464_v17 = vmul.f32 %v1922_v48, %v426_v8  ;;  %v447_v20 = vmul.f32 %v1922_v48, %v409_v10  ;;  %v542_v33 = vld [vmem:[%s1847_s25 + $0x58] sm:$0xff]  ;;  %v557_v51 = vld [vmem:[%s1847_s25 + $0xd0] sm:$0xff]  ;;  %v560_v52 = vld [vmem:[%s1847_s25 + $0xe8] sm:$0xff] }
  0x3f   : > { %1524 = vmatprep.subr.bf16.mxu0 %v1523_v40  ;;  %v1537_v19 = vpack.c.bf16 %v446_v13, %v445_v12  ;;  %v448_v21 = vmul.f32 %v1922_v48, %v410_v14  ;;  %v547_v40 = vld [vmem:[%s1847_s25 + $0x80] sm:$0xff]  ;;  %v562_v54 = vld [vmem:[%s1847_s25 + $0xf8] sm:$0xff]  ;;  %v561_v55 = vld [vmem:[%s1847_s25 + $0xf0] sm:$0xff] }
  0x40   : > { %v1539_v22 = vpack.c.bf16 %v464_v17, %v463_v16  ;;  %v559_v53 = vld [vmem:[%s1847_s25 + $0xe0] sm:$0xff]  ;;  %v721_v57 = vld [vmem:[%s2273_s4 + $0x68] sm:$0xff]  ;;  %v722_v59 = vld [vmem:[%s2273_s4 + $0x70] sm:$0xff] }
  0x41   : > { %v1541_v23 = vpack.c.bf16 %v448_v21, %v447_v20  ;;  %v1571_v61 = vpack.c.bf16 %v723_v60, %v722_v59 }
  0x42   : > { %1526 = vmatpush3.bf16.msra.mxu0 %v1525_v50  ;;  %v558_v50 = vld [vmem:[%s1847_s25 + $0xd8] sm:$0xff]  ;;  %s1230_s25 = sshll.u32 %s2287_s21, 3  ;;  %s1231_s21 = sshll.u32 %s1807_s9, 7 }
  0x43   : > { %1528 = vmatprep.subr.bf16.mxu0 %v1527_v56  ;;  %v720_v56 = vld [vmem:[%s2273_s4 + $0x60] sm:$0xff]  ;;  %s2102_s1 = scalar_lea.vmem %s2275_s6, %s1230_s25  ;;  %s2138_s18 = scalar_lea.vmem %s2269_s0, %s1231_s21 }
  0x44   : > { %v1567_v58 = vpack.c.bf16 %v721_v57, %v720_v56  ;;  %s1738_s21 = smov [#allocation2]  }
  0x45   : > { %s1674_s13 = sshll.u32 %s1738_s21, 4  ;;  %s1675_s13 = int_to_ptr.vmem [resolvable:$false] %s1674_s13 }
  0x46   : > { %1530 = vmatpush3.bf16.msra.mxu0 %v1529_v0  ;;  %1568 = vmatprep.subr.bf16.mxu1 %v1567_v58  ;;  %s1676_s17 = scalar_lea.vmem %s1675_s13, 4096  ;;  %p1677_p0 = scmp.lt.s32.totalorder %s2210_s24, %s1675_s13 }
  0x47   : > { %1532 = vmatprep.subr.bf16.mxu0 %v1531_v5  ;;  %1570 = vmatpush3.bf16.msra.mxu1 %v1567_v58 }
  0x48   : > { %1572 = vmatprep.subr.bf16.mxu1 %v1571_v61 }
  0x4a   : > { %1534 = vmatpush3.bf16.msra.mxu0 %v1533_v11 }
  0x4b   : > { %1536 = vmatprep.subr.bf16.mxu0 %v1535_v15  ;;  %1574 = vmatpush3.bf16.msra.mxu1 %v1571_v61 }
  0x4e   : > { %1538 = vmatpush3.bf16.msra.mxu0 %v1537_v19 }
  0x4f   : > { %1540 = vmatprep.subr.bf16.mxu0 %v1539_v22 }
  0x52   : > { %1542 = vmatpush3.bf16.msra.mxu0 %v1541_v23 }
  0x55   : > { %628 = vmatmul.mubr.f32.vlgmr.msra.gmra.mrb[0].mxu0 %v531_v24 }
  0x56   : > { %632 = vmatprep.mubr.f32.mxu0 %v534_v25 }
  0x59   : > { %633 = vmatmul.mubr.f32.gmra.mrb[2].mxu0 %v533_v26 }
  0x5a   : > { %637 = vmatprep.mubr.f32.mxu0 %v536_v27 }
  0x5d   : > { %638 = vmatmul.mubr.f32.gmra.mrb[4].mxu0 %v535_v28 }
  0x5e   : > { %642 = vmatprep.mubr.f32.mxu0 %v538_v29 }
  0x61   : > { %643 = vmatmul.mubr.f32.gmra.mrb[6].mxu0 %v537_v30 }
  0x62   : > { %647 = vmatprep.mubr.f32.mxu0 %v540_v31 }
  0x65   : > { %648 = vmatmul.mubr.f32.gmra.mrb[8].mxu0 %v539_v32 }
  0x66   : > { %652 = vmatprep.mubr.f32.mxu0 %v542_v33 }
  0x69   : > { %653 = vmatmul.mubr.f32.gmra.mrb[10].mxu0 %v541_v34 }
  0x6a   : > { %657 = vmatprep.mubr.f32.mxu0 %v544_v35 }
  0x6d   : > { %658 = vmatmul.mubr.f32.gmra.mrb[12].mxu0 %v543_v36 }
  0x6e   : > { %662 = vmatprep.mubr.f32.mxu0 %v546_v37 }
  0x71   : > { %663 = vmatmul.mubr.f32.gmra.mrb[14].mxu0 %v545_v38 }
  0x72   : > { %667 = vmatprep.mubr.f32.mxu0 %v548_v39 }
  0x75   : > { %668 = vmatmul.mubr.f32.gmra.mrb[16].mxu0 %v547_v40 }
  0x76   : > { %672 = vmatprep.mubr.f32.mxu0 %v550_v41 }
  0x79   : > { %673 = vmatmul.mubr.f32.gmra.mrb[18].mxu0 %v549_v42 }
  0x7a   : > { %677 = vmatprep.mubr.f32.mxu0 %v552_v43 }
  0x7d   : > { %678 = vmatmul.mubr.f32.gmra.mrb[20].mxu0 %v551_v44 }
  0x7e   : > { %682 = vmatprep.mubr.f32.mxu0 %v554_v45 }
  0x81   : > { %683 = vmatmul.mubr.f32.gmra.mrb[22].mxu0 %v553_v46 }
  0x82   : > { %687 = vmatprep.mubr.f32.mxu0 %v556_v47  ;;  %v1734_v47 = vmov 0.0|0.0  }
  0x83   : > { %1575 = vmatprep.subr.bf16.mxu1 %v1734_v47  ;;  %1599 = vmatprep.subr.bf16.mxu0 %v1734_v47 }
  0x85   : > { %688 = vmatmul.mubr.f32.gmra.mrb[24].mxu0 %v555_v49  ;;  %v1736_v49 = vmov 0.0  }
  0x86   : > { %692 = vmatprep.mubr.f32.mxu0 %v558_v50 }
  0x89   : > { %693 = vmatmul.mubr.f32.gmra.mrb[26].mxu0 %v557_v51 }
  0x8a   : > { %697 = vmatprep.mubr.f32.mxu0 %v560_v52 }
  0x8d   : > { %698 = vmatmul.mubr.f32.gmra.mrb[28].mxu0 %v559_v53 }
  0x8e   : > { %702 = vmatprep.mubr.f32.mxu0 %v562_v54 }
  0x91   : > { %703 = vmatmul.mubr.f32.gmra.mrb[30].mxu0 %v561_v55 }
  0x92   : > { %1508 = vmatprep.mubr.msk.f32.mxu0 %vm1735_vm0, %v1736_v49 }
 0x128   : > { %v1271_v62 = vpop.f32.mrb[0].mxu0 }
 0x129   : > { %v1272_v63 = vpop.f32.mrb[1].mxu0 }
 0x12a   : > { %v1273_v0 = vadd.f32 %v1272_v63, %v1271_v62 }
 0x12c   : > { %v1274_v1 = vpop.f32.mrb[2].mxu0  ;;  %1417 = vmatprep.mubr.f32.mxu1 %v1273_v0 }
 0x12d   : > { %v1275_v2 = vpop.f32.mrb[3].mxu0 }
 0x12e   : > { %v1276_v3 = vadd.f32 %v1275_v2, %v1274_v1 }
 0x130   : > { %v1277_v4 = vpop.f32.mrb[4].mxu0  ;;  %1418 = vmatmul.mubr.f32.vlgmr.msra.gmra.mrb[0].mxu1 %v1276_v3 }
 0x131   : > { %v1278_v5 = vpop.f32.mrb[5].mxu0 }
 0x132   : > { %v1279_v6 = vadd.f32 %v1278_v5, %v1277_v4 }
 0x134   : > { %v1280_v7 = vpop.f32.mrb[6].mxu0  ;;  %1420 = vmatprep.mubr.f32.mxu1 %v1279_v6 }
 0x135   : > { %v1281_v8 = vpop.f32.mrb[7].mxu0 }
 0x136   : > { %v1282_v9 = vadd.f32 %v1281_v8, %v1280_v7 }
 0x138   : > { %v1283_v10 = vpop.f32.mrb[8].mxu0  ;;  %1421 = vmatmul.mubr.f32.gmra.mrb[2].mxu1 %v1282_v9 }
 0x139   : > { %v1284_v11 = vpop.f32.mrb[9].mxu0 }
 0x13a   : > { %v1285_v12 = vadd.f32 %v1284_v11, %v1283_v10 }
 0x13c   : > { %v1286_v13 = vpop.f32.mrb[10].mxu0  ;;  %1423 = vmatprep.mubr.f32.mxu1 %v1285_v12 }
 0x13d   : > { %v1287_v14 = vpop.f32.mrb[11].mxu0 }
 0x13e   : > { %v1288_v15 = vadd.f32 %v1287_v14, %v1286_v13 }
 0x140   : > { %v1289_v16 = vpop.f32.mrb[12].mxu0  ;;  %1424 = vmatmul.mubr.f32.gmra.mrb[4].mxu1 %v1288_v15 }
 0x141   : > { %v1290_v17 = vpop.f32.mrb[13].mxu0 }
 0x142   : > { %v1291_v19 = vadd.f32 %v1290_v17, %v1289_v16 }
 0x144   : > { %v1292_v20 = vpop.f32.mrb[14].mxu0  ;;  %1426 = vmatprep.mubr.f32.mxu1 %v1291_v19 }
 0x145   : > { %v1293_v21 = vpop.f32.mrb[15].mxu0 }
 0x146   : > { %v1294_v22 = vadd.f32 %v1293_v21, %v1292_v20 }
 0x148   : > { %v1295_v23 = vpop.f32.mrb[16].mxu0  ;;  %1427 = vmatmul.mubr.f32.gmra.mrb[6].mxu1 %v1294_v22 }
 0x149   : > { %v1296_v24 = vpop.f32.mrb[17].mxu0 }
 0x14a   : > { %v1297_v25 = vadd.f32 %v1296_v24, %v1295_v23 }
 0x14c   : > { %v1298_v26 = vpop.f32.mrb[18].mxu0  ;;  %1429 = vmatprep.mubr.f32.mxu1 %v1297_v25 }
 0x14d   : > { %v1299_v27 = vpop.f32.mrb[19].mxu0 }
 0x14e   : > { %v1300_v28 = vadd.f32 %v1299_v27, %v1298_v26 }
 0x150   : > { %v1301_v29 = vpop.f32.mrb[20].mxu0  ;;  %1430 = vmatmul.mubr.f32.gmra.mrb[8].mxu1 %v1300_v28 }
 0x151   : > { %v1302_v30 = vpop.f32.mrb[21].mxu0 }
 0x152   : > { %v1303_v31 = vadd.f32 %v1302_v30, %v1301_v29 }
 0x154   : > { %v1304_v32 = vpop.f32.mrb[22].mxu0  ;;  %1432 = vmatprep.mubr.f32.mxu1 %v1303_v31 }
 0x155   : > { %v1305_v33 = vpop.f32.mrb[23].mxu0 }
 0x156   : > { %v1306_v34 = vadd.f32 %v1305_v33, %v1304_v32 }
 0x158   : > { %v1307_v35 = vpop.f32.mrb[24].mxu0  ;;  %1433 = vmatmul.mubr.f32.gmra.mrb[10].mxu1 %v1306_v34 }
 0x159   : > { %v1308_v36 = vpop.f32.mrb[25].mxu0 }
 0x15a   : > { %v1309_v37 = vadd.f32 %v1308_v36, %v1307_v35 }
 0x15c   : > { %v1310_v38 = vpop.f32.mrb[26].mxu0  ;;  %1435 = vmatprep.mubr.f32.mxu1 %v1309_v37 }
 0x15d   : > { %v1311_v39 = vpop.f32.mrb[27].mxu0 }
 0x15e   : > { %v1312_v40 = vadd.f32 %v1311_v39, %v1310_v38 }
 0x160   : > { %v1313_v41 = vpop.f32.mrb[28].mxu0  ;;  %1436 = vmatmul.mubr.f32.gmra.mrb[12].mxu1 %v1312_v40 }
 0x161   : > { %v1314_v42 = vpop.f32.mrb[29].mxu0 }
 0x162   : > { %v1315_v43 = vadd.f32 %v1314_v42, %v1313_v41 }
 0x164   : > { %v1316_v44 = vpop.f32.mrb[30].mxu0  ;;  %1438 = vmatprep.mubr.f32.mxu1 %v1315_v43 }
 0x165   : > { %v1317_v45 = vpop.f32.mrb[31].mxu0 }
 0x166   : > { %v1318_v46 = vadd.f32 %v1317_v45, %v1316_v44 }
 0x168   : > { %1439 = vmatmul.mubr.f32.gmra.mrb[14].mxu1 %v1318_v46 }
 0x169   : > { %1473 = vmatprep.mubr.msk.f32.mxu1 %vm1735_vm0, %v1736_v49 }
 0x203   : > { %v1419_v50 = vpop.f32.mrb[0].mxu1 }
 0x204   : > { %v870_v51 = vmax.f32 %v1419_v50, 0.0  ;;  %v790_v52 = vpop.f32.mrb[1].mxu1 }
 0x205   : > { %v869_v53 = vmax.f32 %v790_v52, 0.0 }
 0x206   : > { %886 = vst [vmem:[%s2102_s1 + $0x8] sm:$0xff] %v870_v51  ;;  %v973_v54 = vmul.f32 %v870_v51, %v870_v51 }
 0x207   : > { %885 = vst [vmem:[%s2102_s1] sm:$0xff] %v869_v53  ;;  %v1576_v55 = vpack.c.bf16 %v870_v51, %v869_v53  ;;  %v972_v56 = vmul.f32 %v869_v53, %v869_v53  ;;  %v1737_v53 = vmov 1.0  }
 0x209   : > { %v1600_v57 = vpack.c.bf16 %v973_v54, %v972_v56  ;;  %1577 = vmatpush3.bf16.msra.mxu1 %v1576_v55  ;;  %v468_v54 = vld [vmem:[%s2138_s18 + $0x8] sm:$0xff]  ;;  %v469_v55 = vld [vmem:[%s2138_s18 + $0x10] sm:$0xff]  ;;  %v470_v56 = vld [vmem:[%s2138_s18 + $0x18] sm:$0xff] }
 0x20a   : > { %1578 = vmatprep.subr.bf16.mxu1 %v1734_v47 }
 0x20b   : > { %v1422_v58 = vpop.f32.mrb[2].mxu1  ;;  %1601 = vmatpush3.bf16.msra.mxu0 %v1600_v57  ;;  %v471_v57 = vld [vmem:[%s2138_s18 + $0x20] sm:$0xff] }
 0x20c   : > { %v872_v59 = vmax.f32 %v1422_v58, 0.0  ;;  %v800_v60 = vpop.f32.mrb[3].mxu1  ;;  %1602 = vmatprep.subr.bf16.mxu0 %v1734_v47  ;;  %v472_v58 = vld [vmem:[%s2138_s18 + $0x28] sm:$0xff] }
 0x20d   : > { %v871_v61 = vmax.f32 %v800_v60, 0.0  ;;  %v484_v60 = vsub.f32 %v468_v54, %v1856_v18 }
 0x20e   : > { %888 = vst [vmem:[%s2102_s1 + $0x18] sm:$0xff] %v872_v59  ;;  %v975_v62 = vmul.f32 %v872_v59, %v872_v59 }
 0x20f   : > { %887 = vst [vmem:[%s2102_s1 + $0x10] sm:$0xff] %v871_v61  ;;  %v1579_v63 = vpack.c.bf16 %v872_v59, %v871_v61  ;;  %v974_v0 = vmul.f32 %v871_v61, %v871_v61  ;;  %v485_v61 = vsub.f32 %v469_v55, %v1856_v18 }
 0x211   : > { %v1603_v1 = vpack.c.bf16 %v975_v62, %v974_v0  ;;  %1580 = vmatpush3.bf16.msra.mxu1 %v1579_v63  ;;  %v473_v62 = vld [vmem:[%s2138_s18 + $0x30] sm:$0xff]  ;;  %v474_v63 = vld [vmem:[%s2138_s18 + $0x38] sm:$0xff]  ;;  %v475_v0 = vld [vmem:[%s2138_s18 + $0x40] sm:$0xff] }
 0x212   : > { %1581 = vmatprep.subr.bf16.mxu1 %v1734_v47 }
 0x213   : > { %v1425_v2 = vpop.f32.mrb[4].mxu1  ;;  %1604 = vmatpush3.bf16.msra.mxu0 %v1603_v1  ;;  %v486_v1 = vsub.f32 %v470_v56, %v1856_v18 }
 0x214   : > { %v874_v3 = vmax.f32 %v1425_v2, 0.0  ;;  %v810_v4 = vpop.f32.mrb[5].mxu1  ;;  %1605 = vmatprep.subr.bf16.mxu0 %v1734_v47  ;;  %v487_v2 = vsub.f32 %v471_v57, %v1856_v18 }
 0x215   : > { %v873_v5 = vmax.f32 %v810_v4, 0.0  ;;  %v476_v4 = vld [vmem:[%s2138_s18 + $0x48] sm:$0xff] }
 0x216   : > { %890 = vst [vmem:[%s2102_s1 + $0x28] sm:$0xff] %v874_v3  ;;  %v977_v6 = vmul.f32 %v874_v3, %v874_v3 }
 0x217   : > { %889 = vst [vmem:[%s2102_s1 + $0x20] sm:$0xff] %v873_v5  ;;  %v1582_v7 = vpack.c.bf16 %v874_v3, %v873_v5  ;;  %v976_v8 = vmul.f32 %v873_v5, %v873_v5  ;;  %v488_v3 = vsub.f32 %v472_v58, %v1856_v18  ;;  %v477_v5 = vld [vmem:[%s2138_s18 + $0x50] sm:$0xff] }
 0x219   : > { %v1606_v9 = vpack.c.bf16 %v977_v6, %v976_v8  ;;  %1583 = vmatpush3.bf16.msra.mxu1 %v1582_v7  ;;  %v478_v6 = vld [vmem:[%s2138_s18 + $0x58] sm:$0xff]  ;;  %v489_v7 = vsub.f32 %v473_v62, %v1856_v18  ;;  %v490_v8 = vsub.f32 %v474_v63, %v1856_v18 }
 0x21a   : > { %1584 = vmatprep.subr.bf16.mxu1 %v1734_v47 }
 0x21b   : > { %v1428_v10 = vpop.f32.mrb[6].mxu1  ;;  %1607 = vmatpush3.bf16.msra.mxu0 %v1606_v9  ;;  %v491_v9 = vsub.f32 %v475_v0, %v1856_v18 }
 0x21c   : > { %v876_v11 = vmax.f32 %v1428_v10, 0.0  ;;  %v820_v12 = vpop.f32.mrb[7].mxu1  ;;  %1608 = vmatprep.subr.bf16.mxu0 %v1734_v47 }
 0x21d   : > { %v875_v13 = vmax.f32 %v820_v12, 0.0  ;;  %v480_v12 = vld [vmem:[%s2138_s18 + $0x68] sm:$0xff] }
 0x21e   : > { %892 = vst [vmem:[%s2102_s1 + $0x38] sm:$0xff] %v876_v11  ;;  %v979_v14 = vmul.f32 %v876_v11, %v876_v11 }
 0x21f   : > { %891 = vst [vmem:[%s2102_s1 + $0x30] sm:$0xff] %v875_v13  ;;  %v1585_v15 = vpack.c.bf16 %v876_v11, %v875_v13  ;;  %v978_v16 = vmul.f32 %v875_v13, %v875_v13  ;;  %v479_v11 = vld [vmem:[%s2138_s18 + $0x60] sm:$0xff]  ;;  %v481_v13 = vld [vmem:[%s2138_s18 + $0x70] sm:$0xff] }
 0x221   : > { %v1609_v17 = vpack.c.bf16 %v979_v14, %v978_v16  ;;  %1586 = vmatpush3.bf16.msra.mxu1 %v1585_v15  ;;  %v492_v14 = vsub.f32 %v476_v4, %v1856_v18  ;;  %v493_v15 = vsub.f32 %v477_v5, %v1856_v18  ;;  %v494_v16 = vsub.f32 %v478_v6, %v1856_v18 }
 0x222   : > { %1587 = vmatprep.subr.bf16.mxu1 %v1734_v47 }
 0x223   : > { %v1431_v19 = vpop.f32.mrb[8].mxu1  ;;  %1610 = vmatpush3.bf16.msra.mxu0 %v1609_v17  ;;  %v500_v17 = vmul.f32 %v484_v60, %v1922_v48 }
 0x224   : > { %v878_v20 = vmax.f32 %v1431_v19, 0.0  ;;  %v830_v21 = vpop.f32.mrb[9].mxu1  ;;  %1611 = vmatprep.subr.bf16.mxu0 %v1734_v47  ;;  %v482_v19 = vld [vmem:[%s2138_s18 + $0x78] sm:$0xff] }
 0x225   : > { %v877_v22 = vmax.f32 %v830_v21, 0.0  ;;  %v496_v21 = vsub.f32 %v480_v12, %v1856_v18  ;;  %516 = vst [vmem:[%s2177_s22 + $0x8] sm:$0xff] %v500_v17 }
 0x226   : > { %894 = vst [vmem:[%s2102_s1 + $0x48] sm:$0xff] %v878_v20  ;;  %v981_v23 = vmul.f32 %v878_v20, %v878_v20 }
 0x227   : > { %893 = vst [vmem:[%s2102_s1 + $0x40] sm:$0xff] %v877_v22  ;;  %v1588_v24 = vpack.c.bf16 %v878_v20, %v877_v22  ;;  %v980_v25 = vmul.f32 %v877_v22, %v877_v22  ;;  %v495_v20 = vsub.f32 %v479_v11, %v1856_v18  ;;  %v497_v22 = vsub.f32 %v481_v13, %v1856_v18 }
 0x229   : > { %v1612_v26 = vpack.c.bf16 %v981_v23, %v980_v25  ;;  %1589 = vmatpush3.bf16.msra.mxu1 %v1588_v24  ;;  %v501_v23 = vmul.f32 %v485_v61, %v1922_v48  ;;  %v498_v24 = vsub.f32 %v482_v19, %v1856_v18  ;;  %v502_v25 = vmul.f32 %v486_v1, %v1922_v48 }
 0x22a   : > { %1590 = vmatprep.subr.bf16.mxu1 %v1734_v47 }
 0x22b   : > { %v1434_v27 = vpop.f32.mrb[10].mxu1  ;;  %1613 = vmatpush3.bf16.msra.mxu0 %v1612_v26  ;;  %v503_v26 = vmul.f32 %v487_v2, %v1922_v48  ;;  %517 = vst [vmem:[%s2177_s22 + $0x10] sm:$0xff] %v501_v23  ;;  %518 = vst [vmem:[%s2177_s22 + $0x18] sm:$0xff] %v502_v25 }
 0x22c   : > { %v880_v28 = vmax.f32 %v1434_v27, 0.0  ;;  %v840_v29 = vpop.f32.mrb[11].mxu1  ;;  %1614 = vmatprep.subr.bf16.mxu0 %v1734_v47  ;;  %v504_v27 = vmul.f32 %v488_v3, %v1922_v48 }
 0x22d   : > { %v879_v30 = vmax.f32 %v840_v29, 0.0  ;;  %v506_v29 = vmul.f32 %v490_v8, %v1922_v48  ;;  %519 = vst [vmem:[%s2177_s22 + $0x20] sm:$0xff] %v503_v26 }
 0x22e   : > { %896 = vst [vmem:[%s2102_s1 + $0x58] sm:$0xff] %v880_v28  ;;  %v983_v31 = vmul.f32 %v880_v28, %v880_v28  ;;  %520 = vst [vmem:[%s2177_s22 + $0x28] sm:$0xff] %v504_v27 }
 0x22f   : > { %895 = vst [vmem:[%s2102_s1 + $0x50] sm:$0xff] %v879_v30  ;;  %v1591_v32 = vpack.c.bf16 %v880_v28, %v879_v30  ;;  %v982_v33 = vmul.f32 %v879_v30, %v879_v30  ;;  %v505_v28 = vmul.f32 %v489_v7, %v1922_v48  ;;  %v507_v30 = vmul.f32 %v491_v9, %v1922_v48 }
 0x230   : > { %522 = vst [vmem:[%s2177_s22 + $0x38] sm:$0xff] %v506_v29 }
 0x231   : > { %v1615_v34 = vpack.c.bf16 %v983_v31, %v982_v33  ;;  %1592 = vmatpush3.bf16.msra.mxu1 %v1591_v32  ;;  %v509_v31 = vmul.f32 %v493_v15, %v1922_v48  ;;  %v510_v32 = vmul.f32 %v494_v16, %v1922_v48  ;;  %v511_v33 = vmul.f32 %v495_v20, %v1922_v48 }
 0x232   : > { %1593 = vmatprep.subr.bf16.mxu1 %v1734_v47  ;;  %521 = vst [vmem:[%s2177_s22 + $0x30] sm:$0xff] %v505_v28  ;;  %523 = vst [vmem:[%s2177_s22 + $0x40] sm:$0xff] %v507_v30 }
 0x233   : > { %v1437_v35 = vpop.f32.mrb[12].mxu1  ;;  %1616 = vmatpush3.bf16.msra.mxu0 %v1615_v34  ;;  %v512_v34 = vmul.f32 %v496_v21, %v1922_v48  ;;  %525 = vst [vmem:[%s2177_s22 + $0x50] sm:$0xff] %v509_v31  ;;  %526 = vst [vmem:[%s2177_s22 + $0x58] sm:$0xff] %v510_v32 }
 0x234   : > { %v882_v36 = vmax.f32 %v1437_v35, 0.0  ;;  %v850_v37 = vpop.f32.mrb[13].mxu1  ;;  %1617 = vmatprep.subr.bf16.mxu0 %v1734_v47  ;;  %v513_v35 = vmul.f32 %v497_v22, %v1922_v48  ;;  %527 = vst [vmem:[%s2177_s22 + $0x60] sm:$0xff] %v511_v33 }
 0x235   : > { %v881_v38 = vmax.f32 %v850_v37, 0.0  ;;  %528 = vst [vmem:[%s2177_s22 + $0x68] sm:$0xff] %v512_v34 }
 0x236   : > { %898 = vst [vmem:[%s2102_s1 + $0x68] sm:$0xff] %v882_v36  ;;  %v985_v39 = vmul.f32 %v882_v36, %v882_v36  ;;  %529 = vst [vmem:[%s2177_s22 + $0x70] sm:$0xff] %v513_v35 }
 0x237   : > { %897 = vst [vmem:[%s2102_s1 + $0x60] sm:$0xff] %v881_v38  ;;  %v1594_v40 = vpack.c.bf16 %v882_v36, %v881_v38  ;;  %v984_v41 = vmul.f32 %v881_v38, %v881_v38  ;;  %v514_v36 = vmul.f32 %v498_v24, %v1922_v48 }
 0x239   : > { %v1618_v42 = vpack.c.bf16 %v985_v39, %v984_v41  ;;  %1595 = vmatpush3.bf16.msra.mxu1 %v1594_v40  ;;  %530 = vst [vmem:[%s2177_s22 + $0x78] sm:$0xff] %v514_v36 }
 0x23a   : > { %1596 = vmatprep.subr.bf16.mxu1 %v1734_v47 }
 0x23b   : > { %v1440_v43 = vpop.f32.mrb[14].mxu1  ;;  %1619 = vmatpush3.bf16.msra.mxu0 %v1618_v42 }
 0x23c   : > { %v884_v44 = vmax.f32 %v1440_v43, 0.0  ;;  %v860_v45 = vpop.f32.mrb[15].mxu1  ;;  %1620 = vmatprep.subr.bf16.mxu0 %v1734_v47  ;;  %v467_v47 = vld [vmem:[%s2138_s18] sm:$0xff] }
 0x23d   : > { %v883_v46 = vmax.f32 %v860_v45, 0.0  ;;  %v483_v59 = vsub.f32 %v467_v47, %v1856_v18  ;;  %v508_v18 = vmul.f32 %v492_v14, %v1922_v48 }
 0x23e   : > { %900 = vst [vmem:[%s2102_s1 + $0x78] sm:$0xff] %v884_v44  ;;  %v987_v49 = vmul.f32 %v884_v44, %v884_v44 }
 0x23f   : > { %899 = vst [vmem:[%s2102_s1 + $0x70] sm:$0xff] %v883_v46  ;;  %v1597_v50 = vpack.c.bf16 %v884_v44, %v883_v46  ;;  %v986_v51 = vmul.f32 %v883_v46, %v883_v46  ;;  %v499_v10 = vmul.f32 %v483_v59, %v1922_v48  ;;  %524 = vst [vmem:[%s2177_s22 + $0x48] sm:$0xff] %v508_v18  ;;  %s1670_s1 = scalar_lea.vmem %s2210_s24, 2048 }
 0x240   : > { %p1671_p11 = scmp.ne.s32.totalorder %s2210_s24, %s1670_s1  ;;  %p1678_p1 = scmp.lt.s32.totalorder %s1676_s17, %s1670_s1 }
 0x241   : > { %v1621_v52 = vpack.c.bf16 %v987_v49, %v986_v51  ;;  %1598 = vmatpush3.bf16.msra.mxu1 %v1597_v50  ;;  %515 = vst [vmem:[%s2177_s22] sm:$0xff] %v499_v10 }
 0x242   : > { %p1672_p12 = pnand %p1671_p11, %p1824_p5  ;;  %p1679_p2 = por %p1678_p1, %p1677_p0 }
 0x243   : > { %1622 = vmatpush3.bf16.msra.mxu0 %v1621_v52 }
 0x244   : > { %1474 = vmatmul.mubr.f32.vlgmr.msra.gmra.mrb[16].mxu1 %v1737_v53  ;;  %p1673_p13 = pneg %p1672_p12 }
 0x246   : > { %1509 = vmatmul.mubr.f32.vlgmr.msra.gmra.mrb[32].mxu0 %v1737_v53  ;;  %p1680_p3 = pnand %p1679_p2, %p1673_p13 }
 0x248   : > { %1683 = shalt.err (!%p1680_p3)
}
 0x249   : > { %s1684_s18 = scalar_lea.hbm %s2202_s10, 2048  ;;  %s1688_s22 = scalar_lea.hbm %s2274_s5, 4096 }
 0x24a   : > { %p1685_p4 = scmp.ne.s32.totalorder %s2202_s10, %s1684_s18  ;;  %p1689_p9 = scmp.lt.u32.totalorder %s2202_s10, %s2274_s5 }
 0x24b   : > { %p1690_p10 = scmp.lt.u32.totalorder %s1688_s22, %s1684_s18  ;;  %p1692_p12 = scmp.lt.u32.totalorder %s1684_s18, %s2202_s10 }
 0x24c   : > { %p1686_p7 = pnand %p1685_p4, %p1824_p5 }
 0x24d   : > { %p1691_p11 = por %p1690_p10, %p1689_p9 }
 0x24e   : > { %p1687_p8 = pneg %p1686_p7 }
 0x24f   : > { %p1693_p13 = por %p1692_p12, %p1691_p11 }
 0x251   : > { %p1694_p0 = pnand %p1693_p13, %p1687_p8 }
 0x253   : > { %1697 = shalt.err (!%p1694_p0)
}
 0x254   : > { %s1739_s25 = smov 128   ;;  %s1740_s1 = smov 8  }
 0x255   : > { %1623 = dma.vmem_to_hbm [thread:$0]  (%p1824_p5), %s2210_s24, 2048, %s2202_s10, %s2220_s12, %s1739_s25, %s1739_s25, %s1740_s1  }
 0x256   : > { %p334_p1 = scmp.lt.s32.totalorder %s1807_s9, 1 }
 0x258   : > { %s2289_s9 = smov (!%p334_p1, %s1807_s9), 1 }
 0x259   : > { %s336_s17 = scalar_lea.vmem %s2276_s7, %s2289_s9  ;;  %s339_s20 = scalar_lea.vmem %s2277_s8, %s2289_s9 }
 0x317   : > { %v967_v48 = vpop.f32.mrb[16].mxu1 }
 0x318   : > { %971 = vst [vmem:[%s336_s17] sm:$0x1] %v967_v48  ;;  %v1475_v37 = vpop.f32.mrb[17].mxu1 }
 0x319   : > { %v1054_v38 = vpop.f32.mrb[32].mxu0 }
 0x31a   : > { %1058 = vst [vmem:[%s339_s20] sm:$0x1] %v1054_v38  ;;  %v1510_v39 = vpop.f32.mrb[33].mxu0 }
 0x31b PF: > { %p1629_p5 = scmp.ge.s32.totalorder %s1732_s30, 2  ;;  %s1109_s15 = sand.u32 1, %s1720_s27  }
 0x31c   : > { %s1110_s24 = scalar_lea.sflag [#allocation3], %s1109_s15 }
 0x31d   : > { %p1626_p2 = pnand %p1629_p5, %p1828_p6 }
 0x31f   : > { %1715 = dma.done.wait (!%p1626_p2), %s1110_s24, 2048  }
 0x320   : > { %1717 = vsyncadd (!%p1626_p2), %s1110_s24, 4294965248  ;;  %p19_p3 = scmp.ge.s32.totalorder %s1811_s11, 4   ;;  %s2282_s27 = smov %s1724_s28 }
 0x321   : > { %s2283_s28 = smov %s1728_s29  ;;  %s2284_s29 = smov %s1822_s14 }
 0x322   : > { %s2285_s30 = smov %s1811_s11  ;;  %21 = sbr.rel (!%p19_p3) target bundleno = 5 (0x5), region = 112 }
 0x329   :  { %1135 = vsyncpa [#allocation3], 1 }
 0x32a   :  { %1137 = vsyncpa [#allocation3 + $0x1], 1 }

</bundles_post_ra>
